<compile_context>
chip_gen: v7x
topology: tpu7x:2x2x1
jax: 0.10.0
libtpu: 0.0.40
codegen_flags: <defaults>
</compile_context>

<pallas_src>
import functools

import jax
import jax.numpy as jnp
from jax.experimental import pallas as pl
from jax.experimental.pallas import tpu as pltpu

_EPS = 1e-5
_TM_MAX = 512   # row tile for the tiled linear / prenet kernels
_TQ_MAX = 512   # query tile for the attention kernel


@functools.lru_cache(maxsize=None)
def _vmem_limit_bytes():
    # Use 3/4 of physical VMEM (v5e/v6e: 128 MiB, v7x: 64 MiB/TC); fall back to 64 MiB.
    try:
        return int(pltpu.get_tpu_info().vmem_capacity_bytes) * 3 // 4
    except Exception:
        return 64 * 1024 * 1024


def _pick_tm(m):
    return m if m <= _TM_MAX else _TM_MAX


def _pick_tq(T):
    if T <= _TQ_MAX:
        return T
    for tq in range(_TQ_MAX, 7, -1):
        if tq % 8 == 0 and T % tq == 0:
            return tq
    return T


def _round_up(n, m):
    return ((n + m - 1) // m) * m


def _mish(x):
    return x * jnp.tanh(jax.nn.softplus(x))


def _saln(x, gb, d_model):
    # LayerNorm (no affine) + style-adaptive gamma/beta. gb: (1, 2D) = [gamma|beta].
    mean = jnp.mean(x, axis=-1, keepdims=True)
    var = jnp.mean(jnp.square(x - mean), axis=-1, keepdims=True)
    xn = (x - mean) * jax.lax.rsqrt(var + _EPS)
    return gb[:, :d_model] * xn + gb[:, d_model:]


# ------------------------------------------------------------------ kernels ---

def _linear_kernel(x_ref, w_ref, b_ref, o_ref):
    y = jnp.dot(x_ref[...].astype(jnp.bfloat16), w_ref[...],
                preferred_element_type=jnp.float32) + b_ref[...]
    o_ref[...] = y.astype(o_ref.dtype)


def _linear_keep_kernel(x_ref, w_ref, b_ref, keep_ref, o_ref):
    # Linear + fused masked_fill(mask, 0) epilogue (keep = 1 - mask).
    y = jnp.dot(x_ref[...].astype(jnp.bfloat16), w_ref[...],
                preferred_element_type=jnp.float32) + b_ref[...]
    o_ref[...] = (y * keep_ref[...]).astype(o_ref.dtype)


def _prenet_kernel(x_ref, w1_ref, b1_ref, w2_ref, b2_ref, o_ref):
    # Linear -> Mish -> Linear fused; hidden (tm, D/2) stays in VMEM.
    h = jnp.dot(x_ref[...].astype(jnp.bfloat16), w1_ref[...],
                preferred_element_type=jnp.float32) + b1_ref[...]
    h = _mish(h)
    y = jnp.dot(h.astype(jnp.bfloat16), w2_ref[...],
                preferred_element_type=jnp.float32) + b2_ref[...]
    o_ref[...] = y.astype(o_ref.dtype)


def _mha_saln_kernel(x_ref, bias_ref, wq_ref, wk_ref, wv_ref, bq_ref, bk_ref, bv_ref,
                     wo_ref, bo_ref, gb_ref, keep_ref, o_ref, k_sc, v_sc,
                     *, n_head, d_model, tq, inv_temp):
    """Per (batch, query-tile): fused QKV proj + MHA + out-proj + residual + SALN0 + mask.

    K/V for the whole sequence are computed once per batch element (qt==0) into
    bf16 VMEM scratch and reused across query tiles.
    """
    qt = pl.program_id(1)
    D = d_model

    @pl.when(qt == 0)
    def _():
        x_full = x_ref[0].astype(jnp.bfloat16)                       # (T, D)
        for h in range(n_head):
            k_sc[h] = (jnp.dot(x_full, wk_ref[h], preferred_element_type=jnp.float32)
                       + bk_ref[h]).astype(jnp.bfloat16)             # (T, dk)
            v_sc[h] = (jnp.dot(x_full, wv_ref[h], preferred_element_type=jnp.float32)
                       + bv_ref[h]).astype(jnp.bfloat16)

    row0 = pl.multiple_of(qt * tq, tq)
    xq = x_ref[0, pl.ds(row0, tq), :]                                # (tq, D) f32, residual
    xq_bf = xq.astype(jnp.bfloat16)
    bias = bias_ref[0]                                               # (1, T) additive key bias

    o_acc = jnp.zeros((tq, D), jnp.float32)
    for h in range(n_head):                                          # n_head small & static
        # fold inv_temp into q: one (tq,dk) multiply instead of a (tq,T) one
        q = (jnp.dot(xq_bf, wq_ref[h], preferred_element_type=jnp.float32)
             + bq_ref[h]) * inv_temp
        s = jax.lax.dot_general(q.astype(jnp.bfloat16), k_sc[h],
                                (((1,), (1,)), ((), ())),
                                preferred_element_type=jnp.float32)  # (tq, T)
        s = s + bias
        s = s - jnp.max(s, axis=-1, keepdims=True)
        p = jnp.exp(s)                                               # unnormalized probs
        denom = jnp.sum(p, axis=-1, keepdims=True)
        ctx = jnp.dot(p.astype(jnp.bfloat16), v_sc[h],
                      preferred_element_type=jnp.float32)            # (tq, dk)
        ctx = ctx * pl.reciprocal(denom, approx=True)                # normalize after PV
        o_acc = o_acc + jnp.dot(ctx.astype(jnp.bfloat16), wo_ref[h],
                                preferred_element_type=jnp.float32)  # per-head out-proj acc

    o = o_acc + bo_ref[...] + xq                                     # bias + residual
    out = _saln(o, gb_ref[0], D)
    o_ref[0] = (out * keep_ref[0]).astype(o_ref.dtype)               # masked_fill


def _ffn_saln_kernel(x_ref, w1_ref, b1_ref, w2_ref, b2_ref, gb_ref, keep_ref, o_ref,
                     *, K1, K2):
    """Per batch element: conv1(K1) + Mish + conv2(K2) + residual + SALN1 + mask."""
    T = x_ref.shape[1]
    D = x_ref.shape[2]
    x = x_ref[0]                                                     # (T, D) f32

    def conv_same(inp_f32, w_ref_, b_ref_, K):
        cout = w_ref_.shape[2]
        pad = (K - 1) // 2
        acc = jnp.zeros((T, cout), jnp.float32)
        row = jax.lax.broadcasted_iota(jnp.int32, (T, 1), 0)
        for k in range(K):                                           # K tiny & static
            shift = pad - k
            if shift == 0:
                xk = inp_f32
            else:
                # halo via XLU roll; zero the wrapped boundary rows (keeps 'same' padding)
                xk = pltpu.roll(inp_f32, shift=shift % T, axis=0)
                if shift > 0:
                    xk = jnp.where(row >= shift, xk, 0.0)
                else:
                    xk = jnp.where(row < T + shift, xk, 0.0)
            acc = acc + jnp.dot(xk.astype(jnp.bfloat16), w_ref_[k],
                                preferred_element_type=jnp.float32)
        return acc + b_ref_[...]

    h = conv_same(x, w1_ref, b1_ref, K1)
    h = _mish(h)
    y = conv_same(h, w2_ref, b2_ref, K2)
    y = y + x                                                        # residual
    out = _saln(y, gb_ref[0], D)
    o_ref[0] = (out * keep_ref[0]).astype(o_ref.dtype)               # masked_fill


# ----------------------------------------------------------------- wrappers ---

def linear(x, w, b, keep=None):
    """Row-tiled linear. x: (M, Din), w: (Din, Dout) bf16, b: (Dout,).
    If keep ((M,1) float {0,1}) is given the pad-mask multiply is fused."""
    M, Din = x.shape
    Dout = w.shape[1]
    tm = _pick_tm(M)
    grid = (pl.cdiv(M, tm),)
    b2 = b.reshape(1, Dout)
    cp = pltpu.CompilerParams(dimension_semantics=("parallel",))
    if keep is None:
        return pl.pallas_call(
            _linear_kernel, grid=grid,
            out_shape=jax.ShapeDtypeStruct((M, Dout), jnp.float32),
            in_specs=[pl.BlockSpec((tm, Din), lambda i: (i, 0)),
                      pl.BlockSpec((Din, Dout), lambda i: (0, 0)),
                      pl.BlockSpec((1, Dout), lambda i: (0, 0))],
            out_specs=pl.BlockSpec((tm, Dout), lambda i: (i, 0)),
            compiler_params=cp,
        )(x, w, b2)
    return pl.pallas_call(
        _linear_keep_kernel, grid=grid,
        out_shape=jax.ShapeDtypeStruct((M, Dout), jnp.float32),
        in_specs=[pl.BlockSpec((tm, Din), lambda i: (i, 0)),
                  pl.BlockSpec((Din, Dout), lambda i: (0, 0)),
                  pl.BlockSpec((1, Dout), lambda i: (0, 0)),
                  pl.BlockSpec((tm, 1), lambda i: (i, 0))],
        out_specs=pl.BlockSpec((tm, Dout), lambda i: (i, 0)),
        compiler_params=cp,
    )(x, w, b2, keep)


def prenet(x, w1, b1, w2, b2):
    """Fused Linear -> Mish -> Linear, row-tiled. x: (M, D)."""
    M, D = x.shape
    Dh = w1.shape[1]
    tm = _pick_tm(M)
    return pl.pallas_call(
        _prenet_kernel, grid=(pl.cdiv(M, tm),),
        out_shape=jax.ShapeDtypeStruct((M, D), jnp.float32),
        in_specs=[pl.BlockSpec((tm, D), lambda i: (i, 0)),
                  pl.BlockSpec((D, Dh), lambda i: (0, 0)),
                  pl.BlockSpec((1, Dh), lambda i: (0, 0)),
                  pl.BlockSpec((Dh, D), lambda i: (0, 0)),
                  pl.BlockSpec((1, D), lambda i: (0, 0))],
        out_specs=pl.BlockSpec((tm, D), lambda i: (i, 0)),
        compiler_params=pltpu.CompilerParams(dimension_semantics=("parallel",)),
    )(x, w1, b1.reshape(1, Dh), w2, b2.reshape(1, D))


def mha_saln(x, key_bias, Lp, gb0, keep, n_head):
    """x: (B,T,D); key_bias: (B,1,T); gb0: (B,1,2D); keep: (B,T,1).
    Per-head weights: wq/wk/wv (H,D,dk), wo (H,dk,D); biases bq/bk/bv (H,1,dk)."""
    B, T, D = x.shape
    dk = D // n_head
    tq = _pick_tq(T)
    nqt = max(T // tq, 1)
    inv_temp = 1.0 / float(dk ** 0.5)
    kernel = functools.partial(_mha_saln_kernel, n_head=n_head, d_model=D,
                               tq=tq, inv_temp=inv_temp)
    return pl.pallas_call(
        kernel,
        grid=(B, nqt),
        out_shape=jax.ShapeDtypeStruct((B, T, D), jnp.float32),
        in_specs=[
            pl.BlockSpec((1, T, D), lambda b, q: (b, 0, 0)),        # x (resident over q)
            pl.BlockSpec((1, 1, T), lambda b, q: (b, 0, 0)),        # additive key bias
            pl.BlockSpec((n_head, D, dk), lambda b, q: (0, 0, 0)),  # wq
            pl.BlockSpec((n_head, D, dk), lambda b, q: (0, 0, 0)),  # wk
            pl.BlockSpec((n_head, D, dk), lambda b, q: (0, 0, 0)),  # wv
            pl.BlockSpec((n_head, 1, dk), lambda b, q: (0, 0, 0)),  # bq
            pl.BlockSpec((n_head, 1, dk), lambda b, q: (0, 0, 0)),  # bk
            pl.BlockSpec((n_head, 1, dk), lambda b, q: (0, 0, 0)),  # bv
            pl.BlockSpec((n_head, dk, D), lambda b, q: (0, 0, 0)),  # wo
            pl.BlockSpec((1, D), lambda b, q: (0, 0)),              # bo
            pl.BlockSpec((1, 1, 2 * D), lambda b, q: (b, 0, 0)),    # gb0
            pl.BlockSpec((1, tq, 1), lambda b, q: (b, q, 0)),       # keep
        ],
        out_specs=pl.BlockSpec((1, tq, D), lambda b, q: (b, q, 0)),
        scratch_shapes=[pltpu.VMEM((n_head, T, dk), jnp.bfloat16),  # K
                        pltpu.VMEM((n_head, T, dk), jnp.bfloat16)], # V
        compiler_params=pltpu.CompilerParams(
            dimension_semantics=("parallel", "arbitrary"),
            vmem_limit_bytes=_vmem_limit_bytes()),
    )(x, key_bias, Lp["wq"], Lp["wk"], Lp["wv"], Lp["bq"], Lp["bk"], Lp["bv"],
      Lp["wo"], Lp["bo"].reshape(1, D), gb0, keep)


def ffn_saln(x, w1, b1, w2, b2, gb, keep):
    """x: (B,T,D); w1: (K1,D,d_inner); w2: (K2,d_inner,D); gb: (B,1,2D); keep: (B,T,1)."""
    B, T, D = x.shape
    K1, _, d_inner = w1.shape
    K2 = w2.shape[0]
    return pl.pallas_call(
        functools.partial(_ffn_saln_kernel, K1=K1, K2=K2),
        grid=(B,),
        out_shape=jax.ShapeDtypeStruct((B, T, D), jnp.float32),
        in_specs=[
            pl.BlockSpec((1, T, D), lambda b: (b, 0, 0)),
            pl.BlockSpec((K1, D, d_inner), lambda b: (0, 0, 0)),
            pl.BlockSpec((1, d_inner), lambda b: (0, 0)),
            pl.BlockSpec((K2, d_inner, D), lambda b: (0, 0, 0)),
            pl.BlockSpec((1, D), lambda b: (0, 0)),
            pl.BlockSpec((1, 1, 2 * D), lambda b: (b, 0, 0)),
            pl.BlockSpec((1, T, 1), lambda b: (b, 0, 0)),
        ],
        out_specs=pl.BlockSpec((1, T, D), lambda b: (b, 0, 0)),
        compiler_params=pltpu.CompilerParams(
            dimension_semantics=("parallel",),
            vmem_limit_bytes=_vmem_limit_bytes()),
    )(x, w1, b1.reshape(1, d_inner), w2, b2.reshape(1, D), gb, keep)


# --------------------------------------------------------------- model glue ---

def fft_block(x, Lp, gb0, gb1, keep, key_bias, n_head):
    x = mha_saln(x, key_bias, Lp, gb0, keep, n_head)
    x = ffn_saln(x, Lp["w1"], Lp["b1"], Lp["w2"], Lp["b2"], gb1, keep)
    return x


def low_decoder_forward(params, enc_seq, style_vector, mask, *, n_head, n_mel):
    B, T, D = enc_seq.shape
    keep = (~mask).astype(jnp.float32)[:, :, None]                     # (B, T, 1)
    keep_flat = keep.reshape(B * T, 1)
    # (B, 1, T) additive key bias; the (H*B, T, T) mask is never materialized.
    key_bias = jnp.where(mask, jnp.float32(-1e30), jnp.float32(0.0))[:, None, :]

    # prenet: Linear -> Mish -> (Dropout) -> Linear, fused.
    x = prenet(enc_seq.reshape(B * T, D), params["pre_w1"], params["pre_b1"],
               params["pre_w2"], params["pre_b2"]).reshape(B, T, D)

    # ALL layers' SALN style projections in one tiny matmul (style const across layers).
    gb_all = linear(style_vector, params["saln_w_all"], params["saln_b_all"])  # (B, 4D*L)

    for l, Lp in enumerate(params["layers"]):
        off = 4 * D * l
        gb0 = gb_all[:, off:off + 2 * D].reshape(B, 1, 2 * D)
        gb1 = gb_all[:, off + 2 * D:off + 4 * D].reshape(B, 1, 2 * D)
        x = fft_block(x, Lp, gb0, gb1, keep, key_bias, n_head)

    # final projection with fused pad-mask epilogue; weights are lane-padded to 128,
    # slice back to n_mel outside the kernel (lane-dense stores inside).
    mel = linear(x.reshape(B * T, D), params["fc_w"], params["fc_b"], keep=keep_flat)
    mel_low = mel.reshape(B, T, -1)[:, :, :n_mel]
    return mel_low, None


# ------------------------------------------------------------------- params ---

def init_params(key, d_model, d_inner, n_head, fft_kernel, style_dim, n_layers, n_mel):
    keys = iter(jax.random.split(key, 128 * (n_layers + 2)))
    wdt = jnp.bfloat16   # MXU-native weight dtype; biases / accumulation stay f32
    D = d_model
    dk = D // n_head

    def uni(shape, s):
        return jax.random.uniform(next(keys), shape, jnp.float32, -s, s)

    def lin(din, dout):
        s = 1.0 / (din ** 0.5)
        return uni((din, dout), s).astype(wdt), uni((dout,), s)

    def conv(cin, cout, k):
        s = 1.0 / ((cin * k) ** 0.5)
        return uni((k, cin, cout), s).astype(wdt), uni((cout,), s)

    pre_w1, pre_b1 = lin(D, D // 2)
    pre_w2, pre_b2 = lin(D // 2, D)

    # lane-dense final projection: pad n_mel out to a multiple of 128 lanes.
    n_mel_pad = _round_up(n_mel, 128)
    fc_w_raw, fc_b_raw = lin(D, n_mel)
    fc_w = jnp.zeros((D, n_mel_pad), wdt).at[:, :n_mel].set(fc_w_raw)
    fc_b = jnp.zeros((n_mel_pad,), jnp.float32).at[:n_mel].set(fc_b_raw)

    saln_ws, saln_bs, layers = [], [], []
    for _ in range(n_layers):
        def head_lin(din, dout):
            # per-head layout (H, din, dout): head selection is a free leading index
            s = 1.0 / (din ** 0.5)
            return uni((n_head, din, dout), s).astype(wdt), uni((n_head, 1, dout), s)

        wq, bq = head_lin(D, dk)
        wk, bk = head_lin(D, dk)
        wv, bv = head_lin(D, dk)
        so = 1.0 / ((n_head * dk) ** 0.5)
        wo = uni((n_head, dk, D), so).astype(wdt)                    # out-proj per head
        bo = uni((D,), so)

        s0_w, _ = lin(style_dim, 2 * D)
        s1_w, _ = lin(style_dim, 2 * D)
        saln_bias = jnp.concatenate([jnp.ones((D,), jnp.float32),
                                     jnp.zeros((D,), jnp.float32)])  # gamma=1, beta=0
        saln_ws.append(jnp.concatenate([s0_w, s1_w], axis=1))        # (style, 4D)
        saln_bs.append(jnp.concatenate([saln_bias, saln_bias]))      # (4D,)

        w1, b1 = conv(D, d_inner, fft_kernel[0])
        w2, b2 = conv(d_inner, D, fft_kernel[1])
        layers.append({"wq": wq, "bq": bq, "wk": wk, "bk": bk, "wv": wv, "bv": bv,
                       "wo": wo, "bo": bo, "w1": w1, "b1": b1, "w2": w2, "b2": b2})

    return {"pre_w1": pre_w1, "pre_b1": pre_b1, "pre_w2": pre_w2, "pre_b2": pre_b2,
            "fc_w": fc_w, "fc_b": fc_b,
            "saln_w_all": jnp.concatenate(saln_ws, axis=1),          # (style, 4D*L)
            "saln_b_all": jnp.concatenate(saln_bs),                  # (4D*L,)
            "layers": layers}


# --------------------------------------------------------------------- main ---

if __name__ == "__main__":
    B, T = 2, 16
    d_model, n_head = 32, 2
    d_inner = 64
    style_dim = 16
    n_layers = 2
    fft_kernel = (3, 1)
    n_mel = 40

    key = jax.random.PRNGKey(0)
    kp, ke, ks = jax.random.split(key, 3)
    params = init_params(kp, d_model, d_inner, n_head, fft_kernel,
                         style_dim, n_layers, n_mel)

    enc_seq = jax.random.normal(ke, (B, T, d_model), jnp.float32)
    style_vector = jax.random.normal(ks, (B, style_dim), jnp.float32)
    lengths = jnp.array([T, T - 4], jnp.int32)
    mask = jnp.arange(T)[None, :] >= lengths[:, None]          # (B, T) bool, True = pad

    fwd = jax.jit(functools.partial(low_decoder_forward, n_head=n_head, n_mel=n_mel))
    mel_low, _ = fwd(params, enc_seq, style_vector, mask)
    mel_low = jax.block_until_ready(mel_low)

    assert mel_low.shape == (B, T, n_mel)
    assert bool(jnp.all(jnp.isfinite(mel_low)))
    assert bool(jnp.all(mel_low[1, T - 4:, :] == 0.0))          # padded frames zeroed
    print("KERNEL_OK")
</pallas_src>

<mosaic_0001>
module attributes {stable_mosaic.version = 11 : i64} {
  func.func @_linear_kernel(%arg0: i32, %arg1: memref<2x16xf32, #tpu.memory_space<vmem>>, %arg2: memref<16x256xbf16, #tpu.memory_space<vmem>>, %arg3: memref<1x256xf32, #tpu.memory_space<vmem>>, %arg4: memref<2x256xf32, #tpu.memory_space<vmem>>) attributes {dimension_semantics = [#tpu.dimension_semantics<parallel>], iteration_bounds = array<i64: 1>, scalar_prefetch = 0 : i64, scratch_operands = 0 : i64, tpu.core_type = #tpu.core_type<tc>, window_params = [{transform_indices = @transform_0, window_bounds = array<i64: 2, 16>}, {pipeline_mode = #tpu.pipeline_mode<synchronous>, transform_indices = @transform_1, window_bounds = array<i64: 16, 256>}, {pipeline_mode = #tpu.pipeline_mode<synchronous>, transform_indices = @transform_2, window_bounds = array<i64: 1, 256>}, {transform_indices = @transform_3, window_bounds = array<i64: 2, 256>}]} {
    %c0 = arith.constant 0 : index
    %c0_0 = arith.constant 0 : index
    %0 = vector.load %arg1[%c0, %c0_0] : memref<2x16xf32, #tpu.memory_space<vmem>>, vector<2x16xf32>
    %1 = arith.truncf %0 : vector<2x16xf32> to vector<2x16xbf16>
    %c0_1 = arith.constant 0 : index
    %c0_2 = arith.constant 0 : index
    %2 = vector.load %arg2[%c0_1, %c0_2] : memref<16x256xbf16, #tpu.memory_space<vmem>>, vector<16x256xbf16>
    %cst = arith.constant dense<0.000000e+00> : vector<2x256xf32>
    %3 = tpu.matmul %1, %2, %cst {dimension_numbers = #tpu.dot_dimension_numbers<[1], [0], [0], [1], [0, 0, 1, 1], [], []>} : vector<2x16xbf16>, vector<16x256xbf16>, vector<2x256xf32> -> vector<2x256xf32>
    %c0_3 = arith.constant 0 : index
    %c0_4 = arith.constant 0 : index
    %4 = vector.load %arg3[%c0_3, %c0_4] : memref<1x256xf32, #tpu.memory_space<vmem>>, vector<1x256xf32>
    %5 = vector.broadcast %4 : vector<1x256xf32> to vector<2x256xf32>
    %6 = arith.addf %3, %5 : vector<2x256xf32>
    %c0_5 = arith.constant 0 : index
    %c0_6 = arith.constant 0 : index
    %7 = vector.load %arg4[%c0_5, %c0_6] : memref<2x256xf32, #tpu.memory_space<vmem>>, vector<2x256xf32>
    tpu.vector_store %arg4[%c0_5, %c0_6], %6 {strides = array<i32>} : memref<2x256xf32, #tpu.memory_space<vmem>>, vector<2x256xf32>,
    return
  }
  func.func @transform_0(%arg0: i32) -> (i32, i32) {
    %c0_i32 = arith.constant 0 : i32
    %c0_i32_0 = arith.constant 0 : i32
    return %arg0, %c0_i32 : i32, i32
  }
  func.func @transform_1(%arg0: i32) -> (i32, i32) {
    %c0_i32 = arith.constant 0 : i32
    %c0_i32_0 = arith.constant 0 : i32
    %c0_i32_1 = arith.constant 0 : i32
    return %c0_i32, %c0_i32_0 : i32, i32
  }
  func.func @transform_2(%arg0: i32) -> (i32, i32) {
    %c0_i32 = arith.constant 0 : i32
    %c0_i32_0 = arith.constant 0 : i32
    %c0_i32_1 = arith.constant 0 : i32
    return %c0_i32, %c0_i32_0 : i32, i32
  }
  func.func @transform_3(%arg0: i32) -> (i32, i32) {
    %c0_i32 = arith.constant 0 : i32
    %c0_i32_0 = arith.constant 0 : i32
    return %arg0, %c0_i32 : i32, i32
  }
}

module attributes {stable_mosaic.version = 11 : i64} {
  func.func @_prenet_kernel(%arg0: i32, %arg1: memref<32x32xf32, #tpu.memory_space<vmem>>, %arg2: memref<32x16xbf16, #tpu.memory_space<vmem>>, %arg3: memref<1x16xf32, #tpu.memory_space<vmem>>, %arg4: memref<16x32xbf16, #tpu.memory_space<vmem>>, %arg5: memref<1x32xf32, #tpu.memory_space<vmem>>, %arg6: memref<32x32xf32, #tpu.memory_space<vmem>>) attributes {dimension_semantics = [#tpu.dimension_semantics<parallel>], iteration_bounds = array<i64: 1>, scalar_prefetch = 0 : i64, scratch_operands = 0 : i64, tpu.core_type = #tpu.core_type<tc>, window_params = [{transform_indices = @transform_0, window_bounds = array<i64: 32, 32>}, {pipeline_mode = #tpu.pipeline_mode<synchronous>, transform_indices = @transform_1, window_bounds = array<i64: 32, 16>}, {pipeline_mode = #tpu.pipeline_mode<synchronous>, transform_indices = @transform_2, window_bounds = array<i64: 1, 16>}, {pipeline_mode = #tpu.pipeline_mode<synchronous>, transform_indices = @transform_3, window_bounds = array<i64: 16, 32>}, {pipeline_mode = #tpu.pipeline_mode<synchronous>, transform_indices = @transform_4, window_bounds = array<i64: 1, 32>}, {transform_indices = @transform_5, window_bounds = array<i64: 32, 32>}]} {
    %c0 = arith.constant 0 : index
    %c0_0 = arith.constant 0 : index
    %0 = vector.load %arg1[%c0, %c0_0] : memref<32x32xf32, #tpu.memory_space<vmem>>, vector<32x32xf32>
    %1 = arith.truncf %0 : vector<32x32xf32> to vector<32x32xbf16>
    %c0_1 = arith.constant 0 : index
    %c0_2 = arith.constant 0 : index
    %2 = vector.load %arg2[%c0_1, %c0_2] : memref<32x16xbf16, #tpu.memory_space<vmem>>, vector<32x16xbf16>
    %cst = arith.constant dense<0.000000e+00> : vector<32x16xf32>
    %3 = tpu.matmul %1, %2, %cst {dimension_numbers = #tpu.dot_dimension_numbers<[1], [0], [0], [1], [0, 0, 1, 1], [], []>} : vector<32x32xbf16>, vector<32x16xbf16>, vector<32x16xf32> -> vector<32x16xf32>
    %c0_3 = arith.constant 0 : index
    %c0_4 = arith.constant 0 : index
    %4 = vector.load %arg3[%c0_3, %c0_4] : memref<1x16xf32, #tpu.memory_space<vmem>>, vector<1x16xf32>
    %5 = vector.broadcast %4 : vector<1x16xf32> to vector<32x16xf32>
    %6 = arith.addf %3, %5 : vector<32x16xf32>
    %cst_5 = arith.constant 0.000000e+00 : f32
    %7 = vector.broadcast %cst_5 : f32 to vector<32x16xf32>
    %8 = arith.maximumf %6, %7 : vector<32x16xf32>
    %9 = vector.broadcast %cst_5 : f32 to vector<32x16xf32>
    %10 = arith.subf %6, %9 : vector<32x16xf32>
    %11 = arith.cmpf one, %10, %10 : vector<32x16xf32>
    %12 = vector.broadcast %cst_5 : f32 to vector<32x16xf32>
    %13 = arith.addf %6, %12 : vector<32x16xf32>
    %14 = math.absf %10 : vector<32x16xf32>
    %cst_6 = arith.constant 0.000000e+00 : f32
    %15 = vector.broadcast %cst_6 : f32 to vector<32x16xf32>
    %16 = arith.subf %15, %14 : vector<32x16xf32>
    %17 = math.exp %16 : vector<32x16xf32>
    %18 = math.log1p %17 : vector<32x16xf32>
    %19 = arith.addf %8, %18 : vector<32x16xf32>
    %20 = arith.select %11, %13, %19 : vector<32x16xi1>, vector<32x16xf32>
    %21 = math.tanh %20 : vector<32x16xf32>
    %22 = arith.mulf %6, %21 : vector<32x16xf32>
    %23 = arith.truncf %22 : vector<32x16xf32> to vector<32x16xbf16>
    %c0_7 = arith.constant 0 : index
    %c0_8 = arith.constant 0 : index
    %24 = vector.load %arg4[%c0_7, %c0_8] : memref<16x32xbf16, #tpu.memory_space<vmem>>, vector<16x32xbf16>
    %cst_9 = arith.constant dense<0.000000e+00> : vector<32x32xf32>
    %25 = tpu.matmul %23, %24, %cst_9 {dimension_numbers = #tpu.dot_dimension_numbers<[1], [0], [0], [1], [0, 0, 1, 1], [], []>} : vector<32x16xbf16>, vector<16x32xbf16>, vector<32x32xf32> -> vector<32x32xf32>
    %c0_10 = arith.constant 0 : index
    %c0_11 = arith.constant 0 : index
    %26 = vector.load %arg5[%c0_10, %c0_11] : memref<1x32xf32, #tpu.memory_space<vmem>>, vector<1x32xf32>
    %27 = vector.broadcast %26 : vector<1x32xf32> to vector<32x32xf32>
    %28 = arith.addf %25, %27 : vector<32x32xf32>
    %c0_12 = arith.constant 0 : index
    %c0_13 = arith.constant 0 : index
    %29 = vector.load %arg6[%c0_12, %c0_13] : memref<32x32xf32, #tpu.memory_space<vmem>>, vector<32x32xf32>
    tpu.vector_store %arg6[%c0_12, %c0_13], %28 {strides = array<i32>} : memref<32x32xf32, #tpu.memory_space<vmem>>, vector<32x32xf32>,
    return
  }
  func.func @transform_0(%arg0: i32) -> (i32, i32) {
    %c0_i32 = arith.constant 0 : i32
    %c0_i32_0 = arith.constant 0 : i32
    return %arg0, %c0_i32 : i32, i32
  }
  func.func @transform_1(%arg0: i32) -> (i32, i32) {
    %c0_i32 = arith.constant 0 : i32
    %c0_i32_0 = arith.constant 0 : i32
    %c0_i32_1 = arith.constant 0 : i32
    return %c0_i32, %c0_i32_0 : i32, i32
  }
  func.func @transform_2(%arg0: i32) -> (i32, i32) {
    %c0_i32 = arith.constant 0 : i32
    %c0_i32_0 = arith.constant 0 : i32
    %c0_i32_1 = arith.constant 0 : i32
    return %c0_i32, %c0_i32_0 : i32, i32
  }
  func.func @transform_3(%arg0: i32) -> (i32, i32) {
    %c0_i32 = arith.constant 0 : i32
    %c0_i32_0 = arith.constant 0 : i32
    %c0_i32_1 = arith.constant 0 : i32
    return %c0_i32, %c0_i32_0 : i32, i32
  }
  func.func @transform_4(%arg0: i32) -> (i32, i32) {
    %c0_i32 = arith.constant 0 : i32
    %c0_i32_0 = arith.constant 0 : i32
    %c0_i32_1 = arith.constant 0 : i32
    return %c0_i32, %c0_i32_0 : i32, i32
  }
  func.func @transform_5(%arg0: i32) -> (i32, i32) {
    %c0_i32 = arith.constant 0 : i32
    %c0_i32_0 = arith.constant 0 : i32
    return %arg0, %c0_i32 : i32, i32
  }
}

module attributes {stable_mosaic.version = 11 : i64} {
  func.func @_ffn_saln_kernel(%arg0: i32, %arg1: memref<1x16x32xf32, #tpu.memory_space<vmem>>, %arg2: memref<3x32x64xbf16, #tpu.memory_space<vmem>>, %arg3: memref<1x64xf32, #tpu.memory_space<vmem>>, %arg4: memref<1x64x32xbf16, #tpu.memory_space<vmem>>, %arg5: memref<1x32xf32, #tpu.memory_space<vmem>>, %arg6: memref<1x1x64xf32, #tpu.memory_space<vmem>>, %arg7: memref<1x16x1xf32, #tpu.memory_space<vmem>>, %arg8: memref<1x16x32xf32, #tpu.memory_space<vmem>>) attributes {dimension_semantics = [#tpu.dimension_semantics<parallel>], iteration_bounds = array<i64: 2>, scalar_prefetch = 0 : i64, scratch_operands = 0 : i64, tpu.core_type = #tpu.core_type<tc>, window_params = [{transform_indices = @transform_0, window_bounds = array<i64: 1, 16, 32>}, {pipeline_mode = #tpu.pipeline_mode<synchronous>, transform_indices = @transform_1, window_bounds = array<i64: 3, 32, 64>}, {pipeline_mode = #tpu.pipeline_mode<synchronous>, transform_indices = @transform_2, window_bounds = array<i64: 1, 64>}, {pipeline_mode = #tpu.pipeline_mode<synchronous>, transform_indices = @transform_3, window_bounds = array<i64: 1, 64, 32>}, {pipeline_mode = #tpu.pipeline_mode<synchronous>, transform_indices = @transform_4, window_bounds = array<i64: 1, 32>}, {transform_indices = @transform_5, window_bounds = array<i64: 1, 1, 64>}, {transform_indices = @transform_6, window_bounds = array<i64: 1, 16, 1>}, {transform_indices = @transform_7, window_bounds = array<i64: 1, 16, 32>}]} {
    %c0 = arith.constant 0 : index
    %c0_0 = arith.constant 0 : index
    %c0_1 = arith.constant 0 : index
    %0 = vector.load %arg1[%c0, %c0_0, %c0_1] : memref<1x16x32xf32, #tpu.memory_space<vmem>>, vector<1x16x32xf32>
    %1 = vector.shape_cast %0 : vector<1x16x32xf32> to vector<16x32xf32>
    %cst = arith.constant 0.000000e+00 : f32
    %2 = vector.broadcast %cst : f32 to vector<16x64xf32>
    %3 = tpu.iota {dimensions = array<i32: 0>} : vector<16x1xi32>
    %c1_i32 = arith.constant 1 : i32
    %4 = tpu.dynamic_rotate %1 by %c1_i32 dim 0 : vector<16x32xf32>, i32 -> vector<16x32xf32>
    %c1_i32_2 = arith.constant 1 : i32
    %5 = vector.broadcast %c1_i32_2 : i32 to vector<16x1xi32>
    %6 = arith.cmpi sge, %3, %5 : vector<16x1xi32>
    %cst_3 = arith.constant 0.000000e+00 : f32
    %7 = vector.shape_cast %6 : vector<16x1xi1> to vector<16x1xi1>
    %8 = vector.broadcast %7 : vector<16x1xi1> to vector<16x32xi1>
    %9 = vector.broadcast %cst_3 : f32 to vector<16x32xf32>
    %10 = arith.select %8, %4, %9 : vector<16x32xi1>, vector<16x32xf32>
    %11 = arith.truncf %10 : vector<16x32xf32> to vector<16x32xbf16>
    %c0_4 = arith.constant 0 : index
    %c0_5 = arith.constant 0 : index
    %c0_6 = arith.constant 0 : index
    %12 = vector.load %arg2[%c0_4, %c0_5, %c0_6] : memref<3x32x64xbf16, #tpu.memory_space<vmem>>, vector<1x32x64xbf16>
    %13 = vector.shape_cast %12 : vector<1x32x64xbf16> to vector<32x64xbf16>
    %cst_7 = arith.constant dense<0.000000e+00> : vector<16x64xf32>
    %14 = tpu.matmul %11, %13, %cst_7 {dimension_numbers = #tpu.dot_dimension_numbers<[1], [0], [0], [1], [0, 0, 1, 1], [], []>} : vector<16x32xbf16>, vector<32x64xbf16>, vector<16x64xf32> -> vector<16x64xf32>
    %15 = arith.addf %2, %14 : vector<16x64xf32>
    %16 = arith.truncf %1 : vector<16x32xf32> to vector<16x32xbf16>
    %c1 = arith.constant 1 : index
    %c0_8 = arith.constant 0 : index
    %c0_9 = arith.constant 0 : index
    %17 = vector.load %arg2[%c1, %c0_8, %c0_9] : memref<3x32x64xbf16, #tpu.memory_space<vmem>>, vector<1x32x64xbf16>
    %18 = vector.shape_cast %17 : vector<1x32x64xbf16> to vector<32x64xbf16>
    %cst_10 = arith.constant dense<0.000000e+00> : vector<16x64xf32>
    %19 = tpu.matmul %16, %18, %cst_10 {dimension_numbers = #tpu.dot_dimension_numbers<[1], [0], [0], [1], [0, 0, 1, 1], [], []>} : vector<16x32xbf16>, vector<32x64xbf16>, vector<16x64xf32> -> vector<16x64xf32>
    %20 = arith.addf %15, %19 : vector<16x64xf32>
    %c15_i32 = arith.constant 15 : i32
    %21 = tpu.dynamic_rotate %1 by %c15_i32 dim 0 : vector<16x32xf32>, i32 -> vector<16x32xf32>
    %c15_i32_11 = arith.constant 15 : i32
    %22 = vector.broadcast %c15_i32_11 : i32 to vector<16x1xi32>
    %23 = arith.cmpi slt, %3, %22 : vector<16x1xi32>
    %cst_12 = arith.constant 0.000000e+00 : f32
    %24 = vector.shape_cast %23 : vector<16x1xi1> to vector<16x1xi1>
    %25 = vector.broadcast %24 : vector<16x1xi1> to vector<16x32xi1>
    %26 = vector.broadcast %cst_12 : f32 to vector<16x32xf32>
    %27 = arith.select %25, %21, %26 : vector<16x32xi1>, vector<16x32xf32>
    %28 = arith.truncf %27 : vector<16x32xf32> to vector<16x32xbf16>
    %c2 = arith.constant 2 : index
    %c0_13 = arith.constant 0 : index
    %c0_14 = arith.constant 0 : index
    %29 = vector.load %arg2[%c2, %c0_13, %c0_14] : memref<3x32x64xbf16, #tpu.memory_space<vmem>>, vector<1x32x64xbf16>
    %30 = vector.shape_cast %29 : vector<1x32x64xbf16> to vector<32x64xbf16>
    %cst_15 = arith.constant dense<0.000000e+00> : vector<16x64xf32>
    %31 = tpu.matmul %28, %30, %cst_15 {dimension_numbers = #tpu.dot_dimension_numbers<[1], [0], [0], [1], [0, 0, 1, 1], [], []>} : vector<16x32xbf16>, vector<32x64xbf16>, vector<16x64xf32> -> vector<16x64xf32>
    %32 = arith.addf %20, %31 : vector<16x64xf32>
    %c0_16 = arith.constant 0 : index
    %c0_17 = arith.constant 0 : index
    %33 = vector.load %arg3[%c0_16, %c0_17] : memref<1x64xf32, #tpu.memory_space<vmem>>, vector<1x64xf32>
    %34 = vector.broadcast %33 : vector<1x64xf32> to vector<16x64xf32>
    %35 = arith.addf %32, %34 : vector<16x64xf32>
    %cst_18 = arith.constant 0.000000e+00 : f32
    %36 = vector.broadcast %cst_18 : f32 to vector<16x64xf32>
    %37 = arith.maximumf %35, %36 : vector<16x64xf32>
    %38 = vector.broadcast %cst_18 : f32 to vector<16x64xf32>
    %39 = arith.subf %35, %38 : vector<16x64xf32>
    %40 = arith.cmpf one, %39, %39 : vector<16x64xf32>
    %41 = vector.broadcast %cst_18 : f32 to vector<16x64xf32>
    %42 = arith.addf %35, %41 : vector<16x64xf32>
    %43 = math.absf %39 : vector<16x64xf32>
    %cst_19 = arith.constant 0.000000e+00 : f32
    %44 = vector.broadcast %cst_19 : f32 to vector<16x64xf32>
    %45 = arith.subf %44, %43 : vector<16x64xf32>
    %46 = math.exp %45 : vector<16x64xf32>
    %47 = math.log1p %46 : vector<16x64xf32>
    %48 = arith.addf %37, %47 : vector<16x64xf32>
    %49 = arith.select %40, %42, %48 : vector<16x64xi1>, vector<16x64xf32>
    %50 = math.tanh %49 : vector<16x64xf32>
    %51 = arith.mulf %35, %50 : vector<16x64xf32>
    %cst_20 = arith.constant 0.000000e+00 : f32
    %52 = vector.broadcast %cst_20 : f32 to vector<16x32xf32>
    %53 = arith.truncf %51 : vector<16x64xf32> to vector<16x64xbf16>
    %c0_21 = arith.constant 0 : index
    %c0_22 = arith.constant 0 : index
    %c0_23 = arith.constant 0 : index
    %54 = vector.load %arg4[%c0_21, %c0_22, %c0_23] : memref<1x64x32xbf16, #tpu.memory_space<vmem>>, vector<1x64x32xbf16>
    %55 = vector.shape_cast %54 : vector<1x64x32xbf16> to vector<64x32xbf16>
    %cst_24 = arith.constant dense<0.000000e+00> : vector<16x32xf32>
    %56 = tpu.matmul %53, %55, %cst_24 {dimension_numbers = #tpu.dot_dimension_numbers<[1], [0], [0], [1], [0, 0, 1, 1], [], []>} : vector<16x64xbf16>, vector<64x32xbf16>, vector<16x32xf32> -> vector<16x32xf32>
    %57 = arith.addf %52, %56 : vector<16x32xf32>
    %c0_25 = arith.constant 0 : index
    %c0_26 = arith.constant 0 : index
    %58 = vector.load %arg5[%c0_25, %c0_26] : memref<1x32xf32, #tpu.memory_space<vmem>>, vector<1x32xf32>
    %59 = vector.broadcast %58 : vector<1x32xf32> to vector<16x32xf32>
    %60 = arith.addf %57, %59 : vector<16x32xf32>
    %61 = arith.addf %60, %1 : vector<16x32xf32>
    %c0_27 = arith.constant 0 : index
    %c0_28 = arith.constant 0 : index
    %c0_29 = arith.constant 0 : index
    %62 = vector.load %arg6[%c0_27, %c0_28, %c0_29] : memref<1x1x64xf32, #tpu.memory_space<vmem>>, vector<1x1x64xf32>
    %63 = vector.shape_cast %62 : vector<1x1x64xf32> to vector<1x64xf32>
    %cst_30 = arith.constant dense<0.000000e+00> : vector<16xf32>
    %64 = vector.multi_reduction <add>, %61, %cst_30 [1] : vector<16x32xf32> to vector<16xf32>
    %65 = vector.shape_cast %64 : vector<16xf32> to vector<16x1xf32>
    %cst_31 = arith.constant 3.200000e+01 : f32
    %66 = vector.broadcast %cst_31 : f32 to vector<16x1xf32>
    %67 = arith.divf %65, %66 : vector<16x1xf32>
    %68 = vector.broadcast %67 : vector<16x1xf32> to vector<16x32xf32>
    %69 = arith.subf %61, %68 : vector<16x32xf32>
    %70 = arith.mulf %69, %69 : vector<16x32xf32>
    %cst_32 = arith.constant dense<0.000000e+00> : vector<16xf32>
    %71 = vector.multi_reduction <add>, %70, %cst_32 [1] : vector<16x32xf32> to vector<16xf32>
    %72 = vector.shape_cast %71 : vector<16xf32> to vector<16x1xf32>
    %cst_33 = arith.constant 3.200000e+01 : f32
    %73 = vector.broadcast %cst_33 : f32 to vector<16x1xf32>
    %74 = arith.divf %72, %73 : vector<16x1xf32>
    %75 = vector.broadcast %67 : vector<16x1xf32> to vector<16x32xf32>
    %76 = arith.subf %61, %75 : vector<16x32xf32>
    %cst_34 = arith.constant 9.99999974E-6 : f32
    %77 = vector.broadcast %cst_34 : f32 to vector<16x1xf32>
    %78 = arith.addf %74, %77 : vector<16x1xf32>
    %79 = math.rsqrt %78 : vector<16x1xf32>
    %80 = vector.broadcast %79 : vector<16x1xf32> to vector<16x32xf32>
    %81 = arith.mulf %76, %80 : vector<16x32xf32>
    %82 = vector.extract_strided_slice %63 {offsets = [0, 0], sizes = [1, 32], strides = [1, 1]} : vector<1x64xf32> to vector<1x32xf32>
    %83 = vector.broadcast %82 : vector<1x32xf32> to vector<16x32xf32>
    %84 = arith.mulf %83, %81 : vector<16x32xf32>
    %85 = vector.extract_strided_slice %63 {offsets = [0, 32], sizes = [1, 32], strides = [1, 1]} : vector<1x64xf32> to vector<1x32xf32>
    %86 = vector.broadcast %85 : vector<1x32xf32> to vector<16x32xf32>
    %87 = arith.addf %84, %86 : vector<16x32xf32>
    %c0_35 = arith.constant 0 : index
    %c0_36 = arith.constant 0 : index
    %c0_37 = arith.constant 0 : index
    %88 = vector.load %arg7[%c0_35, %c0_36, %c0_37] : memref<1x16x1xf32, #tpu.memory_space<vmem>>, vector<1x16x1xf32>
    %89 = vector.shape_cast %88 : vector<1x16x1xf32> to vector<16x1xf32>
    %90 = vector.broadcast %89 : vector<16x1xf32> to vector<16x32xf32>
    %91 = arith.mulf %87, %90 : vector<16x32xf32>
    %c0_38 = arith.constant 0 : index
    %c0_39 = arith.constant 0 : index
    %c0_40 = arith.constant 0 : index
    %92 = vector.load %arg8[%c0_38, %c0_39, %c0_40] : memref<1x16x32xf32, #tpu.memory_space<vmem>>, vector<1x16x32xf32>
    %93 = vector.shape_cast %92 : vector<1x16x32xf32> to vector<16x32xf32>
    %94 = vector.shape_cast %91 : vector<16x32xf32> to vector<1x16x32xf32>
    tpu.vector_store %arg8[%c0_38, %c0_39, %c0_40], %94 {strides = array<i32>} : memref<1x16x32xf32, #tpu.memory_space<vmem>>, vector<1x16x32xf32>,
    return
  }
  func.func @transform_0(%arg0: i32) -> (i32, i32, i32) {
    %c0_i32 = arith.constant 0 : i32
    %c0_i32_0 = arith.constant 0 : i32
    %c0_i32_1 = arith.constant 0 : i32
    return %arg0, %c0_i32, %c0_i32_0 : i32, i32, i32
  }
  func.func @transform_1(%arg0: i32) -> (i32, i32, i32) {
    %c0_i32 = arith.constant 0 : i32
    %c0_i32_0 = arith.constant 0 : i32
    %c0_i32_1 = arith.constant 0 : i32
    %c0_i32_2 = arith.constant 0 : i32
    return %c0_i32, %c0_i32_0, %c0_i32_1 : i32, i32, i32
  }
  func.func @transform_2(%arg0: i32) -> (i32, i32) {
    %c0_i32 = arith.constant 0 : i32
    %c0_i32_0 = arith.constant 0 : i32
    %c0_i32_1 = arith.constant 0 : i32
    return %c0_i32, %c0_i32_0 : i32, i32
  }
  func.func @transform_3(%arg0: i32) -> (i32, i32, i32) {
    %c0_i32 = arith.constant 0 : i32
    %c0_i32_0 = arith.constant 0 : i32
    %c0_i32_1 = arith.constant 0 : i32
    %c0_i32_2 = arith.constant 0 : i32
    return %c0_i32, %c0_i32_0, %c0_i32_1 : i32, i32, i32
  }
  func.func @transform_4(%arg0: i32) -> (i32, i32) {
    %c0_i32 = arith.constant 0 : i32
    %c0_i32_0 = arith.constant 0 : i32
    %c0_i32_1 = arith.constant 0 : i32
    return %c0_i32, %c0_i32_0 : i32, i32
  }
  func.func @transform_5(%arg0: i32) -> (i32, i32, i32) {
    %c0_i32 = arith.constant 0 : i32
    %c0_i32_0 = arith.constant 0 : i32
    %c0_i32_1 = arith.constant 0 : i32
    return %arg0, %c0_i32, %c0_i32_0 : i32, i32, i32
  }
  func.func @transform_6(%arg0: i32) -> (i32, i32, i32) {
    %c0_i32 = arith.constant 0 : i32
    %c0_i32_0 = arith.constant 0 : i32
    %c0_i32_1 = arith.constant 0 : i32
    return %arg0, %c0_i32, %c0_i32_0 : i32, i32, i32
  }
  func.func @transform_7(%arg0: i32) -> (i32, i32, i32) {
    %c0_i32 = arith.constant 0 : i32
    %c0_i32_0 = arith.constant 0 : i32
    %c0_i32_1 = arith.constant 0 : i32
    return %arg0, %c0_i32, %c0_i32_0 : i32, i32, i32
  }
}

module attributes {stable_mosaic.version = 11 : i64} {
  func.func @_mha_saln_kernel(%arg0: i32, %arg1: i32, %arg2: memref<1x16x32xf32, #tpu.memory_space<vmem>>, %arg3: memref<1x1x16xf32, #tpu.memory_space<vmem>>, %arg4: memref<2x32x16xbf16, #tpu.memory_space<vmem>>, %arg5: memref<2x32x16xbf16, #tpu.memory_space<vmem>>, %arg6: memref<2x32x16xbf16, #tpu.memory_space<vmem>>, %arg7: memref<2x1x16xf32, #tpu.memory_space<vmem>>, %arg8: memref<2x1x16xf32, #tpu.memory_space<vmem>>, %arg9: memref<2x1x16xf32, #tpu.memory_space<vmem>>, %arg10: memref<2x16x32xbf16, #tpu.memory_space<vmem>>, %arg11: memref<1x32xf32, #tpu.memory_space<vmem>>, %arg12: memref<1x1x64xf32, #tpu.memory_space<vmem>>, %arg13: memref<1x16x1xf32, #tpu.memory_space<vmem>>, %arg14: memref<1x16x32xf32, #tpu.memory_space<vmem>>, %arg15: memref<2x16x16xbf16, #tpu.memory_space<vmem>>, %arg16: memref<2x16x16xbf16, #tpu.memory_space<vmem>>) attributes {dimension_semantics = [#tpu.dimension_semantics<parallel>, #tpu.dimension_semantics<arbitrary>], iteration_bounds = array<i64: 2, 1>, scalar_prefetch = 0 : i64, scratch_operands = 2 : i64, tpu.core_type = #tpu.core_type<tc>, window_params = [{transform_indices = @transform_0, window_bounds = array<i64: 1, 16, 32>}, {transform_indices = @transform_1, window_bounds = array<i64: 1, 1, 16>}, {pipeline_mode = #tpu.pipeline_mode<synchronous>, transform_indices = @transform_2, window_bounds = array<i64: 2, 32, 16>}, {pipeline_mode = #tpu.pipeline_mode<synchronous>, transform_indices = @transform_3, window_bounds = array<i64: 2, 32, 16>}, {pipeline_mode = #tpu.pipeline_mode<synchronous>, transform_indices = @transform_4, window_bounds = array<i64: 2, 32, 16>}, {pipeline_mode = #tpu.pipeline_mode<synchronous>, transform_indices = @transform_5, window_bounds = array<i64: 2, 1, 16>}, {pipeline_mode = #tpu.pipeline_mode<synchronous>, transform_indices = @transform_6, window_bounds = array<i64: 2, 1, 16>}, {pipeline_mode = #tpu.pipeline_mode<synchronous>, transform_indices = @transform_7, window_bounds = array<i64: 2, 1, 16>}, {pipeline_mode = #tpu.pipeline_mode<synchronous>, transform_indices = @transform_8, window_bounds = array<i64: 2, 16, 32>}, {pipeline_mode = #tpu.pipeline_mode<synchronous>, transform_indices = @transform_9, window_bounds = array<i64: 1, 32>}, {transform_indices = @transform_10, window_bounds = array<i64: 1, 1, 64>}, {transform_indices = @transform_11, window_bounds = array<i64: 1, 16, 1>}, {transform_indices = @transform_12, window_bounds = array<i64: 1, 16, 32>}]} {
    %c0_i32 = arith.constant 0 : i32
    %0 = arith.cmpi eq, %arg1, %c0_i32 : i32
    %1 = arith.extui %0 : i1 to i32
    %c0_i32_0 = arith.constant 0 : i32
    %2 = arith.cmpi ne, %1, %c0_i32_0 : i32
    scf.if %2 {
      %c0_64 = arith.constant 0 : index
      %c0_65 = arith.constant 0 : index
      %c0_66 = arith.constant 0 : index
      %117 = vector.load %arg2[%c0_64, %c0_65, %c0_66] : memref<1x16x32xf32, #tpu.memory_space<vmem>>, vector<1x16x32xf32>
      %118 = vector.shape_cast %117 : vector<1x16x32xf32> to vector<16x32xf32>
      %119 = arith.truncf %118 : vector<16x32xf32> to vector<16x32xbf16>
      %c0_67 = arith.constant 0 : index
      %c0_68 = arith.constant 0 : index
      %c0_69 = arith.constant 0 : index
      %120 = vector.load %arg5[%c0_67, %c0_68, %c0_69] : memref<2x32x16xbf16, #tpu.memory_space<vmem>>, vector<1x32x16xbf16>
      %121 = vector.shape_cast %120 : vector<1x32x16xbf16> to vector<32x16xbf16>
      %cst_70 = arith.constant dense<0.000000e+00> : vector<16x16xf32>
      %122 = tpu.matmul %119, %121, %cst_70 {dimension_numbers = #tpu.dot_dimension_numbers<[1], [0], [0], [1], [0, 0, 1, 1], [], []>} : vector<16x32xbf16>, vector<32x16xbf16>, vector<16x16xf32> -> vector<16x16xf32>
      %c0_71 = arith.constant 0 : index
      %c0_72 = arith.constant 0 : index
      %c0_73 = arith.constant 0 : index
      %123 = vector.load %arg8[%c0_71, %c0_72, %c0_73] : memref<2x1x16xf32, #tpu.memory_space<vmem>>, vector<1x1x16xf32>
      %124 = vector.shape_cast %123 : vector<1x1x16xf32> to vector<1x16xf32>
      %125 = vector.broadcast %124 : vector<1x16xf32> to vector<16x16xf32>
      %126 = arith.addf %122, %125 : vector<16x16xf32>
      %127 = arith.truncf %126 : vector<16x16xf32> to vector<16x16xbf16>
      %c0_74 = arith.constant 0 : index
      %c0_75 = arith.constant 0 : index
      %c0_76 = arith.constant 0 : index
      %128 = vector.load %arg15[%c0_74, %c0_75, %c0_76] : memref<2x16x16xbf16, #tpu.memory_space<vmem>>, vector<1x16x16xbf16>
      %129 = vector.shape_cast %128 : vector<1x16x16xbf16> to vector<16x16xbf16>
      %130 = vector.shape_cast %127 : vector<16x16xbf16> to vector<1x16x16xbf16>
      tpu.vector_store %arg15[%c0_74, %c0_75, %c0_76], %130 {strides = array<i32>} : memref<2x16x16xbf16, #tpu.memory_space<vmem>>, vector<1x16x16xbf16>,
      %c0_77 = arith.constant 0 : index
      %c0_78 = arith.constant 0 : index
      %c0_79 = arith.constant 0 : index
      %131 = vector.load %arg6[%c0_77, %c0_78, %c0_79] : memref<2x32x16xbf16, #tpu.memory_space<vmem>>, vector<1x32x16xbf16>
      %132 = vector.shape_cast %131 : vector<1x32x16xbf16> to vector<32x16xbf16>
      %cst_80 = arith.constant dense<0.000000e+00> : vector<16x16xf32>
      %133 = tpu.matmul %119, %132, %cst_80 {dimension_numbers = #tpu.dot_dimension_numbers<[1], [0], [0], [1], [0, 0, 1, 1], [], []>} : vector<16x32xbf16>, vector<32x16xbf16>, vector<16x16xf32> -> vector<16x16xf32>
      %c0_81 = arith.constant 0 : index
      %c0_82 = arith.constant 0 : index
      %c0_83 = arith.constant 0 : index
      %134 = vector.load %arg9[%c0_81, %c0_82, %c0_83] : memref<2x1x16xf32, #tpu.memory_space<vmem>>, vector<1x1x16xf32>
      %135 = vector.shape_cast %134 : vector<1x1x16xf32> to vector<1x16xf32>
      %136 = vector.broadcast %135 : vector<1x16xf32> to vector<16x16xf32>
      %137 = arith.addf %133, %136 : vector<16x16xf32>
      %138 = arith.truncf %137 : vector<16x16xf32> to vector<16x16xbf16>
      %c0_84 = arith.constant 0 : index
      %c0_85 = arith.constant 0 : index
      %c0_86 = arith.constant 0 : index
      %139 = vector.load %arg16[%c0_84, %c0_85, %c0_86] : memref<2x16x16xbf16, #tpu.memory_space<vmem>>, vector<1x16x16xbf16>
      %140 = vector.shape_cast %139 : vector<1x16x16xbf16> to vector<16x16xbf16>
      %141 = vector.shape_cast %138 : vector<16x16xbf16> to vector<1x16x16xbf16>
      tpu.vector_store %arg16[%c0_84, %c0_85, %c0_86], %141 {strides = array<i32>} : memref<2x16x16xbf16, #tpu.memory_space<vmem>>, vector<1x16x16xbf16>,
      %c1_87 = arith.constant 1 : index
      %c0_88 = arith.constant 0 : index
      %c0_89 = arith.constant 0 : index
      %142 = vector.load %arg5[%c1_87, %c0_88, %c0_89] : memref<2x32x16xbf16, #tpu.memory_space<vmem>>, vector<1x32x16xbf16>
      %143 = vector.shape_cast %142 : vector<1x32x16xbf16> to vector<32x16xbf16>
      %cst_90 = arith.constant dense<0.000000e+00> : vector<16x16xf32>
      %144 = tpu.matmul %119, %143, %cst_90 {dimension_numbers = #tpu.dot_dimension_numbers<[1], [0], [0], [1], [0, 0, 1, 1], [], []>} : vector<16x32xbf16>, vector<32x16xbf16>, vector<16x16xf32> -> vector<16x16xf32>
      %c1_91 = arith.constant 1 : index
      %c0_92 = arith.constant 0 : index
      %c0_93 = arith.constant 0 : index
      %145 = vector.load %arg8[%c1_91, %c0_92, %c0_93] : memref<2x1x16xf32, #tpu.memory_space<vmem>>, vector<1x1x16xf32>
      %146 = vector.shape_cast %145 : vector<1x1x16xf32> to vector<1x16xf32>
      %147 = vector.broadcast %146 : vector<1x16xf32> to vector<16x16xf32>
      %148 = arith.addf %144, %147 : vector<16x16xf32>
      %149 = arith.truncf %148 : vector<16x16xf32> to vector<16x16xbf16>
      %c1_94 = arith.constant 1 : index
      %c0_95 = arith.constant 0 : index
      %c0_96 = arith.constant 0 : index
      %150 = vector.load %arg15[%c1_94, %c0_95, %c0_96] : memref<2x16x16xbf16, #tpu.memory_space<vmem>>, vector<1x16x16xbf16>
      %151 = vector.shape_cast %150 : vector<1x16x16xbf16> to vector<16x16xbf16>
      %152 = vector.shape_cast %149 : vector<16x16xbf16> to vector<1x16x16xbf16>
      tpu.vector_store %arg15[%c1_94, %c0_95, %c0_96], %152 {strides = array<i32>} : memref<2x16x16xbf16, #tpu.memory_space<vmem>>, vector<1x16x16xbf16>,
      %c1_97 = arith.constant 1 : index
      %c0_98 = arith.constant 0 : index
      %c0_99 = arith.constant 0 : index
      %153 = vector.load %arg6[%c1_97, %c0_98, %c0_99] : memref<2x32x16xbf16, #tpu.memory_space<vmem>>, vector<1x32x16xbf16>
      %154 = vector.shape_cast %153 : vector<1x32x16xbf16> to vector<32x16xbf16>
      %cst_100 = arith.constant dense<0.000000e+00> : vector<16x16xf32>
      %155 = tpu.matmul %119, %154, %cst_100 {dimension_numbers = #tpu.dot_dimension_numbers<[1], [0], [0], [1], [0, 0, 1, 1], [], []>} : vector<16x32xbf16>, vector<32x16xbf16>, vector<16x16xf32> -> vector<16x16xf32>
      %c1_101 = arith.constant 1 : index
      %c0_102 = arith.constant 0 : index
      %c0_103 = arith.constant 0 : index
      %156 = vector.load %arg9[%c1_101, %c0_102, %c0_103] : memref<2x1x16xf32, #tpu.memory_space<vmem>>, vector<1x1x16xf32>
      %157 = vector.shape_cast %156 : vector<1x1x16xf32> to vector<1x16xf32>
      %158 = vector.broadcast %157 : vector<1x16xf32> to vector<16x16xf32>
      %159 = arith.addf %155, %158 : vector<16x16xf32>
      %160 = arith.truncf %159 : vector<16x16xf32> to vector<16x16xbf16>
      %c1_104 = arith.constant 1 : index
      %c0_105 = arith.constant 0 : index
      %c0_106 = arith.constant 0 : index
      %161 = vector.load %arg16[%c1_104, %c0_105, %c0_106] : memref<2x16x16xbf16, #tpu.memory_space<vmem>>, vector<1x16x16xbf16>
      %162 = vector.shape_cast %161 : vector<1x16x16xbf16> to vector<16x16xbf16>
      %163 = vector.shape_cast %160 : vector<16x16xbf16> to vector<1x16x16xbf16>
      tpu.vector_store %arg16[%c1_104, %c0_105, %c0_106], %163 {strides = array<i32>} : memref<2x16x16xbf16, #tpu.memory_space<vmem>>, vector<1x16x16xbf16>,
    } else {
    }
    %c16_i32 = arith.constant 16 : i32
    %3 = arith.muli %arg1, %c16_i32 : i32
    %4 = tpu.assume_multiple %3, 16 : i32
    %c0 = arith.constant 0 : index
    %5 = arith.index_cast %4 : i32 to index
    %c0_1 = arith.constant 0 : index
    %6 = vector.load %arg2[%c0, %5, %c0_1] : memref<1x16x32xf32, #tpu.memory_space<vmem>>, vector<1x16x32xf32>
    %7 = vector.shape_cast %6 : vector<1x16x32xf32> to vector<16x32xf32>
    %8 = arith.truncf %7 : vector<16x32xf32> to vector<16x32xbf16>
    %c0_2 = arith.constant 0 : index
    %c0_3 = arith.constant 0 : index
    %c0_4 = arith.constant 0 : index
    %9 = vector.load %arg3[%c0_2, %c0_3, %c0_4] : memref<1x1x16xf32, #tpu.memory_space<vmem>>, vector<1x1x16xf32>
    %10 = vector.shape_cast %9 : vector<1x1x16xf32> to vector<1x16xf32>
    %cst = arith.constant 0.000000e+00 : f32
    %11 = vector.broadcast %cst : f32 to vector<16x32xf32>
    %c0_5 = arith.constant 0 : index
    %c0_6 = arith.constant 0 : index
    %c0_7 = arith.constant 0 : index
    %12 = vector.load %arg4[%c0_5, %c0_6, %c0_7] : memref<2x32x16xbf16, #tpu.memory_space<vmem>>, vector<1x32x16xbf16>
    %13 = vector.shape_cast %12 : vector<1x32x16xbf16> to vector<32x16xbf16>
    %cst_8 = arith.constant dense<0.000000e+00> : vector<16x16xf32>
    %14 = tpu.matmul %8, %13, %cst_8 {dimension_numbers = #tpu.dot_dimension_numbers<[1], [0], [0], [1], [0, 0, 1, 1], [], []>} : vector<16x32xbf16>, vector<32x16xbf16>, vector<16x16xf32> -> vector<16x16xf32>
    %c0_9 = arith.constant 0 : index
    %c0_10 = arith.constant 0 : index
    %c0_11 = arith.constant 0 : index
    %15 = vector.load %arg7[%c0_9, %c0_10, %c0_11] : memref<2x1x16xf32, #tpu.memory_space<vmem>>, vector<1x1x16xf32>
    %16 = vector.shape_cast %15 : vector<1x1x16xf32> to vector<1x16xf32>
    %17 = vector.broadcast %16 : vector<1x16xf32> to vector<16x16xf32>
    %18 = arith.addf %14, %17 : vector<16x16xf32>
    %cst_12 = arith.constant 2.500000e-01 : f32
    %19 = vector.broadcast %cst_12 : f32 to vector<16x16xf32>
    %20 = arith.mulf %18, %19 : vector<16x16xf32>
    %21 = arith.truncf %20 : vector<16x16xf32> to vector<16x16xbf16>
    %c0_13 = arith.constant 0 : index
    %c0_14 = arith.constant 0 : index
    %c0_15 = arith.constant 0 : index
    %22 = vector.load %arg15[%c0_13, %c0_14, %c0_15] : memref<2x16x16xbf16, #tpu.memory_space<vmem>>, vector<1x16x16xbf16>
    %23 = vector.shape_cast %22 : vector<1x16x16xbf16> to vector<16x16xbf16>
    %cst_16 = arith.constant dense<0.000000e+00> : vector<16x16xf32>
    %24 = tpu.matmul %21, %23, %cst_16 {dimension_numbers = #tpu.dot_dimension_numbers<[1], [1], [0], [0], [0, 0, 1, 0], [], []>} : vector<16x16xbf16>, vector<16x16xbf16>, vector<16x16xf32> -> vector<16x16xf32>
    %25 = vector.broadcast %10 : vector<1x16xf32> to vector<16x16xf32>
    %26 = arith.addf %24, %25 : vector<16x16xf32>
    %cst_17 = arith.constant dense<0xFF800000> : vector<16xf32>
    %27 = vector.multi_reduction <maximumf>, %26, %cst_17 [1] : vector<16x16xf32> to vector<16xf32>
    %28 = vector.shape_cast %27 : vector<16xf32> to vector<16x1xf32>
    %29 = vector.broadcast %28 : vector<16x1xf32> to vector<16x16xf32>
    %30 = arith.subf %26, %29 : vector<16x16xf32>
    %31 = math.exp %30 : vector<16x16xf32>
    %cst_18 = arith.constant dense<0.000000e+00> : vector<16xf32>
    %32 = vector.multi_reduction <add>, %31, %cst_18 [1] : vector<16x16xf32> to vector<16xf32>
    %33 = vector.shape_cast %32 : vector<16xf32> to vector<16x1xf32>
    %34 = arith.truncf %31 : vector<16x16xf32> to vector<16x16xbf16>
    %c0_19 = arith.constant 0 : index
    %c0_20 = arith.constant 0 : index
    %c0_21 = arith.constant 0 : index
    %35 = vector.load %arg16[%c0_19, %c0_20, %c0_21] : memref<2x16x16xbf16, #tpu.memory_space<vmem>>, vector<1x16x16xbf16>
    %36 = vector.shape_cast %35 : vector<1x16x16xbf16> to vector<16x16xbf16>
    %cst_22 = arith.constant dense<0.000000e+00> : vector<16x16xf32>
    %37 = tpu.matmul %34, %36, %cst_22 {dimension_numbers = #tpu.dot_dimension_numbers<[1], [0], [0], [1], [0, 0, 1, 1], [], []>} : vector<16x16xbf16>, vector<16x16xbf16>, vector<16x16xf32> -> vector<16x16xf32>
    %38 = tpu.reciprocal %33 {approx = true} : vector<16x1xf32> -> vector<16x1xf32>
    %39 = vector.broadcast %38 : vector<16x1xf32> to vector<16x16xf32>
    %40 = arith.mulf %37, %39 : vector<16x16xf32>
    %41 = arith.truncf %40 : vector<16x16xf32> to vector<16x16xbf16>
    %c0_23 = arith.constant 0 : index
    %c0_24 = arith.constant 0 : index
    %c0_25 = arith.constant 0 : index
    %42 = vector.load %arg10[%c0_23, %c0_24, %c0_25] : memref<2x16x32xbf16, #tpu.memory_space<vmem>>, vector<1x16x32xbf16>
    %43 = vector.shape_cast %42 : vector<1x16x32xbf16> to vector<16x32xbf16>
    %cst_26 = arith.constant dense<0.000000e+00> : vector<16x32xf32>
    %44 = tpu.matmul %41, %43, %cst_26 {dimension_numbers = #tpu.dot_dimension_numbers<[1], [0], [0], [1], [0, 0, 1, 1], [], []>} : vector<16x16xbf16>, vector<16x32xbf16>, vector<16x32xf32> -> vector<16x32xf32>
    %45 = arith.addf %11, %44 : vector<16x32xf32>
    %c1 = arith.constant 1 : index
    %c0_27 = arith.constant 0 : index
    %c0_28 = arith.constant 0 : index
    %46 = vector.load %arg4[%c1, %c0_27, %c0_28] : memref<2x32x16xbf16, #tpu.memory_space<vmem>>, vector<1x32x16xbf16>
    %47 = vector.shape_cast %46 : vector<1x32x16xbf16> to vector<32x16xbf16>
    %cst_29 = arith.constant dense<0.000000e+00> : vector<16x16xf32>
    %48 = tpu.matmul %8, %47, %cst_29 {dimension_numbers = #tpu.dot_dimension_numbers<[1], [0], [0], [1], [0, 0, 1, 1], [], []>} : vector<16x32xbf16>, vector<32x16xbf16>, vector<16x16xf32> -> vector<16x16xf32>
    %c1_30 = arith.constant 1 : index
    %c0_31 = arith.constant 0 : index
    %c0_32 = arith.constant 0 : index
    %49 = vector.load %arg7[%c1_30, %c0_31, %c0_32] : memref<2x1x16xf32, #tpu.memory_space<vmem>>, vector<1x1x16xf32>
    %50 = vector.shape_cast %49 : vector<1x1x16xf32> to vector<1x16xf32>
    %51 = vector.broadcast %50 : vector<1x16xf32> to vector<16x16xf32>
    %52 = arith.addf %48, %51 : vector<16x16xf32>
    %cst_33 = arith.constant 2.500000e-01 : f32
    %53 = vector.broadcast %cst_33 : f32 to vector<16x16xf32>
    %54 = arith.mulf %52, %53 : vector<16x16xf32>
    %55 = arith.truncf %54 : vector<16x16xf32> to vector<16x16xbf16>
    %c1_34 = arith.constant 1 : index
    %c0_35 = arith.constant 0 : index
    %c0_36 = arith.constant 0 : index
    %56 = vector.load %arg15[%c1_34, %c0_35, %c0_36] : memref<2x16x16xbf16, #tpu.memory_space<vmem>>, vector<1x16x16xbf16>
    %57 = vector.shape_cast %56 : vector<1x16x16xbf16> to vector<16x16xbf16>
    %cst_37 = arith.constant dense<0.000000e+00> : vector<16x16xf32>
    %58 = tpu.matmul %55, %57, %cst_37 {dimension_numbers = #tpu.dot_dimension_numbers<[1], [1], [0], [0], [0, 0, 1, 0], [], []>} : vector<16x16xbf16>, vector<16x16xbf16>, vector<16x16xf32> -> vector<16x16xf32>
    %59 = vector.broadcast %10 : vector<1x16xf32> to vector<16x16xf32>
    %60 = arith.addf %58, %59 : vector<16x16xf32>
    %cst_38 = arith.constant dense<0xFF800000> : vector<16xf32>
    %61 = vector.multi_reduction <maximumf>, %60, %cst_38 [1] : vector<16x16xf32> to vector<16xf32>
    %62 = vector.shape_cast %61 : vector<16xf32> to vector<16x1xf32>
    %63 = vector.broadcast %62 : vector<16x1xf32> to vector<16x16xf32>
    %64 = arith.subf %60, %63 : vector<16x16xf32>
    %65 = math.exp %64 : vector<16x16xf32>
    %cst_39 = arith.constant dense<0.000000e+00> : vector<16xf32>
    %66 = vector.multi_reduction <add>, %65, %cst_39 [1] : vector<16x16xf32> to vector<16xf32>
    %67 = vector.shape_cast %66 : vector<16xf32> to vector<16x1xf32>
    %68 = arith.truncf %65 : vector<16x16xf32> to vector<16x16xbf16>
    %c1_40 = arith.constant 1 : index
    %c0_41 = arith.constant 0 : index
    %c0_42 = arith.constant 0 : index
    %69 = vector.load %arg16[%c1_40, %c0_41, %c0_42] : memref<2x16x16xbf16, #tpu.memory_space<vmem>>, vector<1x16x16xbf16>
    %70 = vector.shape_cast %69 : vector<1x16x16xbf16> to vector<16x16xbf16>
    %cst_43 = arith.constant dense<0.000000e+00> : vector<16x16xf32>
    %71 = tpu.matmul %68, %70, %cst_43 {dimension_numbers = #tpu.dot_dimension_numbers<[1], [0], [0], [1], [0, 0, 1, 1], [], []>} : vector<16x16xbf16>, vector<16x16xbf16>, vector<16x16xf32> -> vector<16x16xf32>
    %72 = tpu.reciprocal %67 {approx = true} : vector<16x1xf32> -> vector<16x1xf32>
    %73 = vector.broadcast %72 : vector<16x1xf32> to vector<16x16xf32>
    %74 = arith.mulf %71, %73 : vector<16x16xf32>
    %75 = arith.truncf %74 : vector<16x16xf32> to vector<16x16xbf16>
    %c1_44 = arith.constant 1 : index
    %c0_45 = arith.constant 0 : index
    %c0_46 = arith.constant 0 : index
    %76 = vector.load %arg10[%c1_44, %c0_45, %c0_46] : memref<2x16x32xbf16, #tpu.memory_space<vmem>>, vector<1x16x32xbf16>
    %77 = vector.shape_cast %76 : vector<1x16x32xbf16> to vector<16x32xbf16>
    %cst_47 = arith.constant dense<0.000000e+00> : vector<16x32xf32>
    %78 = tpu.matmul %75, %77, %cst_47 {dimension_numbers = #tpu.dot_dimension_numbers<[1], [0], [0], [1], [0, 0, 1, 1], [], []>} : vector<16x16xbf16>, vector<16x32xbf16>, vector<16x32xf32> -> vector<16x32xf32>
    %79 = arith.addf %45, %78 : vector<16x32xf32>
    %c0_48 = arith.constant 0 : index
    %c0_49 = arith.constant 0 : index
    %80 = vector.load %arg11[%c0_48, %c0_49] : memref<1x32xf32, #tpu.memory_space<vmem>>, vector<1x32xf32>
    %81 = vector.broadcast %80 : vector<1x32xf32> to vector<16x32xf32>
    %82 = arith.addf %79, %81 : vector<16x32xf32>
    %83 = arith.addf %82, %7 : vector<16x32xf32>
    %c0_50 = arith.constant 0 : index
    %c0_51 = arith.constant 0 : index
    %c0_52 = arith.constant 0 : index
    %84 = vector.load %arg12[%c0_50, %c0_51, %c0_52] : memref<1x1x64xf32, #tpu.memory_space<vmem>>, vector<1x1x64xf32>
    %85 = vector.shape_cast %84 : vector<1x1x64xf32> to vector<1x64xf32>
    %cst_53 = arith.constant dense<0.000000e+00> : vector<16xf32>
    %86 = vector.multi_reduction <add>, %83, %cst_53 [1] : vector<16x32xf32> to vector<16xf32>
    %87 = vector.shape_cast %86 : vector<16xf32> to vector<16x1xf32>
    %cst_54 = arith.constant 3.200000e+01 : f32
    %88 = vector.broadcast %cst_54 : f32 to vector<16x1xf32>
    %89 = arith.divf %87, %88 : vector<16x1xf32>
    %90 = vector.broadcast %89 : vector<16x1xf32> to vector<16x32xf32>
    %91 = arith.subf %83, %90 : vector<16x32xf32>
    %92 = arith.mulf %91, %91 : vector<16x32xf32>
    %cst_55 = arith.constant dense<0.000000e+00> : vector<16xf32>
    %93 = vector.multi_reduction <add>, %92, %cst_55 [1] : vector<16x32xf32> to vector<16xf32>
    %94 = vector.shape_cast %93 : vector<16xf32> to vector<16x1xf32>
    %cst_56 = arith.constant 3.200000e+01 : f32
    %95 = vector.broadcast %cst_56 : f32 to vector<16x1xf32>
    %96 = arith.divf %94, %95 : vector<16x1xf32>
    %97 = vector.broadcast %89 : vector<16x1xf32> to vector<16x32xf32>
    %98 = arith.subf %83, %97 : vector<16x32xf32>
    %cst_57 = arith.constant 9.99999974E-6 : f32
    %99 = vector.broadcast %cst_57 : f32 to vector<16x1xf32>
    %100 = arith.addf %96, %99 : vector<16x1xf32>
    %101 = math.rsqrt %100 : vector<16x1xf32>
    %102 = vector.broadcast %101 : vector<16x1xf32> to vector<16x32xf32>
    %103 = arith.mulf %98, %102 : vector<16x32xf32>
    %104 = vector.extract_strided_slice %85 {offsets = [0, 0], sizes = [1, 32], strides = [1, 1]} : vector<1x64xf32> to vector<1x32xf32>
    %105 = vector.broadcast %104 : vector<1x32xf32> to vector<16x32xf32>
    %106 = arith.mulf %105, %103 : vector<16x32xf32>
    %107 = vector.extract_strided_slice %85 {offsets = [0, 32], sizes = [1, 32], strides = [1, 1]} : vector<1x64xf32> to vector<1x32xf32>
    %108 = vector.broadcast %107 : vector<1x32xf32> to vector<16x32xf32>
    %109 = arith.addf %106, %108 : vector<16x32xf32>
    %c0_58 = arith.constant 0 : index
    %c0_59 = arith.constant 0 : index
    %c0_60 = arith.constant 0 : index
    %110 = vector.load %arg13[%c0_58, %c0_59, %c0_60] : memref<1x16x1xf32, #tpu.memory_space<vmem>>, vector<1x16x1xf32>
    %111 = vector.shape_cast %110 : vector<1x16x1xf32> to vector<16x1xf32>
    %112 = vector.broadcast %111 : vector<16x1xf32> to vector<16x32xf32>
    %113 = arith.mulf %109, %112 : vector<16x32xf32>
    %c0_61 = arith.constant 0 : index
    %c0_62 = arith.constant 0 : index
    %c0_63 = arith.constant 0 : index
    %114 = vector.load %arg14[%c0_61, %c0_62, %c0_63] : memref<1x16x32xf32, #tpu.memory_space<vmem>>, vector<1x16x32xf32>
    %115 = vector.shape_cast %114 : vector<1x16x32xf32> to vector<16x32xf32>
    %116 = vector.shape_cast %113 : vector<16x32xf32> to vector<1x16x32xf32>
    tpu.vector_store %arg14[%c0_61, %c0_62, %c0_63], %116 {strides = array<i32>} : memref<1x16x32xf32, #tpu.memory_space<vmem>>, vector<1x16x32xf32>,
    return
  }
  func.func @transform_0(%arg0: i32, %arg1: i32) -> (i32, i32, i32) {
    %c0_i32 = arith.constant 0 : i32
    %c0_i32_0 = arith.constant 0 : i32
    %c0_i32_1 = arith.constant 0 : i32
    return %arg0, %c0_i32, %c0_i32_0 : i32, i32, i32
  }
  func.func @transform_1(%arg0: i32, %arg1: i32) -> (i32, i32, i32) {
    %c0_i32 = arith.constant 0 : i32
    %c0_i32_0 = arith.constant 0 : i32
    %c0_i32_1 = arith.constant 0 : i32
    return %arg0, %c0_i32, %c0_i32_0 : i32, i32, i32
  }
  func.func @transform_2(%arg0: i32, %arg1: i32) -> (i32, i32, i32) {
    %c0_i32 = arith.constant 0 : i32
    %c0_i32_0 = arith.constant 0 : i32
    %c0_i32_1 = arith.constant 0 : i32
    %c0_i32_2 = arith.constant 0 : i32
    return %c0_i32, %c0_i32_0, %c0_i32_1 : i32, i32, i32
  }
  func.func @transform_3(%arg0: i32, %arg1: i32) -> (i32, i32, i32) {
    %c0_i32 = arith.constant 0 : i32
    %c0_i32_0 = arith.constant 0 : i32
    %c0_i32_1 = arith.constant 0 : i32
    %c0_i32_2 = arith.constant 0 : i32
    return %c0_i32, %c0_i32_0, %c0_i32_1 : i32, i32, i32
  }
  func.func @transform_4(%arg0: i32, %arg1: i32) -> (i32, i32, i32) {
    %c0_i32 = arith.constant 0 : i32
    %c0_i32_0 = arith.constant 0 : i32
    %c0_i32_1 = arith.constant 0 : i32
    %c0_i32_2 = arith.constant 0 : i32
    return %c0_i32, %c0_i32_0, %c0_i32_1 : i32, i32, i32
  }
  func.func @transform_5(%arg0: i32, %arg1: i32) -> (i32, i32, i32) {
    %c0_i32 = arith.constant 0 : i32
    %c0_i32_0 = arith.constant 0 : i32
    %c0_i32_1 = arith.constant 0 : i32
    %c0_i32_2 = arith.constant 0 : i32
    return %c0_i32, %c0_i32_0, %c0_i32_1 : i32, i32, i32
  }
  func.func @transform_6(%arg0: i32, %arg1: i32) -> (i32, i32, i32) {
    %c0_i32 = arith.constant 0 : i32
    %c0_i32_0 = arith.constant 0 : i32
    %c0_i32_1 = arith.constant 0 : i32
    %c0_i32_2 = arith.constant 0 : i32
    return %c0_i32, %c0_i32_0, %c0_i32_1 : i32, i32, i32
  }
  func.func @transform_7(%arg0: i32, %arg1: i32) -> (i32, i32, i32) {
    %c0_i32 = arith.constant 0 : i32
    %c0_i32_0 = arith.constant 0 : i32
    %c0_i32_1 = arith.constant 0 : i32
    %c0_i32_2 = arith.constant 0 : i32
    return %c0_i32, %c0_i32_0, %c0_i32_1 : i32, i32, i32
  }
  func.func @transform_8(%arg0: i32, %arg1: i32) -> (i32, i32, i32) {
    %c0_i32 = arith.constant 0 : i32
    %c0_i32_0 = arith.constant 0 : i32
    %c0_i32_1 = arith.constant 0 : i32
    %c0_i32_2 = arith.constant 0 : i32
    return %c0_i32, %c0_i32_0, %c0_i32_1 : i32, i32, i32
  }
  func.func @transform_9(%arg0: i32, %arg1: i32) -> (i32, i32) {
    %c0_i32 = arith.constant 0 : i32
    %c0_i32_0 = arith.constant 0 : i32
    %c0_i32_1 = arith.constant 0 : i32
    return %c0_i32, %c0_i32_0 : i32, i32
  }
  func.func @transform_10(%arg0: i32, %arg1: i32) -> (i32, i32, i32) {
    %c0_i32 = arith.constant 0 : i32
    %c0_i32_0 = arith.constant 0 : i32
    %c0_i32_1 = arith.constant 0 : i32
    return %arg0, %c0_i32, %c0_i32_0 : i32, i32, i32
  }
  func.func @transform_11(%arg0: i32, %arg1: i32) -> (i32, i32, i32) {
    %c0_i32 = arith.constant 0 : i32
    %c0_i32_0 = arith.constant 0 : i32
    return %arg0, %arg1, %c0_i32 : i32, i32, i32
  }
  func.func @transform_12(%arg0: i32, %arg1: i32) -> (i32, i32, i32) {
    %c0_i32 = arith.constant 0 : i32
    %c0_i32_0 = arith.constant 0 : i32
    return %arg0, %arg1, %c0_i32 : i32, i32, i32
  }
}

module attributes {stable_mosaic.version = 11 : i64} {
  func.func @_linear_keep_kernel(%arg0: i32, %arg1: memref<32x32xf32, #tpu.memory_space<vmem>>, %arg2: memref<32x128xbf16, #tpu.memory_space<vmem>>, %arg3: memref<1x128xf32, #tpu.memory_space<vmem>>, %arg4: memref<32x1xf32, #tpu.memory_space<vmem>>, %arg5: memref<32x128xf32, #tpu.memory_space<vmem>>) attributes {dimension_semantics = [#tpu.dimension_semantics<parallel>], iteration_bounds = array<i64: 1>, scalar_prefetch = 0 : i64, scratch_operands = 0 : i64, tpu.core_type = #tpu.core_type<tc>, window_params = [{transform_indices = @transform_0, window_bounds = array<i64: 32, 32>}, {pipeline_mode = #tpu.pipeline_mode<synchronous>, transform_indices = @transform_1, window_bounds = array<i64: 32, 128>}, {pipeline_mode = #tpu.pipeline_mode<synchronous>, transform_indices = @transform_2, window_bounds = array<i64: 1, 128>}, {transform_indices = @transform_3, window_bounds = array<i64: 32, 1>}, {transform_indices = @transform_4, window_bounds = array<i64: 32, 128>}]} {
    %c0 = arith.constant 0 : index
    %c0_0 = arith.constant 0 : index
    %0 = vector.load %arg1[%c0, %c0_0] : memref<32x32xf32, #tpu.memory_space<vmem>>, vector<32x32xf32>
    %1 = arith.truncf %0 : vector<32x32xf32> to vector<32x32xbf16>
    %c0_1 = arith.constant 0 : index
    %c0_2 = arith.constant 0 : index
    %2 = vector.load %arg2[%c0_1, %c0_2] : memref<32x128xbf16, #tpu.memory_space<vmem>>, vector<32x128xbf16>
    %cst = arith.constant dense<0.000000e+00> : vector<32x128xf32>
    %3 = tpu.matmul %1, %2, %cst {dimension_numbers = #tpu.dot_dimension_numbers<[1], [0], [0], [1], [0, 0, 1, 1], [], []>} : vector<32x32xbf16>, vector<32x128xbf16>, vector<32x128xf32> -> vector<32x128xf32>
    %c0_3 = arith.constant 0 : index
    %c0_4 = arith.constant 0 : index
    %4 = vector.load %arg3[%c0_3, %c0_4] : memref<1x128xf32, #tpu.memory_space<vmem>>, vector<1x128xf32>
    %5 = vector.broadcast %4 : vector<1x128xf32> to vector<32x128xf32>
    %6 = arith.addf %3, %5 : vector<32x128xf32>
    %c0_5 = arith.constant 0 : index
    %c0_6 = arith.constant 0 : index
    %7 = vector.load %arg4[%c0_5, %c0_6] : memref<32x1xf32, #tpu.memory_space<vmem>>, vector<32x1xf32>
    %8 = vector.broadcast %7 : vector<32x1xf32> to vector<32x128xf32>
    %9 = arith.mulf %6, %8 : vector<32x128xf32>
    %c0_7 = arith.constant 0 : index
    %c0_8 = arith.constant 0 : index
    %10 = vector.load %arg5[%c0_7, %c0_8] : memref<32x128xf32, #tpu.memory_space<vmem>>, vector<32x128xf32>
    tpu.vector_store %arg5[%c0_7, %c0_8], %9 {strides = array<i32>} : memref<32x128xf32, #tpu.memory_space<vmem>>, vector<32x128xf32>,
    return
  }
  func.func @transform_0(%arg0: i32) -> (i32, i32) {
    %c0_i32 = arith.constant 0 : i32
    %c0_i32_0 = arith.constant 0 : i32
    return %arg0, %c0_i32 : i32, i32
  }
  func.func @transform_1(%arg0: i32) -> (i32, i32) {
    %c0_i32 = arith.constant 0 : i32
    %c0_i32_0 = arith.constant 0 : i32
    %c0_i32_1 = arith.constant 0 : i32
    return %c0_i32, %c0_i32_0 : i32, i32
  }
  func.func @transform_2(%arg0: i32) -> (i32, i32) {
    %c0_i32 = arith.constant 0 : i32
    %c0_i32_0 = arith.constant 0 : i32
    %c0_i32_1 = arith.constant 0 : i32
    return %c0_i32, %c0_i32_0 : i32, i32
  }
  func.func @transform_3(%arg0: i32) -> (i32, i32) {
    %c0_i32 = arith.constant 0 : i32
    %c0_i32_0 = arith.constant 0 : i32
    return %arg0, %c0_i32 : i32, i32
  }
  func.func @transform_4(%arg0: i32) -> (i32, i32) {
    %c0_i32 = arith.constant 0 : i32
    %c0_i32_0 = arith.constant 0 : i32
    return %arg0, %c0_i32 : i32, i32
  }
}

</mosaic_0001>

<bundles_post_ra>
// kernel: low_decoder_forward.8
= control target key start
LH: loop header
LB: loop body
LE: loop exit
PB: predicated region body
PF: predicated region fallthrough
CT: control target
= control target key end

     0   :  { %v110_v1 = vmov 0   ;;  %vm41_vm0 = vcmask 130048   ;;  %v21_v5 = vlaneseq  ;;  %s146_s1 = inlined_call_operand.vmem [shape: bf16[16,256], index: 1, kind: input, shape index: {}]   ;;  %s147_s0 = inlined_call_operand.vmem [shape: f32[2,16], index: 0, kind: input, shape index: {}]   ;;  %s148_s2 = inlined_call_operand.vmem [shape: f32[1,256], index: 2, kind: input, shape index: {}]   ;;  %s149_s3 = inlined_call_operand.vmem [shape: f32[2,256], index: 3, kind: output, shape index: {}]  }
   0x1   :  { %v107_v0 = vld [vmem:[%s146_s1 + $0x4] ss:$8 sps:$4 sm:$0xff]   ;;  %77 = vmatprep.mubr.bf16.mxu0 %v110_v1  ;;  %v109_v2 = vld [vmem:[%s146_s1] ss:$8 sps:$4 sm:$0xff]  }
   0x2   :  { %v15_v3 = vld [vmem:[%s147_s0] sm:$0x3]  ;;  %45 = vmatprep.subr.bf16.mxu0 %v107_v0  ;;  %v22_v6 = vshrl.u32 %v21_v5, 7 }
   0x3   :  { %v16_v4 = vpack.c.bf16 %v15_v3, %v15_v3  ;;  %46 = vmatpush1.bf16.msra.mxu0 %v109_v2  ;;  %v19_v8 = vld [vmem:[%s148_s2] sm:$0x3] }
   0x4   :  { %v23_v7 = vsub.s32 0, %v22_v6  ;;  %v27_v9 = vsub.s32 1, %v22_v6 }
   0x6   :  { %104 = vmatmul.mubr.msk.bf16.vlgmr.msra.gmra.mrb[0].mxu0 %vm41_vm0, %v16_v4  ;;  %v24_v10 = vrot.slane %v19_v8, %v23_v7  ;;  %v28_v11 = vrot.slane %v19_v8, %v27_v9 }
  0xd9   :  { %v79_v12 = vpop.f32.mrb[0].mxu0 }
  0xda   :  { %v80_v13 = vadd.f32 %v79_v12, %v24_v10  ;;  %v81_v14 = vpop.f32.mrb[1].mxu0 }
  0xdb   :  { %v82_v15 = vadd.f32 %v81_v14, %v28_v11  ;;  %v83_v16 = vpop.f32.mrb[2].mxu0 }
  0xdc   :  { %v84_v17 = vpop.f32.mrb[3].mxu0 }
  0xdd   :  { %v88_v18 = vcombine.low %v80_v13, %v82_v15 }
  0xdf   :  { %105 = vst.sshfl [vmem:[%s149_s3] sm:$0x33 pattern:$0x76325410] %v88_v18 }

// kernel: low_decoder_forward.7
= control target key start
LH: loop header
LB: loop body
LE: loop exit
PB: predicated region body
PF: predicated region fallthrough
CT: control target
= control target key end

     0   :  { %vm51_vm0 = vcmask 261120   ;;  %s480_s0 = inlined_call_operand.vmem [shape: f32[32,32], index: 0, kind: input, shape index: {}]   ;;  %s481_s1 = inlined_call_operand.vmem [shape: bf16[32,16], index: 1, kind: input, shape index: {}]   ;;  %s482_s2 = inlined_call_operand.vmem [shape: f32[1,16], index: 2, kind: input, shape index: {}]   ;;  %s483_s3 = inlined_call_operand.vmem [shape: bf16[16,32], index: 3, kind: input, shape index: {}]   ;;  %s484_s4 = inlined_call_operand.vmem [shape: f32[1,32], index: 4, kind: input, shape index: {}]   ;;  %s485_s5 = inlined_call_operand.hbm [shape: f32[32,32], index: 5, kind: output, shape index: {}]  }
   0x1   :  { %v313_v0 = vld [vmem:[%s481_s1] sm:$0xff]   ;;  %v314_v1 = vld [vmem:[%s481_s1 + $0x8] sm:$0xff]   ;;  %v24_v4 = vld [vmem:[%s480_s0 + $0x10] sm:$0xff] }
   0x2   :  { %296 = vmatprep.subr.bf16.mxu0 %v313_v0  ;;  %v22_v2 = vld [vmem:[%s480_s0] sm:$0xff]  ;;  %v23_v3 = vld [vmem:[%s480_s0 + $0x8] sm:$0xff]  ;;  %v25_v6 = vld [vmem:[%s480_s0 + $0x18] sm:$0xff] }
   0x3   :  { %297 = vmatpush3.bf16.msra.mxu0 %v313_v0  ;;  %v26_v5 = vpack.c.bf16 %v23_v3, %v22_v2 }
   0x4   :  { %298 = vmatprep.subr.bf16.mxu0 %v314_v1 }
   0x5   :  { %10 = vsyncpa [#allocation3], 0  ;;  %300 = vmatprep.mubr.msk.bf16.mxu0 %vm51_vm0, %v26_v5  ;;  %v27_v7 = vpack.c.bf16 %v25_v6, %v24_v4  ;;  %v315_v8 = vld [vmem:[%s483_s3] sm:$0xff]   ;;  %vm204_vm9 = vcmask 130048   ;;  %s364_s3 = smov [#allocation2]  }
   0x6   :  { %304 = vmatprep.subr.bf16.mxu1 %v315_v8  ;;  %v280_v9 = vld [vmem:[%s482_s2] ss:$0 sm:$0xff]  ;;  %s269_s8 = sshll.u32 %s364_s3, 4  ;;  %s270_s8 = int_to_ptr.vmem [resolvable:$true] %s269_s8 }
   0x7   :  { %299 = vmatpush3.bf16.msra.mxu0 %v314_v1  ;;  %305 = vmatpush3.bf16.msra.mxu1 %v315_v8  ;;  %p345_p1 = scmp.lt.s32.totalorder %s270_s8, %s270_s8 }
   0xa   :  { %301 = vmatmul.mubr.msk.bf16.vlgmr.msra.gmra.mrb[0].mxu0 %vm51_vm0, %v27_v7 }
  0xdd   :  { %v302_v10 = vpop.f32.mrb[0].mxu0 }
  0xde   :  { %v423_v11 = vadd.f32 %v302_v10, %v280_v9  ;;  %v92_v12 = vpop.f32.mrb[1].mxu0 }
  0xdf   :  { %v425_v13 = vadd.f32 %v280_v9, %v92_v12  ;;  %v303_v14 = vpop.f32.mrb[2].mxu0 }
  0xe0   :  { %v121_v15 = vand.u32 2147483647, %v423_v11  ;;  %v428_v16 = vadd.f32 %v303_v14, %v280_v9  ;;  %v95_v17 = vpop.f32.mrb[3].mxu0  ;;  %v109_v48 = vmax.f32 %v423_v11, 0.0  ;;  %vm113_vm1 = vcmp.ne.f32.partialorder %v423_v11, %v423_v11 }
  0xe1   :  { %v119_v18 = vand.u32 2147483647, %v425_v13  ;;  %v431_v19 = vadd.f32 %v280_v9, %v95_v17  ;;  %v107_v49 = vmax.f32 %v425_v13, 0.0  ;;  %vm111_vm2 = vcmp.ne.f32.partialorder %v425_v13, %v425_v13 }
  0xe2   :  { %v125_v20 = vsub.f32 0.0, %v121_v15  ;;  %v122_v21 = vand.u32 2147483647, %v428_v16  ;;  %v110_v1 = vmax.f32 %v428_v16, 0.0  ;;  %vm114_vm7 = vcmp.ne.f32.partialorder %v428_v16, %v428_v16 }
  0xe3   :  { %v123_v22 = vsub.f32 0.0, %v119_v18  ;;  %v120_v23 = vand.u32 2147483647, %v431_v19  ;;  %v108_v8 = vmax.f32 %v431_v19, 0.0  ;;  %vm112_vm8 = vcmp.ne.f32.partialorder %v431_v19, %v431_v19 }
  0xe4   :  { %v131_v24 = vmul.f32 1.442695, %v125_v20  ;;  %v126_v25 = vsub.f32 0.0, %v122_v21 }
  0xe5   :  { %v127_v26 = vmul.f32 1.442695, %v123_v22  ;;  %v124_v27 = vsub.f32 0.0, %v120_v23 }
  0xe6   :  { %316 = vpow2.f32 %v131_v24  ;;  %v133_v28 = vmul.f32 1.442695, %v126_v25 }
  0xe7   :  { %318 = vpow2.f32 %v127_v26  ;;  %v129_v29 = vmul.f32 1.442695, %v124_v27 }
  0xe8   :  { %320 = vpow2.f32 %v133_v28  ;;  %v285_v28 = vld [vmem:[%s484_s4] ss:$0 sm:$0xff]  ;;  %s340_s4 = scalar_lea.vmem %s270_s8, 512 }
  0xe9   :  { %322 = vpow2.f32 %v129_v29  ;;  %p341_p0 = scmp.ne.s32.totalorder %s270_s8, %s340_s4  ;;  %p346_p2 = scmp.lt.s32.totalorder %s340_s4, %s340_s4 }
  0xeb   :  { %p347_p3 = por %p346_p2, %p345_p1 }
  0xed   :  { %p348_p4 = pnand %p347_p3, %p341_p0 }
  0xf0   :  { %v317_v30 = vpop.eup %316 }
  0xf1   :  { %v319_v31 = vpop.eup %318  ;;  %v153_v32 = vadd.f32 1.0, %v317_v30  ;;  %v156_v38 = vmul.f32 -0.5, %v317_v30  ;;  %v159_v43 = vand.u32 2147483647, %v317_v30 }
  0xf2   :  { %v321_v33 = vpop.eup %320  ;;  %v135_v34 = vadd.f32 1.0, %v319_v31  ;;  %v138_v39 = vmul.f32 -0.5, %v319_v31  ;;  %v141_v45 = vand.u32 2147483647, %v319_v31 }
  0xf3   :  { %v323_v35 = vpop.eup %322  ;;  %324 = vlog2.f32 %v153_v32  ;;  %v162_v36 = vadd.f32 1.0, %v321_v33  ;;  %v165_v40 = vmul.f32 -0.5, %v321_v33  ;;  %v157_v41 = vadd.f32 1.0, %v156_v38 }
  0xf4   :  { %326 = vlog2.f32 %v135_v34  ;;  %v144_v37 = vadd.f32 1.0, %v323_v35  ;;  %v147_v42 = vmul.f32 -0.5, %v323_v35  ;;  %v139_v44 = vadd.f32 1.0, %v138_v39 }
  0xf5   :  { %328 = vlog2.f32 %v162_v36  ;;  %v166_v46 = vadd.f32 1.0, %v165_v40  ;;  %v168_v50 = vand.u32 2147483647, %v321_v33  ;;  %v158_v53 = vmul.f32 %v317_v30, %v157_v41 }
  0xf6   :  { %330 = vlog2.f32 %v144_v37  ;;  %v148_v54 = vadd.f32 1.0, %v147_v42  ;;  %vm160_vm3 = vcmp.lt.f32.partialorder %v159_v43, 0.0004427343  ;;  %v140_v57 = vmul.f32 %v319_v31, %v139_v44 }
  0xf7   :  { %v150_v58 = vand.u32 2147483647, %v323_v35  ;;  %vm142_vm4 = vcmp.lt.f32.partialorder %v141_v45, 0.0004427343  ;;  %v167_v61 = vmul.f32 %v321_v33, %v166_v46  ;;  %vm169_vm5 = vcmp.lt.f32.partialorder %v168_v50, 0.0004427343 }
  0xf8   :  { %v149_v5 = vmul.f32 %v323_v35, %v148_v54 }
  0xf9   :  { %vm151_vm6 = vcmp.lt.f32.partialorder %v150_v58, 0.0004427343 }
  0xfd   :  { %v325_v47 = vpop.eup %324 }
  0xfe   :  { %v327_v51 = vpop.eup %326  ;;  %v155_v52 = vmul.f32 0.6931472, %v325_v47 }
  0xff   :  { %v329_v55 = vpop.eup %328  ;;  %v137_v56 = vmul.f32 0.6931472, %v327_v51 }
 0x100   :  { %v161_v59 = vsel %vm160_vm3, %v158_v53, %v155_v52  ;;  %v164_v60 = vmul.f32 0.6931472, %v329_v55  ;;  %v331_v62 = vpop.eup %330 }
 0x101   :  { %v173_v63 = vadd.f32 %v161_v59, %v109_v48  ;;  %v143_v0 = vsel %vm142_vm4, %v140_v57, %v137_v56  ;;  %v146_v4 = vmul.f32 0.6931472, %v331_v62 }
 0x102   :  { %v171_v2 = vadd.f32 %v143_v0, %v107_v49  ;;  %v170_v3 = vsel %vm169_vm5, %v167_v61, %v164_v60 }
 0x103   :  { %v177_v6 = vsel %vm113_vm1, %v423_v11, %v173_v63  ;;  %v174_v7 = vadd.f32 %v170_v3, %v110_v1  ;;  %v152_v10 = vsel %vm151_vm6, %v149_v5, %v146_v4 }
 0x104   :  { %332 = vtanh.f32 %v177_v6  ;;  %v175_v9 = vsel %vm111_vm2, %v425_v13, %v171_v2  ;;  %v172_v14 = vadd.f32 %v152_v10, %v108_v8 }
 0x105   :  { %334 = vtanh.f32 %v175_v9  ;;  %v178_v12 = vsel %vm114_vm7, %v428_v16, %v174_v7 }
 0x106   :  { %336 = vtanh.f32 %v178_v12  ;;  %v176_v15 = vsel %vm112_vm8, %v431_v19, %v172_v14 }
 0x107   :  { %338 = vtanh.f32 %v176_v15 }
 0x10e   :  { %v333_v17 = vpop.eup %332 }
 0x10f   :  { %v335_v18 = vpop.eup %334  ;;  %v185_v21 = vmul.f32 %v333_v17, %v423_v11 }
 0x110   :  { %v337_v20 = vpop.eup %336  ;;  %v183_v24 = vmul.f32 %v335_v18, %v425_v13 }
 0x111   :  { %v186_v22 = vmul.f32 %v337_v20, %v428_v16  ;;  %v339_v23 = vpop.eup %338 }
 0x112   :  { %v184_v25 = vmul.f32 %v339_v23, %v431_v19 }
 0x113   :  { %v188_v26 = vpack.c.bf16 %v186_v22, %v185_v21 }
 0x114   :  { %v187_v27 = vpack.c.bf16 %v184_v25, %v183_v24 }
 0x116   :  { %306 = vmatprep.mubr.msk.bf16.mxu1 %vm204_vm9, %v187_v27 }
 0x117   :  { %307 = vmatmul.mubr.msk.bf16.vlgmr.msra.gmra.mrb[0].mxu1 %vm204_vm9, %v188_v26 }
 0x1ea   :  { %v308_v29 = vpop.f32.mrb[0].mxu1 }
 0x1eb   :  { %v254_v30 = vadd.f32 %v308_v29, %v285_v28  ;;  %v245_v31 = vpop.f32.mrb[1].mxu1 }
 0x1ec   :  { %v246_v11 = vadd.f32 %v285_v28, %v245_v31  ;;  %v309_v16 = vpop.f32.mrb[2].mxu1 }
 0x1ed   :  { %262 = vst.msk [vmem:[#allocation2 + $0x10] sm:$0xff] %vm51_vm0, %v254_v30  ;;  %v257_v13 = vadd.f32 %v309_v16, %v285_v28  ;;  %v248_v19 = vpop.f32.mrb[3].mxu1 }
 0x1ee   :  { %260 = vst.msk [vmem:[#allocation2] sm:$0xff] %vm51_vm0, %v246_v11  ;;  %v249_v32 = vadd.f32 %v285_v28, %v248_v19 }
 0x1ef   :  { %263 = vst.msk [vmem:[#allocation2 + $0x18] sm:$0xff] %vm51_vm0, %v257_v13 }
 0x1f0   :  { %261 = vst.msk [vmem:[#allocation2 + $0x8] sm:$0xff] %vm51_vm0, %v249_v32 }
 0x1f1   :  { %351 = shalt.err (!%p348_p4)
}
 0x1f2   :  { %s352_s11 = scalar_lea.hbm %s485_s5, 512 }
 0x1f3   :  { %p353_p5 = scmp.ne.s32.totalorder %s485_s5, %s352_s11  ;;  %p356_p6 = scmp.lt.u32.totalorder %s352_s11, %s485_s5 }
 0x1f5   :  { %p358_p7 = pnand %p356_p6, %p353_p5 }
 0x1f7   :  { %361 = shalt.err (!%p358_p7)
}
 0x1f8   :  { %s365_s16 = smov 128   ;;  %s366_s17 = smov 8  }
 0x1f9   :  { %275 = dma.vmem_to_hbm [thread:$0]  %s270_s8, 512, %s485_s5, [#allocation3], %s365_s16, %s365_s16, %s366_s17  }
 0x1fa   :  { %362 = dma.done.wait [#allocation3], 512  }
 0x1fb   :  { %363 = vsyncadd [#allocation3], 4294966784 }
 0x1fc   :  { %279 = vsyncpa [#allocation3], 1 }

// kernel: low_decoder_forward.10
= control target key start
LH: loop header
LB: loop body
LE: loop exit
PB: predicated region body
PF: predicated region fallthrough
CT: control target
= control target key end

     0   :  { %s1970_s0 = inlined_call_operand.hbm [shape: f32[2,16,32], index: 0, kind: input, shape index: {}]   ;;  %s1971_s1 = inlined_call_operand.hbm [shape: bf16[3,32,64], index: 1, kind: input, shape index: {}]   ;;  %s1972_s2 = inlined_call_operand.hbm [shape: f32[1,64], index: 2, kind: input, shape index: {}]   ;;  %s1973_s3 = inlined_call_operand.hbm [shape: bf16[1,64,32], index: 3, kind: input, shape index: {}]   ;;  %s1974_s4 = inlined_call_operand.hbm [shape: f32[1,32], index: 4, kind: input, shape index: {}]   ;;  %s1975_s5 = inlined_call_operand.hbm [shape: f32[2,1,64], index: 5, kind: input, shape index: {}]   ;;  %s1976_s6 = inlined_call_operand.hbm [shape: f32[2,16,1], index: 6, kind: input, shape index: {}]   ;;  %s1977_s7 = inlined_call_operand.hbm [shape: f32[2,16,32], index: 7, kind: output, shape index: {}]  }
   0x1   :  { %1994 = sst [smem:[#allocation24_spill]] %s1971_s1 }
   0x2   :  { %1995 = sst [smem:[#allocation25_spill]] %s1973_s3 }
   0x3   :  { %1996 = sst [smem:[#allocation26_spill]] %s1975_s5 }
   0x4   :  { %12 = vsyncpa [#allocation3], 0 }
   0x5   :  { %14 = vsyncpa [#allocation3 + $0x1], 0 }
   0x6   :  { %15 = vsyncpa [#allocation6], 0 }
   0x7   :  { %16 = vsyncpa [#allocation9], 0 }
   0x8   :  { %17 = vsyncpa [#allocation12], 0 }
   0x9   :  { %19 = vsyncpa [#allocation12 + $0x1], 0 }
   0xa   :  { %20 = vsyncpa [#allocation4], 0 }
   0xb   :  { %22 = vsyncpa [#allocation4 + $0x1], 0  ;;  %s1572_s24 = smov 0   ;;  %s1574_s25 = smov 0  }
   0xc   :  { %s1576_s26 = smov 0   ;;  %s1578_s27 = smov 0  }
   0xd LB: > { %1997 = sst [smem:[#allocation20_spill]] %s1508_s26  ;;  %s1514_s28 = smov [#allocation5]   ;;  %s1512_s27 = sphi %s1578_s27, %s2028_s27   ;;  %s1508_s26 = sphi %s1576_s26, %s2030_s26   ;;  %s1504_s25 = sphi %s1574_s25, %s2032_s25   ;;  %s1500_s24 = sphi %s1572_s24, %s2031_s24  }
   0xe   : > { %s233_s29 = sshll.u32 %s1514_s28, 4  ;;  %s1593_s30 = sadd.s32 4294967295, %s1512_s27   ;;  %s1598_s29 = int_to_ptr.vmem [resolvable:$true] %s233_s29 }
   0xf   : > { %p1001_p0 = scmp.ge.s32.totalorder %s1512_s27, 1  ;;  %p1979_p1 = scmp.eq.s32.totalorder %s1593_s30, 0 }
  0x10   : > { %p221_p2 = scmp.lt.s32.totalorder %s1512_s27, 3  ;;  %s1515_s9 = smov [#allocation8]  }
  0x11   : > { %s257_s10 = sshll.u32 %s1515_s9, 4  ;;  %s2000_s1 = sld [smem:[#allocation24_spill]]  ;;  %s1613_s10 = int_to_ptr.vmem [resolvable:$true] %s257_s10 }
  0x12   : > { %p1600_p3 = pnand %p1001_p0, %p221_p2 }
  0x14   : > { %s1998_s8 = scalar_select %p1600_p3, 1, 0 }
  0x15   : > { %p1121_p5 = pneg %p1600_p3 }
  0x17   : > { %p1609_p6 = pnand %p1121_p5, %p1979_p1  ;;  %s1232_s14 = scalar_lea.hbm %s2000_s1, 768 }
  0x18   : > { %p1233_p7 = scmp.ne.s32.totalorder %s2000_s1, %s1232_s14  ;;  %p1239_p11 = scmp.lt.u32.totalorder %s1232_s14, %s2000_s1 }
  0x19   : > { %s1999_s11 = scalar_select %p1609_p6, 1, 0 }
  0x1a   : > { %p1623_p8 = pneg %p1609_p6 }
  0x1c   : > { %s2001_s17 = scalar_select %p1623_p8, 1, 0 }
  0x1d   : > { %p1235_p9 = pnand %p1623_p8, %p1233_p7 }
  0x1f   : > { %p1236_p10 = pneg %p1235_p9 }
  0x21   : > { %p1241_p12 = pnand %p1239_p11, %p1236_p10 }
  0x23   : > { %1244 = shalt.err (!%p1241_p12)
}
  0x24   : > { %s1245_s20 = scalar_lea.vmem %s1598_s29, 768  ;;  %p1253_p5 = scmp.lt.s32.totalorder %s1598_s29, %s1598_s29 }
  0x25   : > { %p1246_p13 = scmp.ne.s32.totalorder %s1598_s29, %s1245_s20  ;;  %p1254_p4 = scmp.lt.s32.totalorder %s1245_s20, %s1245_s20 }
  0x27   : > { %p1248_p0 = pnand %p1246_p13, %p1623_p8  ;;  %p1255_p7 = por %p1254_p4, %p1253_p5 }
  0x29   : > { %p1249_p2 = pneg %p1248_p0 }
  0x2b   : > { %p1256_p9 = pnand %p1255_p7, %p1249_p2 }
  0x2d   : > { %1259 = shalt.err (!%p1256_p9)
}
  0x2e   : > { %s1516_s21 = smov 64   ;;  %s1517_s22 = smov 4  }
  0x2f   : > { %1124 = dma.hbm_to_vmem [thread:$0]  (!%p1609_p6), %s2000_s1, 768, %s1598_s29, [#allocation6], %s1516_s21, %s1516_s21, %s1517_s22  }
  0x30   : > { %s2002_s3 = sld [smem:[#allocation25_spill]] }
  0x36   : > { %s1260_s13 = scalar_lea.hbm %s2002_s3, 512 }
  0x37   : > { %p1261_p4 = scmp.ne.s32.totalorder %s2002_s3, %s1260_s13  ;;  %p1267_p12 = scmp.lt.u32.totalorder %s1260_s13, %s2002_s3 }
  0x39   : > { %p1263_p10 = pnand %p1261_p4, %p1623_p8 }
  0x3b   : > { %p1264_p11 = pneg %p1263_p10 }
  0x3d   : > { %p1269_p13 = pnand %p1267_p12, %p1264_p11 }
  0x3f   : > { %1272 = shalt.err (!%p1269_p13)
}
  0x40   : > { %s1273_s29 = scalar_lea.vmem %s1613_s10, 512  ;;  %p1281_p7 = scmp.lt.s32.totalorder %s1613_s10, %s1613_s10 }
  0x41   : > { %p1274_p0 = scmp.ne.s32.totalorder %s1613_s10, %s1273_s29  ;;  %p1282_p9 = scmp.lt.s32.totalorder %s1273_s29, %s1273_s29 }
  0x43   : > { %p1276_p2 = pnand %p1274_p0, %p1623_p8  ;;  %p1283_p4 = por %p1282_p9, %p1281_p7 }
  0x45   : > { %p1277_p5 = pneg %p1276_p2 }
  0x47   : > { %p1284_p10 = pnand %p1283_p4, %p1277_p5 }
  0x49   : > { %1287 = shalt.err (!%p1284_p10)
}
  0x4a   : > { %1130 = dma.hbm_to_vmem [thread:$0]  (!%p1609_p6), %s2002_s3, 512, %s1613_s10, [#allocation9], %s1516_s21, %s1516_s21, %s1517_s22  }
  0x4b   : > { %s1000_s23 = sadd.s32 4294967294, %s1512_s27   ;;  %s1669_s28 = sadd.s32 1, %s1512_s27  }
  0x4c   : > { %2003 = sst [smem:[#allocation21_spill]] %s1669_s28  ;;  %s32_s9 = ssub.s32 %s1512_s27, %s1669_s28 }
  0x4d   : > { %s35_s12 = sadd.s32 1, %s1508_s26  ;;  %p33_p11 = scmp.eq.s32.totalorder %s32_s9, 0 }
  0x4e   : > { %p42_p12 = scmp.ne.s32.totalorder %s1508_s26, %s1504_s25  ;;  %p43_p13 = scmp.eq.s32.totalorder %s1512_s27, 0 }
  0x4f   : > { %p48_p0 = scmp.ne.s32.totalorder %s1504_s25, %s1500_s24  ;;  %p208_p7 = scmp.eq.s32.totalorder %s1593_s30, 1 }
  0x50   : > { %s1680_s13 = scalar_select %p33_p11, %s1508_s26, %s35_s12  }
  0x51   : > { %p44_p2 = por %p43_p13, %p42_p12  ;;  %p1684_p5 = por %p1979_p1, %p48_p0 }
  0x52   : > { %2004 = sst [smem:[#allocation22_spill]] %s1680_s13  ;;  %p214_p9 = scmp.eq.s32.totalorder %s1000_s23, 1 }
  0x53   : > { %s2005_s14 = scalar_select %p1684_p5, 1, 0 }
  0x54   : > { %p1152_p4 = scmp.lt.s32.totalorder %s1512_s27, 2  ;;  %s1691_s10 = sand.u32 1, %s1508_s26  }
  0x55   : > { %p1693_p10 = por %p208_p7, %p42_p12  ;;  %p1697_p3 = por %p214_p9, %p48_p0 }
  0x56   : > { %p1702_p11 = pnand %p1152_p4, %p44_p2  ;;  %s303_s18 = sand.u32 1, %s1512_s27  }
  0x57   : > { %s2006_s21 = scalar_select %p1693_p10, 1, 0 }
  0x58   : > { %s2007_s22 = scalar_select %p1697_p3, 1, 0 }
  0x59   : > { %s2009_s16 = scalar_select %p1702_p11, 1, 0 }
  0x5a   : > { %2008 = sst [smem:[#allocation23_spill]] %s2007_s22  ;;  %s1010_s29 = sshll.u32 %s1512_s27, 4 }
  0x5b   : > { %s306_s19 = scalar_lea.vmem [#allocation11], %s1691_s10  ;;  %s2010_s5 = sld [smem:[#allocation26_spill]] }
  0x5c   : > { %s313_s20 = sshll.u32 %s306_s19, 4  ;;  %s1716_s15 = scalar_lea.sflag [#allocation12], %s303_s18  ;;  %s1714_s20 = int_to_ptr.vmem [resolvable:$true] %s313_s20 }
  0x5d   : > { %p1722_p13 = pneg %p1702_p11 }
  0x5f   : > { %s2011_s3 = scalar_select %p1722_p13, 1, 0 }
  0x61   : > { %s1712_s12 = scalar_lea.hbm %s2010_s5, %s1010_s29  ;;  %s1293_s23 = scalar_lea.hbm %s2010_s5, 32 }
  0x62   : > { %s1288_s1 = scalar_lea.hbm %s1712_s12, 16  ;;  %p1294_p7 = scmp.lt.u32.totalorder %s1712_s12, %s2010_s5 }
  0x63   : > { %p1289_p12 = scmp.ne.s32.totalorder %s1712_s12, %s1288_s1  ;;  %p1295_p9 = scmp.lt.u32.totalorder %s1293_s23, %s1288_s1 }
  0x64   : > { %p1297_p1 = scmp.lt.u32.totalorder %s1288_s1, %s1712_s12 }
  0x65   : > { %p1291_p0 = pnand %p1722_p13, %p1289_p12  ;;  %p1296_p4 = por %p1295_p9, %p1294_p7 }
  0x67   : > { %p1292_p2 = pneg %p1291_p0  ;;  %p1298_p3 = por %p1297_p1, %p1296_p4 }
  0x69   : > { %p1299_p10 = pnand %p1298_p3, %p1292_p2 }
  0x6b   : > { %1302 = shalt.err (!%p1299_p10)
}
  0x6c   : > { %s1303_s18 = scalar_lea.vmem %s1714_s20, 16  ;;  %s1518_s29 = smov [#allocation11]  }
  0x6d   : > { %p1304_p12 = scmp.ne.s32.totalorder %s1714_s20, %s1303_s18  ;;  %s1308_s19 = sshll.u32 %s1518_s29, 4  ;;  %s1309_s19 = int_to_ptr.vmem [resolvable:$false] %s1308_s19 }
  0x6e   : > { %s1310_s13 = scalar_lea.vmem %s1309_s19, 32  ;;  %p1311_p6 = scmp.lt.s32.totalorder %s1714_s20, %s1309_s19 }
  0x6f   : > { %p1306_p0 = pnand %p1304_p12, %p1722_p13  ;;  %p1312_p8 = scmp.lt.s32.totalorder %s1310_s13, %s1303_s18 }
  0x71   : > { %p1307_p5 = pneg %p1306_p0  ;;  %p1313_p7 = por %p1312_p8, %p1311_p6 }
  0x73   : > { %p1314_p9 = pnand %p1313_p7, %p1307_p5 }
  0x75   : > { %1317 = shalt.err (!%p1314_p9)
}
  0x76   : > { %1140 = dma.hbm_to_vmem [thread:$0]  (!%p1702_p11), %s1712_s12, 16, %s1714_s20, %s1716_s15  }
  0x77   : > { %s2012_s1 = sshll.u32 %s1691_s10, 4  ;;  %s1519_s5 = smov [#allocation7]  }
  0x78   : > { %s324_s23 = scalar_lea.vmem [#allocation13], %s2012_s1  ;;  %s247_s29 = sshll.u32 %s1519_s5, 4  ;;  %s248_s29 = int_to_ptr.vmem [resolvable:$true] %s247_s29 }
  0x79   : > { %s331_s9 = sshll.u32 %s324_s23, 4  ;;  %s1318_s13 = scalar_lea.hbm %s1972_s2, 16  ;;  %s1748_s9 = int_to_ptr.vmem [resolvable:$true] %s331_s9 }
  0x7a   : > { %p1319_p1 = scmp.ne.s32.totalorder %s1972_s2, %s1318_s13  ;;  %p2013_p3 = scmp.ne.s32.totalorder %s2001_s17, 0 }
  0x7b   : > { %p1325_p5 = scmp.lt.u32.totalorder %s1318_s13, %s1972_s2 }
  0x7c   : > { %p1321_p6 = pnand %p1319_p1, %p2013_p3 }
  0x7e   : > { %p1322_p8 = pneg %p1321_p6 }
  0x80   : > { %p1327_p10 = pnand %p1325_p5, %p1322_p8 }
  0x82   : > { %1330 = shalt.err (!%p1327_p10)
}
  0x83   : > { %s1331_s5 = scalar_lea.vmem %s248_s29, 16  ;;  %s1338_s1 = scalar_lea.vmem %s248_s29, 32 }
  0x84   : > { %p1332_p2 = scmp.ne.s32.totalorder %s248_s29, %s1331_s5  ;;  %p1339_p0 = scmp.lt.s32.totalorder %s248_s29, %s248_s29 }
  0x85   : > { %p1340_p7 = scmp.lt.s32.totalorder %s1338_s1, %s1331_s5 }
  0x86   : > { %p1334_p4 = pnand %p1332_p2, %p2013_p3 }
  0x87   : > { %p1341_p9 = por %p1340_p7, %p1339_p0 }
  0x88   : > { %p1335_p12 = pneg %p1334_p4 }
  0x8a   : > { %p1342_p11 = pnand %p1341_p9, %p1335_p12 }
  0x8c   : > { %1345 = shalt.err (!%p1342_p11)
}
  0x8d   : > { %p2014_p1 = scmp.ne.s32.totalorder %s1999_s11, 0  ;;  %s1520_s23 = smov [#allocation10]  }
  0x8e   : > { %s271_s18 = sshll.u32 %s1520_s23, 4  ;;  %s1044_s19 = sshll.u32 %s1512_s27, 8  ;;  %s272_s18 = int_to_ptr.vmem [resolvable:$true] %s271_s18 }
  0x8f   : > { %1127 = dma.hbm_to_vmem [thread:$0]  (!%p2014_p1), %s1972_s2, 16, %s248_s29, [#allocation6]  }
  0x90   : > { %s1346_s12 = scalar_lea.hbm %s1974_s4, 16 }
  0x91   : > { %p1347_p11 = scmp.ne.s32.totalorder %s1974_s4, %s1346_s12  ;;  %p1353_p5 = scmp.lt.u32.totalorder %s1346_s12, %s1974_s4 }
  0x93   : > { %p1349_p6 = pnand %p1347_p11, %p2013_p3 }
  0x95   : > { %p1350_p8 = pneg %p1349_p6 }
  0x97   : > { %p1355_p10 = pnand %p1353_p5, %p1350_p8 }
  0x99   : > { %1358 = shalt.err (!%p1355_p10)
}
  0x9a   : > { %s1359_s29 = scalar_lea.vmem %s272_s18, 16  ;;  %s1366_s28 = scalar_lea.vmem %s272_s18, 32 }
  0x9b   : > { %p1360_p2 = scmp.ne.s32.totalorder %s272_s18, %s1359_s29  ;;  %p1367_p0 = scmp.lt.s32.totalorder %s272_s18, %s272_s18 }
  0x9c   : > { %p1368_p7 = scmp.lt.s32.totalorder %s1366_s28, %s1359_s29 }
  0x9d   : > { %p1362_p4 = pnand %p1360_p2, %p2013_p3 }
  0x9e   : > { %p1369_p9 = por %p1368_p7, %p1367_p0 }
  0x9f   : > { %p1363_p12 = pneg %p1362_p4 }
  0xa1   : > { %p1370_p13 = pnand %p1369_p9, %p1363_p12 }
  0xa3   : > { %1373 = shalt.err (!%p1370_p13)
}
  0xa4   : > { %1133 = dma.hbm_to_vmem [thread:$0]  (!%p2014_p1), %s1974_s4, 16, %s272_s18, [#allocation9]  }
  0xa5   : > { %s1790_s17 = scalar_lea.hbm %s1970_s0, %s1044_s19  ;;  %s2015_s12 = sshll.u32 %s1691_s10, 4 }
  0xa6   : > { %s286_s5 = scalar_lea.vmem [#allocation2], %s2015_s12  ;;  %s1799_s29 = scalar_lea.hbm %s1976_s6, %s1044_s19 }
  0xa7   : > { %s293_s1 = sshll.u32 %s286_s5, 4  ;;  %s283_s18 = scalar_lea.sflag [#allocation3], %s1691_s10  ;;  %s1794_s1 = int_to_ptr.vmem [resolvable:$true] %s293_s1 }
  0xa8   : > { %s1374_s28 = scalar_lea.hbm %s1790_s17, 256  ;;  %p2016_p3 = scmp.ne.s32.totalorder %s2011_s3, 0 }
  0xa9   : > { %p1375_p13 = scmp.ne.s32.totalorder %s1790_s17, %s1374_s28  ;;  %s1379_s22 = scalar_lea.hbm %s1970_s0, 512 }
  0xaa   : > { %p1380_p6 = scmp.lt.u32.totalorder %s1790_s17, %s1970_s0  ;;  %p1381_p8 = scmp.lt.u32.totalorder %s1379_s22, %s1374_s28 }
  0xab   : > { %p1377_p1 = pnand %p1375_p13, %p2016_p3  ;;  %p1383_p10 = scmp.lt.u32.totalorder %s1374_s28, %s1790_s17 }
  0xac   : > { %p1382_p5 = por %p1381_p8, %p1380_p6 }
  0xad   : > { %p1378_p11 = pneg %p1377_p1 }
  0xae   : > { %p1384_p2 = por %p1383_p10, %p1382_p5 }
  0xb0   : > { %p1385_p4 = pnand %p1384_p2, %p1378_p11 }
  0xb2   : > { %1388 = shalt.err (!%p1385_p4)
}
  0xb3   : > { %s1389_s19 = scalar_lea.vmem %s1794_s1, 256  ;;  %s1521_s5 = smov [#allocation2]  }
  0xb4   : > { %p1390_p12 = scmp.ne.s32.totalorder %s1794_s1, %s1389_s19  ;;  %s1394_s11 = sshll.u32 %s1521_s5, 4  ;;  %s1395_s11 = int_to_ptr.vmem [resolvable:$false] %s1394_s11 }
  0xb5   : > { %s1396_s26 = scalar_lea.vmem %s1395_s11, 512  ;;  %p1397_p9 = scmp.lt.s32.totalorder %s1794_s1, %s1395_s11 }
  0xb6   : > { %p1392_p0 = pnand %p1390_p12, %p2016_p3  ;;  %p1398_p13 = scmp.lt.s32.totalorder %s1396_s26, %s1389_s19 }
  0xb8   : > { %p1393_p7 = pneg %p1392_p0  ;;  %p1399_p1 = por %p1398_p13, %p1397_p9 }
  0xba   : > { %p1400_p6 = pnand %p1399_p1, %p1393_p7 }
  0xbc   : > { %1403 = shalt.err (!%p1400_p6)
}
  0xbd   : > { %s1522_s28 = smov 128   ;;  %s1523_s23 = smov 8  }
  0xbe   : > { %p2017_p11 = scmp.ne.s32.totalorder %s2009_s16, 0  ;;  %s1404_s13 = scalar_lea.hbm %s1799_s29, 256 }
  0xbf   : > { %p1405_p8 = scmp.ne.s32.totalorder %s1799_s29, %s1404_s13  ;;  %s1409_s12 = scalar_lea.hbm %s1976_s6, 512 }
  0xc0   : > { %1137 = dma.hbm_to_vmem [thread:$0]  (!%p2017_p11), %s1790_s17, 256, %s1794_s1, %s283_s18, %s1522_s28, %s1522_s28, %s1523_s23  }
  0xc1   : > { %p1407_p5 = pnand %p1405_p8, %p2016_p3  ;;  %p1410_p2 = scmp.lt.u32.totalorder %s1799_s29, %s1976_s6 }
  0xc2   : > { %p1411_p4 = scmp.lt.u32.totalorder %s1409_s12, %s1404_s13  ;;  %p1413_p0 = scmp.lt.u32.totalorder %s1404_s13, %s1799_s29 }
  0xc3   : > { %p1408_p10 = pneg %p1407_p5 }
  0xc4   : > { %p1412_p12 = por %p1411_p4, %p1410_p2 }
  0xc6   : > { %p1414_p7 = por %p1413_p0, %p1412_p12 }
  0xc8   : > { %p1415_p9 = pnand %p1414_p7, %p1408_p10 }
  0xca   : > { %1418 = shalt.err (!%p1415_p9)
}
  0xcb   : > { %s1419_s10 = scalar_lea.vmem %s1748_s9, 256  ;;  %s1524_s17 = smov [#allocation13]  }
  0xcc   : > { %p1420_p13 = scmp.ne.s32.totalorder %s1748_s9, %s1419_s10  ;;  %s1424_s1 = sshll.u32 %s1524_s17, 4  ;;  %s1425_s1 = int_to_ptr.vmem [resolvable:$false] %s1424_s1 }
  0xcd   : > { %s1426_s18 = scalar_lea.vmem %s1425_s1, 512  ;;  %p1427_p8 = scmp.lt.s32.totalorder %s1748_s9, %s1425_s1 }
  0xce   : > { %p1422_p1 = pnand %p1420_p13, %p2016_p3  ;;  %p1428_p5 = scmp.lt.s32.totalorder %s1426_s18, %s1419_s10 }
  0xd0   : > { %p1423_p6 = pneg %p1422_p1  ;;  %p1429_p2 = por %p1428_p5, %p1427_p8 }
  0xd2   : > { %p1430_p4 = pnand %p1429_p2, %p1423_p6 }
  0xd4   : > { %1433 = shalt.err (!%p1430_p4)
}
  0xd5   : > { %1143 = dma.hbm_to_vmem [thread:$0]  (!%p2017_p11), %s1799_s29, 256, %s1748_s9, %s1716_s15, %s1522_s28, %s1522_s28, %s1523_s23  }
  0xd6   : > { %p2018_p3 = scmp.ne.s32.totalorder %s1998_s8, 0 }
  0xd7   : > { %s1856_s3 = sand.u32 (!%p2018_p3), 1, %s1504_s25   ;;  %p2019_p10 = scmp.ne.s32.totalorder (!%p2018_p3), %s2005_s14, 0 }
  0xd8   : > { %343 = sbr.rel (%p2018_p3) target bundleno = 1070 (0x42e), region = 48  ;;  %s1859_s11 = sshll.u32 (!%p2018_p3), %s1856_s3, 4 }
  0xd9   : > { %s346_s16 = scalar_lea.sflag (!%p2018_p3), [#allocation3], %s1856_s3  ;;  %s349_s26 = scalar_lea.vmem (!%p2018_p3), [#allocation2], %s1859_s11 }
  0xdf   : > { %1479 = dma.done.wait (%p2019_p10), %s346_s16, 256  }
  0xe0   : > { %1481 = vsyncadd (%p2019_p10), %s346_s16, 4294967040  ;;  %p2020_p11 = scmp.eq.s32.totalorder %s1593_s30, 0 }
  0xe2   : > { %1483 = dma.done.wait (%p2020_p11), [#allocation6], 784   ;;  %p2021_p12 = pmov %p2020_p11 }
  0xe3   : > { %p2022_p0 = pmov %p2020_p11 }
  0xe4   : > { %1485 = vsyncadd (%p2021_p12), [#allocation6], 4294966512 }
  0xe5   : > { %1487 = dma.done.wait (%p2022_p0), [#allocation9], 528   ;;  %p2023_p7 = pmov %p2022_p0 }
  0xe6   : > { %s370_s8 = sand.u32 1, %s1593_s30   ;;  %s373_s9 = scalar_lea.vmem [#allocation11], %s1856_s3 }
  0xe7   : > { %1489 = vsyncadd (%p2023_p7), [#allocation9], 4294966768  ;;  %s371_s15 = scalar_lea.sflag [#allocation12], %s370_s8 }
  0xe8   : > { %1491 = dma.done.wait (%p2019_p10), %s371_s15, 272  }
  0xe9   : > { %1493 = vsyncadd (%p2019_p10), %s371_s15, 4294967024  ;;  %v1525_v0 = vmov 0.0   ;;  %v425_v1 = vlaneseq  ;;  %vm1526_vm0 = vmmov 0   ;;  %v1206_v3 = vld [vmem:[#allocation5 + $0x10] sm:$0xff]   ;;  %v1207_v5 = vld [vmem:[#allocation5] sm:$0xff]   ;;  %vm464_vm1 = vcmask 261120  }
  0xea   : > { %1061 = vmatprep.subr.bf16.mxu0 %v1525_v0  ;;  %1069 = vmatprep.subr.bf16.mxu1 %v1525_v0  ;;  %v1208_v6 = vld [vmem:[#allocation5 + $0x18] sm:$0xff]   ;;  %v1209_v7 = vld [vmem:[#allocation5 + $0x8] sm:$0xff]   ;;  %v1885_v8 = vld [vmem:[%s349_s26] sm:$0xff]  ;;  %vm731_vm10 = vcmask 523264   ;;  %s382_s14 = scalar_lea.vmem [#allocation13], %s1859_s11  ;;  %s1528_s29 = smov 96  }
  0xeb   : > { %1065 = vmatprep.mubr.msk.bf16.mxu0 %vm1526_vm0, %v1525_v0  ;;  %1073 = vmatprep.mubr.msk.bf16.mxu1 %vm1526_vm0, %v1525_v0  ;;  %v426_v2 = vshrl.u32 %v425_v1, 7  ;;  %v1889_v9 = vld [vmem:[%s349_s26 + $0x8] sm:$0xff]  ;;  %v565_v11 = vrot.slane %v1885_v8, 1  ;;  %v428_v13 = vrot.slane %v1885_v8, 7  ;;  %v1210_v15 = vld [vmem:[#allocation5 + $0x20] sm:$0xff]   ;;  %s1046_s28 = sshll.u32 %s1593_s30, 8 }
  0xec   : > { %1062 = vmatpush3.bf16.msra.mxu0 %v1206_v3  ;;  %1070 = vmatpush3.bf16.msra.mxu1 %v1207_v5  ;;  %v446_v10 = vpack.c.bf16 %v1889_v9, %v1885_v8  ;;  %v566_v12 = vrot.slane %v1889_v9, 1  ;;  %v429_v14 = vrot.slane %v1889_v9, 7  ;;  %v1211_v21 = vld [vmem:[#allocation5 + $0x28] sm:$0xff]   ;;  %v1212_v25 = vld [vmem:[#allocation8] sm:$0xff]   ;;  %v1213_v26 = vld [vmem:[#allocation8 + $0x8] sm:$0xff]   ;;  %s421_s23 = scalar_lea.vmem [#allocation14], %s1859_s11  ;;  %s1923_s12 = scalar_lea.hbm %s1977_s7, %s1046_s28 }
  0xed   : > { %v427_v4 = vadd.s32 8, %v426_v2  ;;  %vm430_vm2 = vcmp.lt.s32.totalorder %v426_v2, 1  ;;  %1063 = vmatprep.subr.bf16.mxu0 %v1525_v0  ;;  %vm433_vm3 = vcmp.ge.s32.totalorder %v426_v2, 1  ;;  %1071 = vmatprep.subr.bf16.mxu1 %v1525_v0  ;;  %vm567_vm4 = vcmp.lt.s32.totalorder %v426_v2, 7  ;;  %v1214_v27 = vld [vmem:[#allocation8 + $0x10] sm:$0xff]   ;;  %v1215_v28 = vld [vmem:[#allocation8 + $0x18] sm:$0xff]  }
  0xee   : > { %v569_v16 = vsel %vm567_vm4, %v566_v12, %v565_v11  ;;  %v431_v17 = vsel %vm430_vm2, %v428_v13, %v429_v14  ;;  %v432_v18 = vsel %vm430_vm2, %v429_v14, %v428_v13  ;;  %v568_v22 = vsel %vm567_vm4, %v565_v11, %v566_v12  ;;  %v1031_v40 = vld [vmem:[#allocation7] ss:$0 sm:$0xff]  ;;  %s849_s13 = sshll.u32 %s421_s23, 4  ;;  %s836_s19 = scalar_lea.sflag [#allocation4], %s1856_s3  ;;  %s1925_s13 = int_to_ptr.vmem [resolvable:$true] %s849_s13 }
  0xef   : > { %vm571_vm5 = vcmp.lt.s32.totalorder %v427_v4, 15  ;;  %v439_v19 = vsel %vm433_vm3, %v432_v18, 0.0  ;;  %s1434_s30 = scalar_lea.vmem %s1925_s13, 256  ;;  %p2024_p13 = scmp.ne.s32.totalorder %s2006_s21, 0 }
  0xf0   : > { %1064 = vmatpush3.bf16.msra.mxu0 %v1208_v6  ;;  %1072 = vmatpush3.bf16.msra.mxu1 %v1209_v7  ;;  %v441_v20 = vpack.c.bf16 %v431_v17, %v439_v19  ;;  %v577_v23 = vsel %vm571_vm5, %v569_v16, 0.0  ;;  %p1435_p9 = scmp.ne.s32.totalorder %s1925_s13, %s1434_s30  ;;  %s1529_s5 = smov [#allocation14]  }
  0xf1   : > { %1077 = vmatprep.subr.bf16.mxu0 %v1525_v0  ;;  %1085 = vmatprep.subr.bf16.mxu1 %v1525_v0  ;;  %v578_v24 = vpack.c.bf16 %v577_v23, %v568_v22  ;;  %v820_v22 = vld [vmem:[%s382_s14 + $0x8] sm:$0xff]  ;;  %s1438_s10 = sshll.u32 %s1529_s5, 4  ;;  %s1439_s10 = int_to_ptr.vmem [resolvable:$false] %s1438_s10 }
  0xf2   : > { %v1032_v23 = vld [vmem:[#allocation10] ss:$0 sm:$0xff]  ;;  %p1436_p1 = pnand %p1435_p9, %p2024_p13  ;;  %s1440_s17 = scalar_lea.vmem %s1439_s10, 512 }
  0xf3   : > { %1066 = vmatmul.mubr.msk.bf16.vlgmr.msra.gmra.mrb[0].mxu0 %vm464_vm1, %v446_v10  ;;  %1074 = vmatmul.mubr.msk.bf16.vlgmr.msra.gmra.mrb[0].mxu1 %vm464_vm1, %v441_v20  ;;  %p1441_p8 = scmp.lt.s32.totalorder %s1925_s13, %s1439_s10  ;;  %p1442_p5 = scmp.lt.s32.totalorder %s1440_s17, %s1434_s30 }
  0xf4   : > { %1078 = vmatpush3.bf16.msra.mxu0 %v1210_v15  ;;  %1081 = vmatprep.mubr.msk.bf16.mxu0 %vm1526_vm0, %v1525_v0  ;;  %p1437_p6 = pneg %p1436_p1 }
  0xf5   : > { %1079 = vmatprep.subr.bf16.mxu0 %v1525_v0  ;;  %1093 = vmatprep.mubr.msk.bf16.mxu1 %vm1526_vm0, %v1525_v0  ;;  %p1443_p2 = por %p1442_p5, %p1441_p8 }
  0xf6   : > { %1086 = vmatpush3.bf16.msra.mxu1 %v1212_v25 }
  0xf7   : > { %1087 = vmatprep.subr.bf16.mxu1 %v1525_v0  ;;  %p1444_p4 = pnand %p1443_p2, %p1437_p6 }
  0xf8   : > { %1080 = vmatpush3.bf16.msra.mxu0 %v1211_v21  ;;  %v1527_v21 = vmov 0  }
  0xf9   : > { %1205 = vset.pattern.permute.xlu1 %v1527_v21  ;;  %1204 = vset.pattern.permute.xlu0 %v1527_v21 }
  0xfa   : > { %1088 = vmatpush3.bf16.msra.mxu1 %v1213_v26  ;;  %828 = vperm.xlu1 %1205, %v820_v22  }
  0xfb   : > { %1082 = vmatmul.mubr.msk.bf16.vlgmr.msra.gmra.mrb[4].mxu0 %vm464_vm1, %v578_v24  ;;  %1089 = vmatprep.subr.bf16.mxu1 %v1525_v0 }
  0xfe   : > { %1090 = vmatpush3.bf16.msra.mxu1 %v1214_v27 }
  0xff   : > { %1091 = vmatprep.subr.bf16.mxu1 %v1525_v0 }
 0x102   : > { %1092 = vmatpush3.bf16.msra.mxu1 %v1215_v28 }
 0x1c6   : > { %v502_v29 = vpop.f32.mrb[0].mxu0  ;;  %v558_v32 = vpop.f32.mrb[0].mxu1 }
 0x1c7   : > { %v1067_v30 = vpop.f32.mrb[1].mxu0  ;;  %v559_v34 = vadd.f32 %v558_v32, %v502_v29  ;;  %v1075_v35 = vpop.f32.mrb[1].mxu1 }
 0x1c8   : > { %v505_v31 = vpop.f32.mrb[2].mxu0  ;;  %v561_v36 = vpop.f32.mrb[2].mxu1 }
 0x1c9   : > { %v1068_v33 = vpop.f32.mrb[3].mxu0  ;;  %v562_v37 = vadd.f32 %v561_v36, %v505_v31  ;;  %v1076_v38 = vpop.f32.mrb[3].mxu1 }
 0x1ce   : > { %v633_v39 = vpop.f32.mrb[4].mxu0 }
 0x1cf   : > { %v640_v41 = vadd.f32 %v633_v39, %v559_v34  ;;  %v1083_v42 = vpop.f32.mrb[5].mxu0  ;;  %v819_v34 = vld [vmem:[%s382_s14] sm:$0xff] }
 0x1d0   : > { %v636_v43 = vpop.f32.mrb[6].mxu0 }
 0x1d1   : > { %v649_v44 = vadd.f32 %v1031_v40, %v640_v41  ;;  %v641_v45 = vadd.f32 %v636_v43, %v562_v37  ;;  %v1084_v46 = vpop.f32.mrb[7].mxu0  ;;  %v1038_v43 = vld [vmem:[%s373_s9] ss:$0 sm:$0xff] }
 0x1d3   : > { %v657_v47 = vand.u32 2147483647, %v649_v44  ;;  %v650_v48 = vadd.f32 %v1031_v40, %v641_v45  ;;  %v651_v4 = vmax.f32 %v649_v44, 0.0  ;;  %vm653_vm8 = vcmp.ne.f32.partialorder %v649_v44, %v649_v44 }
 0x1d5   : > { %v659_v49 = vsub.f32 0.0, %v657_v47  ;;  %v658_v50 = vand.u32 2147483647, %v650_v48  ;;  %v652_v11 = vmax.f32 %v650_v48, 0.0  ;;  %vm654_vm9 = vcmp.ne.f32.partialorder %v650_v48, %v650_v48 }
 0x1d7   : > { %v661_v51 = vmul.f32 1.442695, %v659_v49  ;;  %v660_v52 = vsub.f32 0.0, %v658_v50 }
 0x1d9   : > { %1216 = vpow2.f32 %v661_v51  ;;  %v663_v53 = vmul.f32 1.442695, %v660_v52 }
 0x1db   : > { %1218 = vpow2.f32 %v663_v53 }
 0x1e3   : > { %v1217_v54 = vpop.eup %1216 }
 0x1e4   : > { %v665_v55 = vadd.f32 1.0, %v1217_v54  ;;  %v668_v58 = vmul.f32 -0.5, %v1217_v54  ;;  %v671_v61 = vand.u32 2147483647, %v1217_v54 }
 0x1e5   : > { %v1219_v56 = vpop.eup %1218 }
 0x1e6   : > { %1220 = vlog2.f32 %v665_v55  ;;  %v674_v57 = vadd.f32 1.0, %v1219_v56  ;;  %v677_v59 = vmul.f32 -0.5, %v1219_v56  ;;  %v669_v60 = vadd.f32 1.0, %v668_v58 }
 0x1e7   : > { %v680_v0 = vand.u32 2147483647, %v1219_v56  ;;  %vm672_vm6 = vcmp.lt.f32.partialorder %v671_v61, 0.0004427343 }
 0x1e8   : > { %1222 = vlog2.f32 %v674_v57  ;;  %v678_v62 = vadd.f32 1.0, %v677_v59  ;;  %v670_v2 = vmul.f32 %v1217_v54, %v669_v60 }
 0x1e9   : > { %vm681_vm7 = vcmp.lt.f32.partialorder %v680_v0, 0.0004427343 }
 0x1ea   : > { %v679_v7 = vmul.f32 %v1219_v56, %v678_v62 }
 0x1f0   : > { %v1221_v63 = vpop.eup %1220 }
 0x1f1   : > { %v667_v1 = vmul.f32 0.6931472, %v1221_v63 }
 0x1f2   : > { %v1223_v3 = vpop.eup %1222 }
 0x1f3   : > { %v673_v5 = vsel %vm672_vm6, %v670_v2, %v667_v1  ;;  %v676_v6 = vmul.f32 0.6931472, %v1223_v3 }
 0x1f4   : > { %v683_v10 = vadd.f32 %v673_v5, %v651_v4 }
 0x1f5   : > { %v682_v12 = vsel %vm681_vm7, %v679_v7, %v676_v6 }
 0x1f6   : > { %v685_v13 = vsel %vm653_vm8, %v649_v44, %v683_v10  ;;  %v684_v14 = vadd.f32 %v682_v12, %v652_v11 }
 0x1f7   : > { %1224 = vtanh.f32 %v685_v13 }
 0x1f8   : > { %v686_v15 = vsel %vm654_vm9, %v650_v48, %v684_v14 }
 0x1f9   : > { %1226 = vtanh.f32 %v686_v15 }
 0x201   : > { %v1225_v16 = vpop.eup %1224 }
 0x202   : > { %v689_v18 = vmul.f32 %v1225_v16, %v649_v44  ;;  %v829_v44 = vpop.permute.xlu1 %828 }
 0x203   : > { %v1227_v17 = vpop.eup %1226 }
 0x204   : > { %v690_v19 = vmul.f32 %v1227_v17, %v650_v48 }
 0x206   : > { %v691_v20 = vpack.c.bf16 %v690_v19, %v689_v18 }
 0x208   : > { %1094 = vmatmul.mubr.msk.bf16.vlgmr.msra.gmra.mrb[4].mxu1 %vm731_vm10, %v691_v20 }
 0x2db   : > { %v769_v24 = vpop.f32.mrb[4].mxu1 }
 0x2dc   : > { %v770_v25 = vadd.f32 %v1032_v23, %v769_v24  ;;  %v1095_v26 = vpop.f32.mrb[5].mxu1 }
 0x2dd   : > { %v772_v27 = vpop.f32.mrb[6].mxu1 }
 0x2de   : > { %v773_v28 = vadd.f32 %v1032_v23, %v772_v27  ;;  %v1096_v29 = vpop.f32.mrb[7].mxu1  ;;  %v776_v30 = vadd.f32 %v770_v25, %v1885_v8 }
 0x2e0   : > { %v779_v31 = vsel %vm464_vm1, %v776_v30, 0.0  ;;  %v777_v32 = vadd.f32 %v773_v28, %v1889_v9 }
 0x2e1   : > { %780 = vadd.xlane.f32.xlu0 %v779_v31 }
 0x2e2   : > { %v782_v33 = vsel %vm464_vm1, %v777_v32, 0.0 }
 0x2e5   : > { %783 = vadd.xlane.f32.xlu0 %v782_v33 }
 0x2fb   : > { %823 = vperm.xlu0 %1204, %v819_v34  }
 0x36e   : > { %v781_v35 = vpop.xlane.xlu0 %780 }
 0x36f   : > { %v786_v36 = vmul.f32 0.03125, %v781_v35 }
 0x371   : > { %v788_v37 = vsub.f32 %v776_v30, %v786_v36 }
 0x372   : > { %v784_v38 = vpop.xlane.xlu0 %783 }
 0x373   : > { %v787_v39 = vmul.f32 0.03125, %v784_v38  ;;  %v790_v40 = vmul.f32 %v788_v37, %v788_v37 }
 0x375   : > { %v789_v41 = vsub.f32 %v777_v32, %v787_v39  ;;  %v792_v8 = vsel %vm464_vm1, %v790_v40, 0.0 }
 0x376   : > { %793 = vadd.xlane.f32.xlu1 %v792_v8 }
 0x377   : > { %v791_v42 = vmul.f32 %v789_v41, %v789_v41 }
 0x379   : > { %v795_v9 = vsel %vm464_vm1, %v791_v42, 0.0 }
 0x37a   : > { %796 = vadd.xlane.f32.xlu1 %v795_v9  ;;  %v824_v56 = vpop.permute.xlu0 %823 }
 0x38b   : > { %814 = vrot.lane.b32.xlu1 %v1038_v43, %s1528_s29 }
 0x403   : > { %v794_v45 = vpop.xlane.xlu1 %793 }
 0x404   : > { %v798_v46 = vmul.f32 0.03125, %v794_v45 }
 0x406   : > { %v800_v47 = vadd.f32 1e-05, %v798_v46 }
 0x407   : > { %v797_v48 = vpop.xlane.xlu1 %796 }
 0x408   : > { %1228 = vrsqrt.f32 %v800_v47  ;;  %v799_v49 = vmul.f32 0.03125, %v797_v48 }
 0x40a   : > { %v801_v50 = vadd.f32 1e-05, %v799_v49 }
 0x40b   : > { %v815_v53 = vpop.permute.xlu1 %814 }
 0x40c   : > { %1230 = vrsqrt.f32 %v801_v50 }
 0x412   : > { %v1229_v51 = vpop.eup %1228 }
 0x413   : > { %v804_v52 = vmul.f32 %v1229_v51, %v788_v37 }
 0x415   : > { %v812_v54 = vmul.f32 %v1038_v43, %v804_v52 }
 0x416   : > { %v1231_v55 = vpop.eup %1230 }
 0x417   : > { %v805_v57 = vmul.f32 %v1231_v55, %v789_v41  ;;  %v817_v58 = vadd.f32 %v815_v53, %v812_v54 }
 0x419   : > { %v813_v59 = vmul.f32 %v1038_v43, %v805_v57  ;;  %v831_v60 = vmul.f32 %v824_v56, %v817_v58 }
 0x41b   : > { %v818_v61 = vadd.f32 %v815_v53, %v813_v59  ;;  %833 = vst.msk [vmem:[%s421_s23] sm:$0xff] %vm464_vm1, %v831_v60 }
 0x41d   : > { %v832_v62 = vmul.f32 %v829_v44, %v818_v61 }
 0x41f   : > { %834 = vst.msk [vmem:[%s421_s23 + $0x8] sm:$0xff] %vm464_vm1, %v832_v62 }
 0x420   : > { %1447 = shalt.err (!%p1444_p4)
}
 0x421   : > { %s1448_s1 = scalar_lea.hbm %s1923_s12, 256  ;;  %s1452_s16 = scalar_lea.hbm %s1977_s7, 512 }
 0x422   : > { %p1449_p3 = scmp.ne.s32.totalorder %s1923_s12, %s1448_s1  ;;  %p1453_p12 = scmp.lt.u32.totalorder %s1923_s12, %s1977_s7 }
 0x423   : > { %p1454_p0 = scmp.lt.u32.totalorder %s1452_s16, %s1448_s1  ;;  %p1456_p9 = scmp.lt.u32.totalorder %s1448_s1, %s1923_s12 }
 0x424   : > { %p1450_p10 = pnand %p1449_p3, %p2024_p13 }
 0x425   : > { %p1455_p7 = por %p1454_p0, %p1453_p12 }
 0x426   : > { %p1451_p11 = pneg %p1450_p10 }
 0x427   : > { %p1457_p1 = por %p1456_p9, %p1455_p7 }
 0x429   : > { %p1458_p6 = pnand %p1457_p1, %p1451_p11 }
 0x42b   : > { %1461 = shalt.err (!%p1458_p6)
}
 0x42c   : > { %s1530_s15 = smov 128   ;;  %s1531_s9 = smov 8  }
 0x42d   : > { %1119 = dma.vmem_to_hbm [thread:$0]  (%p2024_p13), %s1925_s13, 256, %s1923_s12, %s836_s19, %s1530_s15, %s1530_s15, %s1531_s9  }
 0x42e PF: > { %s2025_s14 = sld [smem:[#allocation23_spill]]  ;;  %s864_s29 = sand.u32 1, %s1500_s24  }
 0x42f   : > { %p2027_p5 = scmp.ge.s32.totalorder %s1512_s27, 2  ;;  %s865_s28 = scalar_lea.sflag [#allocation4], %s864_s29 }
 0x434   : > { %p2026_p8 = scmp.ne.s32.totalorder %s2025_s14, 0 }
 0x436   : > { %p1145_p2 = pnand %p2027_p5, %p2026_p8 }
 0x438   : > { %1495 = dma.done.wait (!%p1145_p2), %s865_s28, 256  }
 0x439   : > { %1497 = vsyncadd (!%p1145_p2), %s865_s28, 4294967040  ;;  %s2028_s27 = sld [smem:[#allocation21_spill]]  ;;  %s2029_s23 = sld [smem:[#allocation20_spill]] }
 0x43a   : > { %s2030_s26 = sld [smem:[#allocation22_spill]]  ;;  %s2031_s24 = smov %s1504_s25 }
 0x43f   : > { %p25_p4 = scmp.ge.s32.totalorder %s2028_s27, 4   ;;  %s2032_s25 = smov %s2029_s23 }
 0x441   :  { %27 = sbr.rel (!%p25_p4) target bundleno = 13 (0xd), region = 135 }
 0x448   :  { %870 = vsyncpa [#allocation3], 1 }
 0x449   :  { %872 = vsyncpa [#allocation3 + $0x1], 1 }
 0x44a   :  { %873 = vsyncpa [#allocation6], 1 }
 0x44b   :  { %874 = vsyncpa [#allocation9], 1 }
 0x44c   :  { %875 = vsyncpa [#allocation12], 1 }
 0x44d   :  { %877 = vsyncpa [#allocation12 + $0x1], 1 }
 0x44e   :  { %878 = vsyncpa [#allocation4], 1 }
 0x44f   :  { %880 = vsyncpa [#allocation4 + $0x1], 1 }

// kernel: low_decoder_forward.13
= control target key start
LH: loop header
LB: loop body
LE: loop exit
PB: predicated region body
PF: predicated region fallthrough
CT: control target
= control target key end

     0   :  { %9 = vsyncpa [#allocation3], 0  ;;  %s328_s0 = inlined_call_operand.vmem [shape: f32[32,32], index: 0, kind: input, shape index: {}]   ;;  %s329_s1 = inlined_call_operand.hbm [shape: bf16[32,128], index: 1, kind: input, shape index: {}]   ;;  %s330_s2 = inlined_call_operand.vmem [shape: f32[1,128], index: 2, kind: input, shape index: {}]   ;;  %s331_s3 = inlined_call_operand.vmem [shape: f32[32,1], index: 3, kind: input, shape index: {}]   ;;  %s332_s4 = inlined_call_operand.hbm [shape: f32[32,128], index: 4, kind: output, shape index: {}]  }
   0x1   :  { %10 = vsyncpa [#allocation4], 0  ;;  %s243_s15 = smov [#allocation2]   ;;  %s195_s19 = scalar_lea.hbm %s329_s1, 256 }
   0x2   :  { %s18_s16 = sshll.u32 %s243_s15, 4  ;;  %p196_p0 = scmp.ne.s32.totalorder %s329_s1, %s195_s19  ;;  %s19_s16 = int_to_ptr.vmem [resolvable:$true] %s18_s16 }
   0x3   :  { %p199_p1 = scmp.lt.u32.totalorder %s195_s19, %s329_s1 }
   0x5   :  { %p201_p2 = pnand %p199_p1, %p196_p0 }
   0x7   :  { %204 = shalt.err (!%p201_p2)
}
   0x8   :  { %s205_s24 = scalar_lea.vmem %s19_s16, 256  ;;  %p210_p4 = scmp.lt.s32.totalorder %s19_s16, %s19_s16 }
   0x9   :  { %p206_p3 = scmp.ne.s32.totalorder %s19_s16, %s205_s24  ;;  %p211_p5 = scmp.lt.s32.totalorder %s205_s24, %s205_s24 }
   0xb   :  { %p212_p6 = por %p211_p5, %p210_p4 }
   0xd   :  { %p213_p7 = pnand %p212_p6, %p206_p3 }
   0xf   :  { %216 = shalt.err (!%p213_p7)
}
  0x10   :  { %s244_s25 = smov 64   ;;  %s245_s26 = smov 4  }
  0x11   :  { %24 = dma.hbm_to_vmem [thread:$0]  %s329_s1, 256, %s19_s16, [#allocation3], %s244_s25, %s244_s25, %s245_s26  }
  0x12   :  { %239 = dma.done.wait [#allocation3], 256  }
  0x13   :  { %240 = vsyncadd [#allocation3], 4294967040  ;;  %v246_v0 = vmov 0   ;;  %v193_v1 = vld [vmem:[#allocation2] sm:$0xff]   ;;  %v194_v2 = vld [vmem:[#allocation2 + $0x8] sm:$0xff]   ;;  %vm62_vm0 = vcmask 261120  }
  0x14   :  { %192 = vset.pattern.permute.xlu1 %v246_v0  ;;  %191 = vset.pattern.permute.xlu0 %v246_v0  ;;  %v33_v3 = vld [vmem:[%s328_s0] sm:$0xff]  ;;  %v34_v4 = vld [vmem:[%s328_s0 + $0x8] sm:$0xff]  ;;  %v35_v5 = vld [vmem:[%s328_s0 + $0x10] sm:$0xff]  ;;  %s247_s19 = smov [#allocation5]  }
  0x15   :  { %176 = vmatprep.subr.bf16.mxu0 %v193_v1  ;;  %v37_v6 = vpack.c.bf16 %v34_v4, %v33_v3  ;;  %v36_v7 = vld [vmem:[%s328_s0 + $0x18] sm:$0xff]  ;;  %v120_v8 = vld [vmem:[%s331_s3 + $0x10] sm:$0xff]  ;;  %v118_v9 = vld [vmem:[%s331_s3] sm:$0xff]  ;;  %s155_s20 = sshll.u32 %s247_s19, 4  ;;  %s156_s20 = int_to_ptr.vmem [resolvable:$true] %s155_s20 }
  0x16   :  { %177 = vmatpush3.bf16.msra.mxu0 %v193_v1  ;;  %134 = vperm.xlu1 %192, %v120_v8   ;;  %v121_v10 = vld [vmem:[%s331_s3 + $0x18] sm:$0xff]  ;;  %v38_v11 = vpack.c.bf16 %v36_v7, %v35_v5  ;;  %v119_v12 = vld [vmem:[%s331_s3 + $0x8] sm:$0xff]  ;;  %v167_v14 = vld [vmem:[%s330_s2] ss:$0 sm:$0xff]  ;;  %s217_s2 = scalar_lea.vmem %s156_s20, 512  ;;  %p222_p9 = scmp.lt.s32.totalorder %s156_s20, %s156_s20 }
  0x17   :  { %178 = vmatprep.subr.bf16.mxu0 %v194_v2  ;;  %180 = vmatprep.mubr.msk.bf16.mxu0 %vm62_vm0, %v37_v6  ;;  %p218_p8 = scmp.ne.s32.totalorder %s156_s20, %s217_s2  ;;  %p223_p10 = scmp.lt.s32.totalorder %s217_s2, %s217_s2 }
  0x18   :  { %124 = vperm.xlu0 %191, %v118_v9  }
  0x19   :  { %p224_p11 = por %p223_p10, %p222_p9 }
  0x1a   :  { %179 = vmatpush3.bf16.msra.mxu0 %v194_v2  ;;  %139 = vperm.xlu1 %192, %v121_v10  }
  0x1b   :  { %p225_p12 = pnand %p224_p11, %p218_p8 }
  0x1c   :  { %129 = vperm.xlu0 %191, %v119_v12  }
  0x1d   :  { %181 = vmatmul.mubr.msk.bf16.vlgmr.msra.gmra.mrb[0].mxu0 %vm62_vm0, %v38_v11 }
  0x95   :  { %v135_v13 = vpop.permute.xlu1 %134 }
  0x97   :  { %v125_v15 = vpop.permute.xlu0 %124 }
  0x99   :  { %v140_v24 = vpop.permute.xlu1 %139 }
  0x9b   :  { %v130_v27 = vpop.permute.xlu0 %129 }
  0xf0   :  { %v182_v16 = vpop.f32.mrb[0].mxu0 }
  0xf1   :  { %v112_v17 = vadd.f32 %v182_v16, %v167_v14  ;;  %v103_v18 = vpop.f32.mrb[1].mxu0 }
  0xf2   :  { %v104_v19 = vadd.f32 %v167_v14, %v103_v18  ;;  %v183_v20 = vpop.f32.mrb[2].mxu0 }
  0xf3   :  { %v144_v21 = vmul.f32 %v135_v13, %v112_v17  ;;  %v115_v22 = vadd.f32 %v183_v20, %v167_v14  ;;  %v106_v23 = vpop.f32.mrb[3].mxu0 }
  0xf4   :  { %v142_v25 = vmul.f32 %v125_v15, %v104_v19  ;;  %v107_v26 = vadd.f32 %v167_v14, %v106_v23 }
  0xf5   :  { %148 = vst [vmem:[#allocation5 + $0x10] sm:$0xff] %v144_v21  ;;  %v145_v28 = vmul.f32 %v140_v24, %v115_v22 }
  0xf6   :  { %146 = vst [vmem:[#allocation5] sm:$0xff] %v142_v25  ;;  %v143_v29 = vmul.f32 %v130_v27, %v107_v26 }
  0xf7   :  { %149 = vst [vmem:[#allocation5 + $0x18] sm:$0xff] %v145_v28 }
  0xf8   :  { %147 = vst [vmem:[#allocation5 + $0x8] sm:$0xff] %v143_v29 }
  0xf9   :  { %228 = shalt.err (!%p225_p12)
}
  0xfa   :  { %s229_s22 = scalar_lea.hbm %s332_s4, 512 }
  0xfb   :  { %p230_p13 = scmp.ne.s32.totalorder %s332_s4, %s229_s22  ;;  %p233_p0 = scmp.lt.u32.totalorder %s229_s22, %s332_s4 }
  0xfd   :  { %p235_p1 = pnand %p233_p0, %p230_p13 }
  0xff   :  { %238 = shalt.err (!%p235_p1)
}
 0x100   :  { %s248_s27 = smov 128   ;;  %s249_s28 = smov 8  }
 0x101   :  { %161 = dma.vmem_to_hbm [thread:$0]  %s156_s20, 512, %s332_s4, [#allocation4], %s248_s27, %s248_s27, %s249_s28  }
 0x102   :  { %241 = dma.done.wait [#allocation4], 512  }
 0x103   :  { %242 = vsyncadd [#allocation4], 4294966784 }
 0x104   :  { %165 = vsyncpa [#allocation3], 1 }
 0x105   :  { %166 = vsyncpa [#allocation4], 1 }

// kernel: low_decoder_forward.9
= control target key start
LH: loop header
LB: loop body
LE: loop exit
PB: predicated region body
PF: predicated region fallthrough
CT: control target
= control target key end

     0   :  { %s3326_s0 = inlined_call_operand.hbm [shape: f32[2,16,32], index: 0, kind: input, shape index: {}]   ;;  %s3327_s1 = inlined_call_operand.hbm [shape: f32[2,1,16], index: 1, kind: input, shape index: {}]   ;;  %s3328_s2 = inlined_call_operand.hbm [shape: bf16[2,32,16], index: 2, kind: input, shape index: {}]   ;;  %s3329_s3 = inlined_call_operand.hbm [shape: bf16[2,32,16], index: 3, kind: input, shape index: {}]   ;;  %s3330_s4 = inlined_call_operand.hbm [shape: bf16[2,32,16], index: 4, kind: input, shape index: {}]   ;;  %s3331_s5 = inlined_call_operand.hbm [shape: f32[2,1,16], index: 5, kind: input, shape index: {}]   ;;  %s3332_s6 = inlined_call_operand.hbm [shape: f32[2,1,16], index: 6, kind: input, shape index: {}]   ;;  %s3333_s7 = inlined_call_operand.hbm [shape: f32[2,1,16], index: 7, kind: input, shape index: {}]   ;;  %s3334_s8 = inlined_call_operand.hbm [shape: bf16[2,16,32], index: 8, kind: input, shape index: {}]   ;;  %s3335_s9 = inlined_call_operand.hbm [shape: f32[1,32], index: 9, kind: input, shape index: {}]   ;;  %s3336_s10 = inlined_call_operand.hbm [shape: f32[2,1,64], index: 10, kind: input, shape index: {}]   ;;  %s3337_s11 = inlined_call_operand.hbm [shape: f32[2,16,1], index: 11, kind: input, shape index: {}]   ;;  %s3338_s12 = inlined_call_operand.hbm [shape: f32[2,16,32], index: 12, kind: output, shape index: {}]  }
   0x1   :  { %3378 = sst [smem:[#allocation45_spill]] %s3326_s0 }
   0x2   :  { %3379 = sst [smem:[#allocation46_spill]] %s3327_s1 }
   0x3   :  { %3380 = sst [smem:[#allocation47_spill]] %s3328_s2 }
   0x4   :  { %3381 = sst [smem:[#allocation48_spill]] %s3329_s3 }
   0x5   :  { %3382 = sst [smem:[#allocation49_spill]] %s3330_s4 }
   0x6   :  { %3383 = sst [smem:[#allocation50_spill]] %s3331_s5 }
   0x7   :  { %3384 = sst [smem:[#allocation51_spill]] %s3333_s7 }
   0x8   :  { %3385 = sst [smem:[#allocation52_spill]] %s3334_s8 }
   0x9   :  { %3386 = sst [smem:[#allocation53_spill]] %s3335_s9 }
   0xa   :  { %3387 = sst [smem:[#allocation54_spill]] %s3336_s10 }
   0xb   :  { %3388 = sst [smem:[#allocation55_spill]] %s3338_s12 }
   0xc   :  { %17 = vsyncpa [#allocation5], 0 }
   0xd   :  { %19 = vsyncpa [#allocation5 + $0x1], 0 }
   0xe   :  { %20 = vsyncpa [#allocation8], 0 }
   0xf   :  { %22 = vsyncpa [#allocation8 + $0x1], 0 }
  0x10   :  { %23 = vsyncpa [#allocation11], 0 }
  0x11   :  { %24 = vsyncpa [#allocation14], 0 }
  0x12   :  { %25 = vsyncpa [#allocation17], 0 }
  0x13   :  { %26 = vsyncpa [#allocation20], 0 }
  0x14   :  { %27 = vsyncpa [#allocation6], 0 }
  0x15   :  { %29 = vsyncpa [#allocation6 + $0x1], 0  ;;  %s2696_s21 = smov 0   ;;  %s2698_s22 = smov 0  }
  0x16   :  { %s2700_s23 = smov 0   ;;  %s2702_s24 = smov 0  }
  0x17   :  { %s2704_s25 = smov 0   ;;  %s2706_s26 = smov 0  }
  0x18 LB: > { %3389 = sst [smem:[#allocation34_spill]] %s2584_s21  ;;  %s2727_s27 = sadd.s32 4294967295, %s2604_s26   ;;  %s2604_s26 = sphi %s2706_s26, %s35_s26   ;;  %s2600_s25 = sphi %s2704_s25, %s3467_s25   ;;  %s2596_s24 = sphi %s2702_s24, %s3466_s24   ;;  %s2592_s23 = sphi %s2700_s23, %s3464_s23   ;;  %s2588_s22 = sphi %s2698_s22, %s3463_s22   ;;  %s2584_s21 = sphi %s2696_s21, %s3462_s21  }
  0x19   : > { %3390 = sst [smem:[#allocation35_spill]] %s2588_s22  ;;  %p1753_p0 = scmp.ge.s32.totalorder %s2604_s26, 1 }
  0x1a   : > { %3391 = sst [smem:[#allocation36_spill]] %s2592_s23  ;;  %p3344_p1 = scmp.eq.s32.totalorder %s2727_s27, 0 }
  0x1b   : > { %3392 = sst [smem:[#allocation37_spill]] %s2596_s24  ;;  %p354_p2 = scmp.lt.s32.totalorder %s2604_s26, 3 }
  0x1c   : > { %3393 = sst [smem:[#allocation38_spill]] %s2604_s26  ;;  %s2606_s29 = smov [#allocation9]  }
  0x1d   : > { %p2732_p3 = pnand %p1753_p0, %p354_p2  ;;  %s366_s30 = sshll.u32 %s2606_s29, 4  ;;  %s2736_s30 = int_to_ptr.vmem [resolvable:$true] %s366_s30 }
  0x1e   : > { %s2607_s14 = smov [#allocation10]   ;;  %s2608_s16 = smov [#allocation13]  }
  0x1f   : > { %s3394_s28 = scalar_select %p2732_p3, 1, 0 }
  0x20   : > { %p1982_p4 = pneg %p2732_p3  ;;  %s379_s15 = sshll.u32 %s2607_s14, 4  ;;  %s2747_s15 = int_to_ptr.vmem [resolvable:$true] %s379_s15 }
  0x21   : > { %3395 = sst [smem:[#allocation39_spill]] %s3394_s28  ;;  %s2749_s17 = sshll.u32 %s2608_s16, 4  ;;  %s406_s17 = int_to_ptr.vmem [resolvable:$true] %s2749_s17 }
  0x22   : > { %p2743_p6 = pnand %p1982_p4, %p3344_p1  ;;  %s3397_s2 = sld [smem:[#allocation47_spill]] }
  0x24   : > { %s3396_s13 = scalar_select %p2743_p6, 1, 0 }
  0x25   : > { %p2759_p8 = pneg %p2743_p6 }
  0x27   : > { %s3398_s24 = scalar_select %p2759_p8, 1, 0 }
  0x28   : > { %s2146_s20 = scalar_lea.hbm %s3397_s2, 512 }
  0x29   : > { %p2147_p7 = scmp.ne.s32.totalorder %s3397_s2, %s2146_s20  ;;  %p2153_p11 = scmp.lt.u32.totalorder %s2146_s20, %s3397_s2 }
  0x2b   : > { %p2149_p9 = pnand %p2759_p8, %p2147_p7 }
  0x2d   : > { %p2150_p10 = pneg %p2149_p9 }
  0x2f   : > { %p2155_p12 = pnand %p2153_p11, %p2150_p10 }
  0x31   : > { %2158 = shalt.err (!%p2155_p12)
}
  0x32   : > { %s2159_s12 = scalar_lea.vmem %s2736_s30, 512  ;;  %p2167_p4 = scmp.lt.s32.totalorder %s2736_s30, %s2736_s30 }
  0x33   : > { %p2160_p13 = scmp.ne.s32.totalorder %s2736_s30, %s2159_s12  ;;  %p2168_p5 = scmp.lt.s32.totalorder %s2159_s12, %s2159_s12 }
  0x35   : > { %p2162_p0 = pnand %p2160_p13, %p2759_p8  ;;  %p2169_p7 = por %p2168_p5, %p2167_p4 }
  0x37   : > { %p2163_p2 = pneg %p2162_p0 }
  0x39   : > { %p2170_p9 = pnand %p2169_p7, %p2163_p2 }
  0x3b   : > { %2173 = shalt.err (!%p2170_p9)
}
  0x3c   : > { %s3346_s18 = smov 64   ;;  %s3348_s19 = smov 4  }
  0x3d   : > { %1985 = dma.hbm_to_vmem [thread:$0]  (!%p2743_p6), %s3397_s2, 512, %s2736_s30, [#allocation8], %s3346_s18, %s3346_s18, %s3348_s19  }
  0x3e   : > { %s3399_s3 = sld [smem:[#allocation48_spill]] }
  0x44   : > { %s2174_s12 = scalar_lea.hbm %s3399_s3, 512 }
  0x45   : > { %p2175_p5 = scmp.ne.s32.totalorder %s3399_s3, %s2174_s12  ;;  %p2181_p12 = scmp.lt.u32.totalorder %s2174_s12, %s3399_s3 }
  0x47   : > { %p2177_p10 = pnand %p2175_p5, %p2759_p8 }
  0x49   : > { %p2178_p11 = pneg %p2177_p10 }
  0x4b   : > { %p2183_p13 = pnand %p2181_p12, %p2178_p11 }
  0x4d   : > { %2186 = shalt.err (!%p2183_p13)
}
  0x4e   : > { %s2187_s30 = scalar_lea.vmem %s2747_s15, 512  ;;  %p2195_p7 = scmp.lt.s32.totalorder %s2747_s15, %s2747_s15 }
  0x4f   : > { %p2188_p0 = scmp.ne.s32.totalorder %s2747_s15, %s2187_s30  ;;  %p2196_p9 = scmp.lt.s32.totalorder %s2187_s30, %s2187_s30 }
  0x51   : > { %p2190_p2 = pnand %p2188_p0, %p2759_p8  ;;  %p2197_p5 = por %p2196_p9, %p2195_p7 }
  0x53   : > { %p2191_p4 = pneg %p2190_p2 }
  0x55   : > { %p2198_p10 = pnand %p2197_p5, %p2191_p4 }
  0x57   : > { %2201 = shalt.err (!%p2198_p10)
}
  0x58   : > { %1988 = dma.hbm_to_vmem [thread:$0]  (!%p2743_p6), %s3399_s3, 512, %s2747_s15, [#allocation11], %s3346_s18, %s3346_s18, %s3348_s19  }
  0x59   : > { %s3400_s5 = sld [smem:[#allocation50_spill]] }
  0x5f   : > { %s2202_s20 = scalar_lea.hbm %s3400_s5, 32 }
  0x60   : > { %p2203_p11 = scmp.ne.s32.totalorder %s3400_s5, %s2202_s20  ;;  %p2209_p0 = scmp.lt.u32.totalorder %s2202_s20, %s3400_s5 }
  0x62   : > { %p2205_p12 = pnand %p2203_p11, %p2759_p8 }
  0x64   : > { %p2206_p13 = pneg %p2205_p12 }
  0x66   : > { %p2211_p2 = pnand %p2209_p0, %p2206_p13 }
  0x68   : > { %2214 = shalt.err (!%p2211_p2)
}
  0x69   : > { %s2215_s30 = scalar_lea.vmem %s406_s17, 32  ;;  %p2223_p5 = scmp.lt.s32.totalorder %s406_s17, %s406_s17 }
  0x6a   : > { %p2216_p4 = scmp.ne.s32.totalorder %s406_s17, %s2215_s30  ;;  %p2224_p10 = scmp.lt.s32.totalorder %s2215_s30, %s2215_s30 }
  0x6c   : > { %p2218_p7 = pnand %p2216_p4, %p2759_p8  ;;  %p2225_p1 = por %p2224_p10, %p2223_p5 }
  0x6e   : > { %p2219_p9 = pneg %p2218_p7 }
  0x70   : > { %p2226_p3 = pnand %p2225_p1, %p2219_p9 }
  0x72   : > { %2229 = shalt.err (!%p2226_p3)
}
  0x73   : > { %s3350_s15 = smov 16   ;;  %s3351_s8 = smov 1  }
  0x74   : > { %1994 = dma.hbm_to_vmem [thread:$0]  (!%p2743_p6), %s3400_s5, 32, %s406_s17, [#allocation14], %s3350_s15, %s3350_s15, %s3351_s8  }
  0x75   : > { %s2613_s28 = smov [#allocation16]   ;;  %s3401_s7 = sld [smem:[#allocation51_spill]] }
  0x76   : > { %s431_s20 = sshll.u32 %s2613_s28, 4  ;;  %s432_s20 = int_to_ptr.vmem [resolvable:$true] %s431_s20 }
  0x7b   : > { %s2230_s16 = scalar_lea.hbm %s3401_s7, 32 }
  0x7c   : > { %p2231_p1 = scmp.ne.s32.totalorder %s3401_s7, %s2230_s16  ;;  %p2237_p12 = scmp.lt.u32.totalorder %s2230_s16, %s3401_s7 }
  0x7e   : > { %p2233_p3 = pnand %p2231_p1, %p2759_p8 }
  0x80   : > { %p2234_p11 = pneg %p2233_p3 }
  0x82   : > { %p2239_p13 = pnand %p2237_p12, %p2234_p11 }
  0x84   : > { %2242 = shalt.err (!%p2239_p13)
}
  0x85   : > { %s2243_s17 = scalar_lea.vmem %s432_s20, 32  ;;  %p2251_p7 = scmp.lt.s32.totalorder %s432_s20, %s432_s20 }
  0x86   : > { %p2244_p0 = scmp.ne.s32.totalorder %s432_s20, %s2243_s17  ;;  %p2252_p9 = scmp.lt.s32.totalorder %s2243_s17, %s2243_s17 }
  0x88   : > { %p2246_p2 = pnand %p2244_p0, %p2759_p8  ;;  %p2253_p5 = por %p2252_p9, %p2251_p7 }
  0x8a   : > { %p2247_p4 = pneg %p2246_p2 }
  0x8c   : > { %p2254_p10 = pnand %p2253_p5, %p2247_p4 }
  0x8e   : > { %2257 = shalt.err (!%p2254_p10)
}
  0x8f   : > { %2000 = dma.hbm_to_vmem [thread:$0]  (!%p2743_p6), %s3401_s7, 32, %s432_s20, [#allocation17], %s3350_s15, %s3350_s15, %s3351_s8  }
  0x90   : > { %s1752_s9 = sadd.s32 4294967294, %s2604_s26   ;;  %s47_s10 = sadd.s32 1, %s2600_s25 }
  0x91   : > { %p49_p1 = scmp.ge.s32.totalorder %s47_s10, 2  ;;  %s54_s28 = sadd.s32 1, %s2592_s23 }
  0x92   : > { %p61_p3 = scmp.ne.s32.totalorder %s2592_s23, %s2588_s22  ;;  %p62_p11 = scmp.eq.s32.totalorder %s2604_s26, 0 }
  0x93   : > { %s3469_s10 = smov (%p49_p1, %s47_s10), 0  ;;  %p67_p13 = scmp.ne.s32.totalorder %s2588_s22, %s2584_s21 }
  0x94   : > { %3402 = sst [smem:[#allocation40_spill]] %s3469_s10  ;;  %p2860_p12 = por %p62_p11, %p61_p3 }
  0x95   : > { %s51_s20 = ssub.s32 %s2600_s25, %s3469_s10  ;;  %p341_p0 = scmp.eq.s32.totalorder %s2727_s27, 1 }
  0x96   : > { %p52_p2 = scmp.eq.s32.totalorder %s51_s20, 0  ;;  %p3404_p4 = scmp.eq.s32.totalorder %s2727_s27, 0 }
  0x97   : > { %p2875_p9 = por %p341_p0, %p61_p3  ;;  %p347_p5 = scmp.eq.s32.totalorder %s1752_s9, 1 }
  0x98   : > { %p2871_p7 = por %p3404_p4, %p67_p13  ;;  %p2032_p1 = scmp.lt.s32.totalorder %s2604_s26, 2 }
  0x99   : > { %s3407_s16 = scalar_select %p2875_p9, 1, 0 }
  0x9a   : > { %s3405_s14 = scalar_select %p2871_p7, 1, 0 }
  0x9b   : > { %3408 = sst [smem:[#allocation42_spill]] %s3407_s16  ;;  %p2882_p10 = por %p347_p5, %p67_p13 }
  0x9c   : > { %3406 = sst [smem:[#allocation41_spill]] %s3405_s14  ;;  %s2889_s18 = sand.u32 1, %s2592_s23  }
  0x9d   : > { %s2880_s12 = scalar_select %p52_p2, %s2592_s23, %s54_s28  }
  0x9e   : > { %s3410_s30 = scalar_select %p2882_p10, 1, 0 }
  0x9f   : > { %3409 = sst [smem:[#allocation43_spill]] %s2880_s12  ;;  %s3352_s19 = sshll.u32 %s2889_s18, 4 }
  0xa0   : > { %3411 = sst [smem:[#allocation44_spill]] %s3410_s30  ;;  %s3353_s20 = sshll.u32 %s2600_s25, 8 }
  0xa1   : > { %s3412_s0 = sld [smem:[#allocation45_spill]]  ;;  %s473_s9 = scalar_lea.vmem [#allocation4], %s3352_s19 }
  0xa2   : > { %s480_s28 = sshll.u32 %s473_s9, 4  ;;  %p2906_p3 = pnand %p2032_p1, %p2860_p12  ;;  %s2902_s28 = int_to_ptr.vmem [resolvable:$true] %s480_s28 }
  0xa3   : > { %s3414_s3 = sand.u32 1, %s2604_s26  }
  0xa4   : > { %s3413_s17 = scalar_select %p2906_p3, 1, 0 }
  0xa5   : > { %s2912_s5 = scalar_lea.sflag [#allocation5], %s3414_s3  ;;  %p2918_p13 = pneg %p2906_p3 }
  0xa7   : > { %s2898_s2 = scalar_lea.hbm %s3412_s0, %s3353_s20  ;;  %s2263_s19 = scalar_lea.hbm %s3412_s0, 512 }
  0xa8   : > { %s2258_s15 = scalar_lea.hbm %s2898_s2, 256  ;;  %p2264_p12 = scmp.lt.u32.totalorder %s2898_s2, %s3412_s0 }
  0xa9   : > { %p2259_p11 = scmp.ne.s32.totalorder %s2898_s2, %s2258_s15  ;;  %p2265_p4 = scmp.lt.u32.totalorder %s2263_s19, %s2258_s15 }
  0xaa   : > { %s3415_s8 = scalar_select %p2918_p13, 1, 0 }
  0xab   : > { %p2261_p0 = pnand %p2918_p13, %p2259_p11  ;;  %p2266_p5 = por %p2265_p4, %p2264_p12 }
  0xac   : > { %p2267_p1 = scmp.lt.u32.totalorder %s2258_s15, %s2898_s2 }
  0xad   : > { %p2262_p2 = pneg %p2261_p0 }
  0xae   : > { %p2268_p10 = por %p2267_p1, %p2266_p5 }
  0xb0   : > { %p2269_p9 = pnand %p2268_p10, %p2262_p2 }
  0xb2   : > { %2272 = shalt.err (!%p2269_p9)
}
  0xb3   : > { %s2273_s3 = scalar_lea.vmem %s2902_s28, 256  ;;  %s2614_s29 = smov [#allocation4]  }
  0xb4   : > { %p2274_p11 = scmp.ne.s32.totalorder %s2902_s28, %s2273_s3  ;;  %s2278_s9 = sshll.u32 %s2614_s29, 4  ;;  %s2279_s9 = int_to_ptr.vmem [resolvable:$false] %s2278_s9 }
  0xb5   : > { %s2280_s7 = scalar_lea.vmem %s2279_s9, 512  ;;  %p2281_p6 = scmp.lt.s32.totalorder %s2902_s28, %s2279_s9 }
  0xb6   : > { %p2276_p0 = pnand %p2274_p11, %p2918_p13  ;;  %p2282_p8 = scmp.lt.s32.totalorder %s2280_s7, %s2273_s3 }
  0xb8   : > { %p2277_p7 = pneg %p2276_p0  ;;  %p2283_p12 = por %p2282_p8, %p2281_p6 }
  0xba   : > { %p2284_p4 = pnand %p2283_p12, %p2277_p7 }
  0xbc   : > { %2287 = shalt.err (!%p2284_p4)
}
  0xbd   : > { %s3364_s19 = smov 128   ;;  %s3365_s20 = smov 8  }
  0xbe   : > { %2010 = dma.hbm_to_vmem [thread:$0]  (!%p2906_p3), %s2898_s2, 256, %s2902_s28, %s2912_s5, %s3364_s19, %s3364_s19, %s3365_s20  }
  0xbf   : > { %s3416_s15 = sshll.u32 %s2600_s25, 8  ;;  %s3417_s7 = sshll.u32 %s2889_s18, 4 }
  0xc0   : > { %s2950_s9 = scalar_lea.hbm %s3337_s11, %s3416_s15  ;;  %s528_s0 = scalar_lea.vmem [#allocation22], %s3417_s7 }
  0xc1   : > { %s537_s10 = sshll.u32 %s528_s0, 4  ;;  %s3368_s12 = sshll.u32 %s2600_s25, 4  ;;  %s2954_s10 = int_to_ptr.vmem [resolvable:$true] %s537_s10 }
  0xc2   : > { %s3418_s1 = sld [smem:[#allocation46_spill]]  ;;  %s493_s2 = scalar_lea.vmem [#allocation7], %s2889_s18 }
  0xc3   : > { %s500_s28 = sshll.u32 %s493_s2, 4  ;;  %s3419_s15 = sand.u32 1, %s2604_s26   ;;  %s501_s28 = int_to_ptr.vmem [resolvable:$true] %s500_s28 }
  0xc4   : > { %s2967_s3 = scalar_lea.sflag [#allocation8], %s3419_s15 }
  0xc8   : > { %s2962_s21 = scalar_lea.hbm %s3418_s1, %s3368_s12  ;;  %s2293_s23 = scalar_lea.hbm %s3418_s1, 32 }
  0xc9   : > { %s2288_s0 = scalar_lea.hbm %s2962_s21, 16  ;;  %p2294_p9 = scmp.lt.u32.totalorder %s2962_s21, %s3418_s1 }
  0xca   : > { %p2289_p6 = scmp.ne.s32.totalorder %s2962_s21, %s2288_s0  ;;  %p2295_p10 = scmp.lt.u32.totalorder %s2293_s23, %s2288_s0 }
  0xcb   : > { %p2297_p5 = scmp.lt.u32.totalorder %s2288_s0, %s2962_s21 }
  0xcc   : > { %p2291_p8 = pnand %p2289_p6, %p2918_p13  ;;  %p2296_p2 = por %p2295_p10, %p2294_p9 }
  0xce   : > { %p2292_p7 = pneg %p2291_p8  ;;  %p2298_p1 = por %p2297_p5, %p2296_p2 }
  0xd0   : > { %p2299_p11 = pnand %p2298_p1, %p2292_p7 }
  0xd2   : > { %2302 = shalt.err (!%p2299_p11)
}
  0xd3   : > { %s2303_s2 = scalar_lea.vmem %s501_s28, 16  ;;  %s2617_s15 = smov [#allocation7]  }
  0xd4   : > { %p2304_p0 = scmp.ne.s32.totalorder %s501_s28, %s2303_s2  ;;  %s2308_s20 = sshll.u32 %s2617_s15, 4  ;;  %s2309_s20 = int_to_ptr.vmem [resolvable:$false] %s2308_s20 }
  0xd5   : > { %s2310_s29 = scalar_lea.vmem %s2309_s20, 32  ;;  %p2311_p6 = scmp.lt.s32.totalorder %s501_s28, %s2309_s20 }
  0xd6   : > { %p2306_p12 = pnand %p2304_p0, %p2918_p13  ;;  %p2312_p8 = scmp.lt.s32.totalorder %s2310_s29, %s2303_s2 }
  0xd8   : > { %p2307_p4 = pneg %p2306_p12  ;;  %p2313_p3 = por %p2312_p8, %p2311_p6 }
  0xda   : > { %p2314_p9 = pnand %p2313_p3, %p2307_p4 }
  0xdc   : > { %2317 = shalt.err (!%p2314_p9)
}
  0xdd   : > { %p3420_p10 = scmp.ne.s32.totalorder %s3413_s17, 0  ;;  %s2618_s19 = smov [#allocation12]  }
  0xde   : > { %s392_s0 = sshll.u32 %s2618_s19, 4  ;;  %s2619_s7 = smov [#allocation15]   ;;  %s393_s0 = int_to_ptr.vmem [resolvable:$true] %s392_s0 }
  0xdf   : > { %2013 = dma.hbm_to_vmem [thread:$0]  (!%p3420_p10), %s2962_s21, 16, %s501_s28, %s2967_s3  }
  0xe0   : > { %s418_s23 = sshll.u32 %s2619_s7, 4  ;;  %s3421_s4 = sld [smem:[#allocation49_spill]]  ;;  %s419_s23 = int_to_ptr.vmem [resolvable:$true] %s418_s23 }
  0xe1   : > { %p3422_p7 = scmp.ne.s32.totalorder %s3398_s24, 0 }
  0xe6   : > { %s2318_s12 = scalar_lea.hbm %s3421_s4, 512 }
  0xe7   : > { %p2319_p3 = scmp.ne.s32.totalorder %s3421_s4, %s2318_s12  ;;  %p2325_p1 = scmp.lt.u32.totalorder %s2318_s12, %s3421_s4 }
  0xe9   : > { %p2321_p2 = pnand %p2319_p3, %p3422_p7 }
  0xeb   : > { %p2322_p5 = pneg %p2321_p2 }
  0xed   : > { %p2327_p11 = pnand %p2325_p1, %p2322_p5 }
  0xef   : > { %2330 = shalt.err (!%p2327_p11)
}
  0xf0   : > { %s2331_s21 = scalar_lea.vmem %s393_s0, 512  ;;  %p2339_p6 = scmp.lt.s32.totalorder %s393_s0, %s393_s0 }
  0xf1   : > { %p2332_p0 = scmp.ne.s32.totalorder %s393_s0, %s2331_s21  ;;  %p2340_p8 = scmp.lt.s32.totalorder %s2331_s21, %s2331_s21 }
  0xf3   : > { %p2334_p12 = pnand %p2332_p0, %p3422_p7  ;;  %p2341_p9 = por %p2340_p8, %p2339_p6 }
  0xf5   : > { %p2335_p4 = pneg %p2334_p12 }
  0xf7   : > { %p2342_p10 = pnand %p2341_p9, %p2335_p4 }
  0xf9   : > { %2345 = shalt.err (!%p2342_p10)
}
  0xfa   : > { %p3423_p3 = scmp.ne.s32.totalorder %s3396_s13, 0  ;;  %s3424_s28 = smov 4  }
  0xfb   : > { %s3425_s19 = smov 64   ;;  %s2346_s15 = scalar_lea.hbm %s3332_s6, 32 }
  0xfc   : > { %1991 = dma.hbm_to_vmem [thread:$0]  (!%p3423_p3), %s3421_s4, 512, %s393_s0, [#allocation11], %s3425_s19, %s3425_s19, %s3424_s28  }
  0xfd   : > { %p2347_p2 = scmp.ne.s32.totalorder %s3332_s6, %s2346_s15  ;;  %p2353_p1 = scmp.lt.u32.totalorder %s2346_s15, %s3332_s6 }
  0xff   : > { %p2349_p10 = pnand %p2347_p2, %p3422_p7 }
 0x101   : > { %p2350_p5 = pneg %p2349_p10 }
 0x103   : > { %p2355_p11 = pnand %p2353_p1, %p2350_p5 }
 0x105   : > { %2358 = shalt.err (!%p2355_p11)
}
 0x106   : > { %s2359_s1 = scalar_lea.vmem %s419_s23, 32  ;;  %p2367_p6 = scmp.lt.s32.totalorder %s419_s23, %s419_s23 }
 0x107   : > { %p2360_p0 = scmp.ne.s32.totalorder %s419_s23, %s2359_s1  ;;  %p2368_p8 = scmp.lt.s32.totalorder %s2359_s1, %s2359_s1 }
 0x109   : > { %p2362_p12 = pnand %p2360_p0, %p3422_p7  ;;  %p2369_p9 = por %p2368_p8, %p2367_p6 }
 0x10b   : > { %p2363_p4 = pneg %p2362_p12 }
 0x10d   : > { %p2370_p13 = pnand %p2369_p9, %p2363_p4 }
 0x10f   : > { %2373 = shalt.err (!%p2370_p13)
}
 0x110   : > { %s3426_s0 = smov 1   ;;  %s3427_s12 = smov 16  }
 0x111   : > { %1997 = dma.hbm_to_vmem [thread:$0]  (!%p3423_p3), %s3332_s6, 32, %s419_s23, [#allocation14], %s3427_s12, %s3427_s12, %s3426_s0  }
 0x112   : > { %s2620_s15 = smov [#allocation18]   ;;  %s2621_s2 = smov [#allocation19]  }
 0x113   : > { %s444_s20 = sshll.u32 %s2620_s15, 4  ;;  %s458_s29 = sshll.u32 %s2621_s2, 4  ;;  %s445_s20 = int_to_ptr.vmem [resolvable:$true] %s444_s20  ;;  %s459_s29 = int_to_ptr.vmem [resolvable:$true] %s458_s29 }
 0x114   : > { %s3428_s4 = sld [smem:[#allocation52_spill]] }
 0x11a   : > { %s2374_s26 = scalar_lea.hbm %s3428_s4, 256 }
 0x11b   : > { %p2375_p13 = scmp.ne.s32.totalorder %s3428_s4, %s2374_s26  ;;  %p2381_p5 = scmp.lt.u32.totalorder %s2374_s26, %s3428_s4 }
 0x11d   : > { %p2377_p2 = pnand %p2375_p13, %p3422_p7 }
 0x11f   : > { %p2378_p10 = pneg %p2377_p2 }
 0x121   : > { %p2383_p1 = pnand %p2381_p5, %p2378_p10 }
 0x123   : > { %2386 = shalt.err (!%p2383_p1)
}
 0x124   : > { %s2387_s23 = scalar_lea.vmem %s445_s20, 256  ;;  %p2395_p4 = scmp.lt.s32.totalorder %s445_s20, %s445_s20 }
 0x125   : > { %p2388_p11 = scmp.ne.s32.totalorder %s445_s20, %s2387_s23  ;;  %p2396_p6 = scmp.lt.s32.totalorder %s2387_s23, %s2387_s23 }
 0x127   : > { %p2390_p0 = pnand %p2388_p11, %p3422_p7  ;;  %p2397_p8 = por %p2396_p6, %p2395_p4 }
 0x129   : > { %p2391_p12 = pneg %p2390_p0 }
 0x12b   : > { %p2398_p9 = pnand %p2397_p8, %p2391_p12 }
 0x12d   : > { %2401 = shalt.err (!%p2398_p9)
}
 0x12e   : > { %2003 = dma.hbm_to_vmem [thread:$0]  (!%p3423_p3), %s3428_s4, 256, %s445_s20, [#allocation17], %s3425_s19, %s3425_s19, %s3424_s28  }
 0x12f   : > { %s3429_s0 = sld [smem:[#allocation53_spill]] }
 0x135   : > { %s2402_s12 = scalar_lea.hbm %s3429_s0, 16 }
 0x136   : > { %p2403_p13 = scmp.ne.s32.totalorder %s3429_s0, %s2402_s12  ;;  %p2409_p5 = scmp.lt.u32.totalorder %s2402_s12, %s3429_s0 }
 0x138   : > { %p2405_p2 = pnand %p2403_p13, %p3422_p7 }
 0x13a   : > { %p2406_p10 = pneg %p2405_p2 }
 0x13c   : > { %p2411_p1 = pnand %p2409_p5, %p2406_p10 }
 0x13e   : > { %2414 = shalt.err (!%p2411_p1)
}
 0x13f   : > { %s2415_s1 = scalar_lea.vmem %s459_s29, 16  ;;  %s2422_s28 = scalar_lea.vmem %s459_s29, 32 }
 0x140   : > { %p2416_p11 = scmp.ne.s32.totalorder %s459_s29, %s2415_s1  ;;  %p2423_p4 = scmp.lt.s32.totalorder %s459_s29, %s459_s29 }
 0x141   : > { %p2424_p6 = scmp.lt.s32.totalorder %s2422_s28, %s2415_s1 }
 0x142   : > { %p2418_p0 = pnand %p2416_p11, %p3422_p7 }
 0x143   : > { %p2425_p8 = por %p2424_p6, %p2423_p4 }
 0x144   : > { %p2419_p12 = pneg %p2418_p0 }
 0x146   : > { %p2426_p9 = pnand %p2425_p8, %p2419_p12 }
 0x148   : > { %2429 = shalt.err (!%p2426_p9)
}
 0x149   : > { %2006 = dma.hbm_to_vmem [thread:$0]  (!%p3423_p3), %s3429_s0, 16, %s459_s29, [#allocation20]  }
 0x14a   : > { %s3430_s7 = sshll.u32 %s2600_s25, 4  ;;  %s3431_s22 = sld [smem:[#allocation54_spill]] }
 0x14b   : > { %s510_s16 = scalar_lea.vmem [#allocation21], %s2889_s18  ;;  %p3433_p13 = scmp.ne.s32.totalorder %s3415_s8, 0 }
 0x14c   : > { %s517_s12 = sshll.u32 %s510_s16, 4  ;;  %s518_s12 = int_to_ptr.vmem [resolvable:$true] %s517_s12 }
 0x150   : > { %s3432_s14 = smov %s3431_s22  ;;  %s3073_s26 = scalar_lea.hbm %s3431_s22, %s3430_s7 }
 0x151   : > { %s2430_s13 = scalar_lea.hbm %s3073_s26, 16  ;;  %s2435_s15 = scalar_lea.hbm %s3432_s14, 32 }
 0x152   : > { %p2431_p7 = scmp.ne.s32.totalorder %s3073_s26, %s2430_s13  ;;  %p2436_p3 = scmp.lt.u32.totalorder %s3073_s26, %s3432_s14 }
 0x153   : > { %p2437_p5 = scmp.lt.u32.totalorder %s2435_s15, %s2430_s13  ;;  %p2439_p11 = scmp.lt.u32.totalorder %s2430_s13, %s3073_s26 }
 0x154   : > { %p2433_p2 = pnand %p2431_p7, %p3433_p13 }
 0x155   : > { %p2438_p1 = por %p2437_p5, %p2436_p3 }
 0x156   : > { %p2434_p10 = pneg %p2433_p2 }
 0x157   : > { %p2440_p0 = por %p2439_p11, %p2438_p1 }
 0x159   : > { %p2441_p12 = pnand %p2440_p0, %p2434_p10 }
 0x15b   : > { %2444 = shalt.err (!%p2441_p12)
}
 0x15c   : > { %s2445_s18 = scalar_lea.vmem %s518_s12, 16  ;;  %s2622_s1 = smov [#allocation21]  }
 0x15d   : > { %p2446_p4 = scmp.ne.s32.totalorder %s518_s12, %s2445_s18  ;;  %s2450_s28 = sshll.u32 %s2622_s1, 4  ;;  %s2451_s28 = int_to_ptr.vmem [resolvable:$false] %s2450_s28 }
 0x15e   : > { %s2452_s19 = scalar_lea.vmem %s2451_s28, 32  ;;  %p2453_p9 = scmp.lt.s32.totalorder %s518_s12, %s2451_s28 }
 0x15f   : > { %p2448_p6 = pnand %p2446_p4, %p3433_p13  ;;  %p2454_p7 = scmp.lt.s32.totalorder %s2452_s19, %s2445_s18 }
 0x161   : > { %p2449_p8 = pneg %p2448_p6  ;;  %p2455_p2 = por %p2454_p7, %p2453_p9 }
 0x163   : > { %p2456_p3 = pnand %p2455_p2, %p2449_p8 }
 0x165   : > { %2459 = shalt.err (!%p2456_p3)
}
 0x166   : > { %p3434_p5 = scmp.ne.s32.totalorder %s3413_s17, 0  ;;  %s2460_s20 = scalar_lea.hbm %s2950_s9, 256 }
 0x167   : > { %p2461_p10 = scmp.ne.s32.totalorder %s2950_s9, %s2460_s20  ;;  %s2465_s24 = scalar_lea.hbm %s3337_s11, 512 }
 0x168   : > { %2016 = dma.hbm_to_vmem [thread:$0]  (!%p3434_p5), %s3073_s26, 16, %s518_s12, %s2912_s5  }
 0x169   : > { %p2463_p1 = pnand %p2461_p10, %p3433_p13  ;;  %p2466_p0 = scmp.lt.u32.totalorder %s2950_s9, %s3337_s11 }
 0x16a   : > { %p2467_p12 = scmp.lt.u32.totalorder %s2465_s24, %s2460_s20  ;;  %p2469_p6 = scmp.lt.u32.totalorder %s2460_s20, %s2950_s9 }
 0x16b   : > { %p2464_p11 = pneg %p2463_p1 }
 0x16c   : > { %p2468_p4 = por %p2467_p12, %p2466_p0 }
 0x16e   : > { %p2470_p8 = por %p2469_p6, %p2468_p4 }
 0x170   : > { %p2471_p9 = pnand %p2470_p8, %p2464_p11 }
 0x172   : > { %2474 = shalt.err (!%p2471_p9)
}
 0x173   : > { %s2475_s5 = scalar_lea.vmem %s2954_s10, 256  ;;  %s2623_s26 = smov [#allocation22]  }
 0x174   : > { %p2476_p7 = scmp.ne.s32.totalorder %s2954_s10, %s2475_s5  ;;  %s2480_s12 = sshll.u32 %s2623_s26, 4  ;;  %s2481_s12 = int_to_ptr.vmem [resolvable:$false] %s2480_s12 }
 0x175   : > { %s2482_s13 = scalar_lea.vmem %s2481_s12, 512  ;;  %p2483_p10 = scmp.lt.s32.totalorder %s2954_s10, %s2481_s12 }
 0x176   : > { %p2478_p2 = pnand %p2476_p7, %p3433_p13  ;;  %p2484_p1 = scmp.lt.s32.totalorder %s2482_s13, %s2475_s5 }
 0x178   : > { %p2479_p3 = pneg %p2478_p2  ;;  %p2485_p0 = por %p2484_p1, %p2483_p10 }
 0x17a   : > { %p2486_p12 = pnand %p2485_p0, %p2479_p3 }
 0x17c   : > { %2489 = shalt.err (!%p2486_p12)
}
 0x17d   : > { %s3435_s30 = smov 8   ;;  %s3436_s29 = smov 128  }
 0x17e   : > { %2019 = dma.hbm_to_vmem [thread:$0]  (!%p3434_p5), %s2950_s9, 256, %s2954_s10, %s2967_s3, %s3436_s29, %s3436_s29, %s3435_s30  }
 0x17f   : > { %s3437_s8 = sld [smem:[#allocation39_spill]] }
 0x185   : > { %p3438_p13 = scmp.ne.s32.totalorder %s3437_s8, 0 }
 0x186   : > { %s3439_s15 = sld [smem:[#allocation35_spill]] (!%p3438_p13)  ;;  %s551_s21 = sand.u32 (!%p3438_p13), 1, %s2727_s27  }
 0x187   : > { %549 = sbr.rel (%p3438_p13) target bundleno = 2201 (0x899), region = 68  ;;  %s3440_s2 = sld [smem:[#allocation41_spill]] (!%p3438_p13) }
 0x188   : > { %s552_s17 = scalar_lea.sflag (!%p3438_p13), [#allocation5], %s551_s21 }
 0x18c   : > { %s3123_s18 = sand.u32 (!%p3438_p13), 1, %s3439_s15  }
 0x18d   : > { %s3126_s1 = sshll.u32 (!%p3438_p13), %s3123_s18, 4  ;;  %p3441_p11 = scmp.ne.s32.totalorder (!%p3438_p13), %s3440_s2, 0 }
 0x18e   : > { %s555_s28 = scalar_lea.vmem [#allocation4], %s3126_s1 }
 0x18f   : > { %2543 = dma.done.wait (%p3441_p11), %s552_s17, 256  }
 0x190   : > { %2545 = vsyncadd (%p3441_p11), %s552_s17, 4294967040  ;;  %s561_s10 = scalar_lea.sflag [#allocation8], %s551_s21  ;;  %s563_s9 = scalar_lea.vmem [#allocation7], %s3123_s18 }
 0x191   : > { %2547 = dma.done.wait (%p3441_p11), %s561_s10, 16  }
 0x192   : > { %2549 = vsyncadd (%p3441_p11), %s561_s10, 4294967280  ;;  %p3442_p5 = scmp.eq.s32.totalorder %s2727_s27, 0 }
 0x194   : > { %2551 = dma.done.wait (%p3442_p5), [#allocation8], 512   ;;  %p3443_p4 = pmov %p3442_p5 }
 0x196   : > { %2553 = vsyncadd (%p3443_p4), [#allocation8], 4294966784  ;;  %p3444_p6 = pmov %p3443_p4 }
 0x197   : > { %p3445_p8 = pmov %p3443_p4 }
 0x198   : > { %2555 = dma.done.wait (%p3444_p6), [#allocation11], 1024  }
 0x199   : > { %2557 = vsyncadd (%p3445_p8), [#allocation11], 4294966272  ;;  %p3446_p9 = pmov %p3443_p4 }
 0x19a   : > { %p3447_p7 = pmov %p3443_p4 }
 0x19b   : > { %2559 = dma.done.wait (%p3446_p9), [#allocation14], 64  }
 0x19c   : > { %2561 = vsyncadd (%p3447_p7), [#allocation14], 4294967232  ;;  %p3448_p2 = pmov %p3443_p4 }
 0x19e   : > { %2563 = dma.done.wait (%p3448_p2), [#allocation17], 288   ;;  %p3449_p3 = pmov %p3448_p2 }
 0x19f   : > { %p3450_p10 = pmov %p3448_p2 }
 0x1a0   : > { %2565 = vsyncadd (%p3449_p3), [#allocation17], 4294967008 }
 0x1a1   : > { %2567 = dma.done.wait (%p3450_p10), [#allocation20], 16   ;;  %p3451_p1 = pmov %p3448_p2 }
 0x1a2   : > { %s603_s3 = scalar_lea.vmem [#allocation21], %s3123_s18 }
 0x1a3   : > { %2569 = vsyncadd (%p3451_p1), [#allocation20], 4294967280 }
 0x1a4   : > { %2571 = dma.done.wait (%p3441_p11), %s552_s17, 16  }
 0x1a5   : > { %2573 = vsyncadd (%p3441_p11), %s552_s17, 4294967280  ;;  %s612_s19 = scalar_lea.vmem [#allocation22], %s3126_s1 }
 0x1a6   : > { %2575 = dma.done.wait (%p3441_p11), %s561_s10, 256  }
 0x1a7   : > { %2577 = vsyncadd (%p3441_p11), %s561_s10, 4294967040  ;;  %v2624_v0 = vmov 0.0   ;;  %vm2625_vm0 = vmmov 0   ;;  %v2112_v1 = vld [vmem:[#allocation10] sm:$0xff]   ;;  %v2113_v2 = vld [vmem:[#allocation10 + $0x8] sm:$0xff]   ;;  %vm699_vm1 = vcmask 261120  }
 0x1a8   : > { %1856 = vmatprep.subr.bf16.mxu0 %v2624_v0  ;;  %1860 = vmatprep.mubr.msk.bf16.mxu0 %vm2625_vm0, %v2624_v0  ;;  %v3176_v3 = vld [vmem:[%s555_s28] sm:$0xff]  ;;  %v3180_v4 = vld [vmem:[%s555_s28 + $0x8] sm:$0xff]  ;;  %vm745_vm2 = vcmask 130048   ;;  %s2627_s27 = smov 96   ;;  %s3452_s20 = sld [smem:[#allocation37_spill]] }
 0x1a9   : > { %1864 = vmatprep.subr.bf16.mxu1 %v2624_v0  ;;  %1868 = vmatprep.mubr.msk.bf16.mxu1 %vm2625_vm0, %v2624_v0  ;;  %v3185_v5 = vpack.c.bf16 %v3180_v4, %v3176_v3  ;;  %v2114_v6 = vld [vmem:[#allocation10 + $0x10] sm:$0xff]   ;;  %v2118_v7 = vld [vmem:[#allocation12] sm:$0xff]   ;;  %v2115_v8 = vld [vmem:[#allocation10 + $0x18] sm:$0xff]   ;;  %s3453_s7 = sld [smem:[#allocation42_spill]]  ;;  %s665_s24 = scalar_lea.vmem [#allocation23], %s3126_s1 }
 0x1aa   : > { %1857 = vmatpush3.bf16.msra.mxu0 %v2112_v1  ;;  %v2119_v9 = vld [vmem:[#allocation12 + $0x8] sm:$0xff]   ;;  %1865 = vmatpush3.bf16.msra.mxu1 %v2118_v7  ;;  %v2116_v10 = vld [vmem:[#allocation9] sm:$0xff]   ;;  %v2120_v12 = vld [vmem:[#allocation12 + $0x10] sm:$0xff]   ;;  %s1529_s22 = sshll.u32 %s665_s24, 4  ;;  %s3454_s26 = sld [smem:[#allocation55_spill]]  ;;  %s3275_s22 = int_to_ptr.vmem [resolvable:$true] %s1529_s22 }
 0x1ab   : > { %1858 = vmatprep.subr.bf16.mxu0 %v2624_v0  ;;  %1866 = vmatprep.subr.bf16.mxu1 %v2624_v0  ;;  %v2117_v11 = vld [vmem:[#allocation9 + $0x8] sm:$0xff]   ;;  %v2121_v13 = vld [vmem:[#allocation12 + $0x18] sm:$0xff]   ;;  %v1783_v14 = vld [vmem:[#allocation15] ss:$0 sm:$0xff]  ;;  %s1514_s30 = scalar_lea.sflag [#allocation6], %s3123_s18  ;;  %s2490_s29 = scalar_lea.vmem %s3275_s22, 256 }
 0x1ac   : > { %v1787_v22 = vld [vmem:[#allocation16] ss:$0 sm:$0xff]  ;;  %v1791_v24 = vld [vmem:[#allocation15 + $0x1] ss:$0 sm:$0xff]  ;;  %v1799_v38 = vld [vmem:[#allocation13] ss:$0 sm:$0xff]  ;;  %p2491_p0 = scmp.ne.s32.totalorder %s3275_s22, %s2490_s29 }
 0x1ad   : > { %v2122_v50 = vld [vmem:[#allocation9 + $0x10] sm:$0xff]   ;;  %v2123_v52 = vld [vmem:[#allocation9 + $0x18] sm:$0xff]   ;;  %v1795_v53 = vld [vmem:[#allocation16 + $0x1] ss:$0 sm:$0xff]  ;;  %s2628_s8 = smov [#allocation23]  }
 0x1ae   : > { %1859 = vmatpush3.bf16.msra.mxu0 %v2113_v2  ;;  %1867 = vmatpush3.bf16.msra.mxu1 %v2119_v9  ;;  %v1803_v62 = vld [vmem:[%s563_s9] ss:$0 sm:$0xff]  ;;  %s1825_s23 = sshll.u32 %s3452_s20, 8  ;;  %s2494_s15 = sshll.u32 %s2628_s8, 4  ;;  %s2495_s15 = int_to_ptr.vmem [resolvable:$false] %s2494_s15 }
 0x1af   : > { %1872 = vmatprep.subr.bf16.mxu0 %v2624_v0  ;;  %1880 = vmatprep.subr.bf16.mxu1 %v2624_v0  ;;  %p3456_p12 = scmp.ne.s32.totalorder %s3453_s7, 0  ;;  %s2496_s2 = scalar_lea.vmem %s2495_s15, 512 }
 0x1b0   : > { %s3455_s12 = smov %s3454_s26  ;;  %s3273_s13 = scalar_lea.hbm %s3454_s26, %s1825_s23 }
 0x1b1   : > { %1861 = vmatmul.mubr.msk.bf16.vlgmr.msra.gmra.mrb[0].mxu0 %vm699_vm1, %v3185_v5  ;;  %1869 = vmatmul.mubr.msk.bf16.vlgmr.msra.gmra.mrb[0].mxu1 %vm699_vm1, %v3185_v5  ;;  %p2492_p13 = pnand %p2491_p0, %p3456_p12  ;;  %p2497_p5 = scmp.lt.s32.totalorder %s3275_s22, %s2495_s15 }
 0x1b2   : > { %1873 = vmatpush3.bf16.msra.mxu0 %v2114_v6  ;;  %1876 = vmatprep.mubr.msk.bf16.mxu0 %vm2625_vm0, %v2624_v0  ;;  %p2498_p4 = scmp.lt.s32.totalorder %s2496_s2, %s2490_s29 }
 0x1b3   : > { %1874 = vmatprep.subr.bf16.mxu0 %v2624_v0  ;;  %1884 = vmatprep.mubr.msk.bf16.mxu1 %vm2625_vm0, %v2624_v0  ;;  %p2493_p11 = pneg %p2492_p13 }
 0x1b4   : > { %1881 = vmatpush3.bf16.msra.mxu1 %v2120_v12  ;;  %p2499_p6 = por %p2498_p4, %p2497_p5 }
 0x1b5   : > { %1882 = vmatprep.subr.bf16.mxu1 %v2624_v0 }
 0x1b6   : > { %1875 = vmatpush3.bf16.msra.mxu0 %v2115_v8  ;;  %p2500_p8 = pnand %p2499_p6, %p2493_p11 }
 0x1b7   : > { %1888 = vmatprep.subr.bf16.mxu0 %v2624_v0 }
 0x1b8   : > { %1883 = vmatpush3.bf16.msra.mxu1 %v2121_v13 }
 0x1b9   : > { %1877 = vmatmul.mubr.msk.bf16.vlgmr.msra.gmra.mrb[4].mxu0 %vm699_vm1, %v3185_v5  ;;  %1896 = vmatprep.subr.bf16.mxu1 %v2624_v0 }
 0x1ba   : > { %1889 = vmatpush3.bf16.msra.mxu0 %v2116_v10  ;;  %1892 = vmatprep.mubr.msk.bf16.mxu0 %vm2625_vm0, %v2624_v0  ;;  %v1806_v10 = vld [vmem:[#allocation13 + $0x1] ss:$0 sm:$0xff] }
 0x1bb   : > { %1890 = vmatprep.subr.bf16.mxu0 %v2624_v0  ;;  %1885 = vmatmul.mubr.msk.bf16.vlgmr.msra.gmra.mrb[4].mxu1 %vm699_vm1, %v3185_v5 }
 0x1bc   : > { %1898 = vmatprep.mubr.msk.bf16.mxu1 %vm2625_vm0, %v2624_v0 }
 0x1be   : > { %1891 = vmatpush3.bf16.msra.mxu0 %v2117_v11 }
 0x1bf   : > { %1902 = vmatprep.subr.bf16.mxu0 %v2624_v0 }
 0x1c1   : > { %1893 = vmatmul.mubr.msk.bf16.vlgmr.msra.gmra.mrb[8].mxu0 %vm699_vm1, %v3185_v5 }
 0x1c2   : > { %1904 = vmatprep.mubr.msk.bf16.mxu0 %vm2625_vm0, %v2624_v0 }
 0x284   : > { %v737_v15 = vpop.f32.mrb[0].mxu0  ;;  %v804_v23 = vpop.f32.mrb[0].mxu1 }
 0x285   : > { %v1862_v16 = vpop.f32.mrb[1].mxu0  ;;  %v738_v18 = vadd.f32 %v1783_v14, %v737_v15  ;;  %v805_v26 = vadd.f32 %v1787_v22, %v804_v23  ;;  %v1870_v27 = vpop.f32.mrb[1].mxu1 }
 0x286   : > { %v740_v17 = vpop.f32.mrb[2].mxu0  ;;  %v807_v29 = vpop.f32.mrb[2].mxu1 }
 0x287   : > { %v741_v19 = vadd.f32 %v1783_v14, %v740_v17  ;;  %v1863_v20 = vpop.f32.mrb[3].mxu0  ;;  %v808_v31 = vadd.f32 %v1787_v22, %v807_v29  ;;  %v1871_v32 = vpop.f32.mrb[3].mxu1 }
 0x289   : > { %v744_v21 = vpack.c.bf16 %v741_v19, %v738_v18  ;;  %v811_v36 = vpack.c.bf16 %v808_v31, %v805_v26 }
 0x28b   : > { %746 = vst.msk [vmem:[#allocation2] sm:$0xff] %vm745_vm2, %v744_v21  ;;  %812 = vst.msk [vmem:[#allocation3] sm:$0xff] %vm745_vm2, %v811_v36 }
 0x28c   : > { %v872_v25 = vpop.f32.mrb[4].mxu0 }
 0x28d   : > { %v1878_v28 = vpop.f32.mrb[5].mxu0  ;;  %v873_v33 = vadd.f32 %v1791_v24, %v872_v25 }
 0x28e   : > { %v875_v30 = vpop.f32.mrb[6].mxu0  ;;  %v941_v54 = vpop.f32.mrb[4].mxu1 }
 0x28f   : > { %v876_v34 = vadd.f32 %v1791_v24, %v875_v30  ;;  %v1879_v35 = vpop.f32.mrb[7].mxu0  ;;  %v942_v55 = vadd.f32 %v1795_v53, %v941_v54  ;;  %v1886_v56 = vpop.f32.mrb[5].mxu1 }
 0x290   : > { %v944_v57 = vpop.f32.mrb[6].mxu1 }
 0x291   : > { %v879_v37 = vpack.c.bf16 %v876_v34, %v873_v33  ;;  %v945_v58 = vadd.f32 %v1795_v53, %v944_v57  ;;  %v1887_v59 = vpop.f32.mrb[7].mxu1  ;;  %v2124_v57 = vld [vmem:[#allocation18] sm:$0xff]  }
 0x292   : > { %v1028_v39 = vld [vmem:[#allocation2] sm:$0xff]  ;;  %v1102_v49 = vld [vmem:[#allocation3] sm:$0xff] }
 0x293   : > { %881 = vst.msk [vmem:[#allocation2 + $0x8] sm:$0xff] %vm745_vm2, %v879_v37  ;;  %v1040_v40 = vsel %vm745_vm2, %v1028_v39, 0  ;;  %1903 = vmatpush3.bf16.msra.mxu0 %v1102_v49  ;;  %v948_v60 = vpack.c.bf16 %v945_v58, %v942_v55 }
 0x294   : > { %v1018_v41 = vpop.f32.mrb[8].mxu0  ;;  %1897 = vmatpush3.bf16.xpose.msra.mxu1 %v1040_v40  ;;  %1916 = vmatprep.subr.bf16.mxu0 %v2624_v0 }
 0x295   : > { %v1019_v42 = vadd.f32 %v1799_v38, %v1018_v41  ;;  %v1894_v43 = vpop.f32.mrb[9].mxu0  ;;  %1908 = vmatprep.subr.bf16.mxu1 %v2624_v0  ;;  %950 = vst.msk [vmem:[#allocation3 + $0x8] sm:$0xff] %vm745_vm2, %v948_v60 }
 0x296   : > { %v1021_v44 = vpop.f32.mrb[10].mxu0 }
 0x297   : > { %v1022_v45 = vadd.f32 %v1799_v38, %v1021_v44  ;;  %v1895_v46 = vpop.f32.mrb[11].mxu0  ;;  %v1025_v47 = vmul.f32 0.25, %v1019_v42 }
 0x299   : > { %v1026_v48 = vmul.f32 0.25, %v1022_v45 }
 0x29a   : > { %v1224_v29 = vld [vmem:[#allocation2 + $0x8] sm:$0xff] }
 0x29b   : > { %v1027_v51 = vpack.c.bf16 %v1026_v48, %v1025_v47  ;;  %v1229_v31 = vsel %vm745_vm2, %v1224_v29, 0 }
 0x29c   : > { %v1292_v61 = vld [vmem:[#allocation3 + $0x8] sm:$0xff] }
 0x29d   : > { %1899 = vmatmul.mubr.msk.bf16.vlgmr.msra.gmra.mrb[8].mxu1 %vm745_vm2, %v1027_v51 }
 0x29e   : > { %1909 = vmatpush3.bf16.msra.mxu1 %v2122_v50  ;;  %1912 = vmatprep.mubr.msk.bf16.mxu1 %vm2625_vm0, %v2624_v0 }
 0x29f   : > { %1910 = vmatprep.subr.bf16.mxu1 %v2624_v0 }
 0x2a2   : > { %1911 = vmatpush3.bf16.msra.mxu1 %v2123_v52 }
 0x2a3   : > { %1922 = vmatprep.subr.bf16.mxu1 %v2624_v0 }
 0x2a5   : > { %1913 = vmatmul.mubr.msk.bf16.vlgmr.msra.gmra.mrb[12].mxu1 %vm699_vm1, %v3185_v5 }
 0x2a6   : > { %1924 = vmatprep.mubr.msk.bf16.mxu1 %vm2625_vm0, %v2624_v0  ;;  %1923 = vmatpush3.bf16.msra.mxu1 %v1292_v61 }
 0x2a7   : > { %1934 = vmatprep.subr.bf16.mxu1 %v2624_v0 }
 0x370   : > { %v1076_v63 = vpop.f32.mrb[8].mxu1 }
 0x371   : > { %v1077_v1 = vadd.f32 %v1803_v62, %v1076_v63  ;;  %v1900_v2 = vpop.f32.mrb[9].mxu1 }
 0x372   : > { %v1079_v5 = vpop.f32.mrb[10].mxu1 }
 0x373   : > { %v1080_v6 = vadd.f32 %v1803_v62, %v1079_v5  ;;  %v1901_v7 = vpop.f32.mrb[11].mxu1  ;;  %v1083_v8 = vsel %vm745_vm2, %v1077_v1, -inf }
 0x374   : > { %1084 = vmax.xlane.f32.xlu0 %v1083_v8 }
 0x375   : > { %v1086_v9 = vsel %vm745_vm2, %v1080_v6, -inf }
 0x378   : > { %1087 = vmax.xlane.f32.xlu0 %v1086_v9  ;;  %v1213_v11 = vpop.f32.mrb[12].mxu1 }
 0x379   : > { %v1214_v12 = vadd.f32 %v1806_v10, %v1213_v11  ;;  %v1914_v13 = vpop.f32.mrb[13].mxu1 }
 0x37a   : > { %v1216_v14 = vpop.f32.mrb[14].mxu1 }
 0x37b   : > { %v1220_v15 = vmul.f32 0.25, %v1214_v12  ;;  %v1217_v16 = vadd.f32 %v1806_v10, %v1216_v14  ;;  %v1915_v17 = vpop.f32.mrb[15].mxu1 }
 0x37d   : > { %v1221_v18 = vmul.f32 0.25, %v1217_v16 }
 0x37f   : > { %v1222_v19 = vpack.c.bf16 %v1221_v18, %v1220_v15  ;;  %v2626_v18 = vmov 0  }
 0x380   : > { %2111 = vset.pattern.permute.xlu1 %v2626_v18  ;;  %2110 = vset.pattern.permute.xlu0 %v2626_v18 }
 0x401   : > { %v1085_v20 = vpop.xlane.xlu0 %1084 }
 0x402   : > { %v1089_v21 = vsub.f32 %v1077_v1, %v1085_v20  ;;  %v2125_v1 = vld [vmem:[#allocation18 + $0x8] sm:$0xff]   ;;  %v1816_v20 = vld [vmem:[#allocation19] ss:$0 sm:$0xff] }
 0x404   : > { %v1091_v22 = vmul.f32 1.442695, %v1089_v21 }
 0x405   : > { %v1088_v23 = vpop.xlane.xlu0 %1087 }
 0x406   : > { %2126 = vpow2.f32 %v1091_v22  ;;  %v1090_v24 = vsub.f32 %v1080_v6, %v1088_v23 }
 0x408   : > { %v1093_v25 = vmul.f32 1.442695, %v1090_v24 }
 0x40a   : > { %2128 = vpow2.f32 %v1093_v25 }
 0x410   : > { %v2127_v26 = vpop.eup %2126 }
 0x411   : > { %v1095_v27 = vsel %vm745_vm2, %v2127_v26, 0.0 }
 0x412   : > { %1096 = vadd.xlane.f32.xlu0 %v1095_v27 }
 0x414   : > { %v2129_v28 = vpop.eup %2128 }
 0x415   : > { %v1101_v30 = vpack.c.bf16 %v2129_v28, %v2127_v26  ;;  %v1098_v44 = vsel %vm745_vm2, %v2129_v28, 0.0 }
 0x417   : > { %1905 = vmatmul.mubr.msk.bf16.vlgmr.msra.gmra.mrb[12].mxu0 %vm745_vm2, %v1101_v30 }
 0x418   : > { %1917 = vmatpush3.bf16.xpose.msra.mxu0 %v1229_v31  ;;  %1918 = vmatprep.mubr.msk.bf16.mxu0 %vm2625_vm0, %v2624_v0 }
 0x419   : > { %1928 = vmatprep.subr.bf16.mxu0 %v2624_v0 }
 0x41f   : > { %1919 = vmatmul.mubr.msk.bf16.vlgmr.msra.gmra.mrb[16].mxu0 %vm745_vm2, %v1222_v19 }
 0x420   : > { %1930 = vmatprep.mubr.msk.bf16.mxu0 %vm2625_vm0, %v2624_v0  ;;  %1929 = vmatpush3.bf16.msra.mxu0 %v2125_v1 }
 0x49f   : > { %v1097_v49 = vpop.xlane.xlu0 %1096 }
 0x4ea   : > { %v1140_v32 = vpop.f32.mrb[12].mxu0 }
 0x4eb   : > { %v1906_v33 = vpop.f32.mrb[13].mxu0 }
 0x4ec   : > { %v1143_v34 = vpop.f32.mrb[14].mxu0 }
 0x4ed   : > { %v1907_v35 = vpop.f32.mrb[15].mxu0 }
 0x4f2   : > { %v1265_v36 = vpop.f32.mrb[16].mxu0 }
 0x4f3   : > { %v1266_v37 = vadd.f32 %v1803_v62, %v1265_v36  ;;  %v1920_v38 = vpop.f32.mrb[17].mxu0 }
 0x4f4   : > { %v1268_v39 = vpop.f32.mrb[18].mxu0 }
 0x4f5   : > { %v1269_v40 = vadd.f32 %v1803_v62, %v1268_v39  ;;  %v1921_v41 = vpop.f32.mrb[19].mxu0  ;;  %v1272_v42 = vsel %vm745_vm2, %v1266_v37, -inf }
 0x4f6   : > { %1273 = vmax.xlane.f32.xlu1 %v1272_v42  ;;  %v1817_v41 = vld [vmem:[%s603_s3] ss:$0 sm:$0xff] }
 0x4f7   : > { %v1275_v43 = vsel %vm745_vm2, %v1269_v40, -inf  ;;  %v1497_v42 = vld [vmem:[%s612_s19] sm:$0xff] }
 0x4fa   : > { %1276 = vmax.xlane.f32.xlu1 %v1275_v43 }
 0x4fe   : > { %1099 = vadd.xlane.f32.xlu1 %v1098_v44 }
 0x583   : > { %v1274_v45 = vpop.xlane.xlu1 %1273 }
 0x584   : > { %v1278_v46 = vsub.f32 %v1266_v37, %v1274_v45 }
 0x586   : > { %v1280_v47 = vmul.f32 1.442695, %v1278_v46 }
 0x587   : > { %v1277_v48 = vpop.xlane.xlu1 %1276 }
 0x588   : > { %2130 = vpow2.f32 %v1280_v47  ;;  %v1279_v50 = vsub.f32 %v1269_v40, %v1277_v48 }
 0x589   : > { %2132 = vrcp.f32 %v1097_v49 }
 0x58a   : > { %v1282_v51 = vmul.f32 1.442695, %v1279_v50 }
 0x58b   : > { %v1100_v52 = vpop.xlane.xlu1 %1099 }
 0x58c   : > { %2134 = vpow2.f32 %v1282_v51 }
 0x58d   : > { %2136 = vrcp.f32 %v1100_v52 }
 0x592   : > { %v2131_v53 = vpop.eup %2130 }
 0x593   : > { %v1284_v54 = vsel %vm745_vm2, %v2131_v53, 0.0  ;;  %v2133_v55 = vpop.eup %2132 }
 0x594   : > { %1285 = vadd.xlane.f32.xlu0 %v1284_v54  ;;  %v1149_v61 = vmul.f32 %v2133_v55, %v1140_v32  ;;  %v1498_v32 = vld [vmem:[%s612_s19 + $0x8] sm:$0xff] }
 0x596   : > { %v2135_v56 = vpop.eup %2134 }
 0x597   : > { %v2137_v58 = vpop.eup %2136  ;;  %v1287_v59 = vsel %vm745_vm2, %v2135_v56, 0.0  ;;  %v1290_v60 = vpack.c.bf16 %v2135_v56, %v2131_v53 }
 0x598   : > { %v1150_v62 = vmul.f32 %v2137_v58, %v1143_v34  ;;  %1288 = vadd.xlane.f32.xlu1 %v1287_v59 }
 0x599   : > { %1925 = vmatmul.mubr.msk.bf16.vlgmr.msra.gmra.mrb[16].mxu1 %vm745_vm2, %v1290_v60 }
 0x59a   : > { %1935 = vmatpush3.bf16.msra.mxu1 %v2124_v57  ;;  %1936 = vmatprep.mubr.msk.bf16.mxu1 %vm2625_vm0, %v2624_v0  ;;  %v1151_v63 = vpack.c.bf16 %v1150_v62, %v1149_v61 }
 0x5a1   : > { %1937 = vmatmul.mubr.msk.bf16.vlgmr.msra.gmra.mrb[20].mxu1 %vm745_vm2, %v1151_v63 }
 0x621   : > { %v1286_v2 = vpop.xlane.xlu0 %1285 }
 0x622   : > { %2138 = vrcp.f32 %v1286_v2 }
 0x625   : > { %v1289_v5 = vpop.xlane.xlu1 %1288 }
 0x626   : > { %2140 = vrcp.f32 %v1289_v5 }
 0x62c   : > { %v2139_v7 = vpop.eup %2138 }
 0x630   : > { %v2141_v9 = vpop.eup %2140 }
 0x66c   : > { %v1330_v6 = vpop.f32.mrb[16].mxu1 }
 0x66d   : > { %v1926_v8 = vpop.f32.mrb[17].mxu1  ;;  %v1339_v11 = vmul.f32 %v2139_v7, %v1330_v6 }
 0x66e   : > { %v1333_v10 = vpop.f32.mrb[18].mxu1 }
 0x66f   : > { %v1340_v12 = vmul.f32 %v2141_v9, %v1333_v10  ;;  %v1927_v13 = vpop.f32.mrb[19].mxu1 }
 0x671   : > { %v1341_v14 = vpack.c.bf16 %v1340_v12, %v1339_v11 }
 0x673   : > { %1931 = vmatmul.mubr.msk.bf16.vlgmr.msra.gmra.mrb[20].mxu0 %vm745_vm2, %v1341_v14 }
 0x674   : > { %v1438_v0 = vpop.f32.mrb[20].mxu1 }
 0x675   : > { %v1938_v15 = vpop.f32.mrb[21].mxu1 }
 0x676   : > { %v1441_v16 = vpop.f32.mrb[22].mxu1 }
 0x677   : > { %v1939_v17 = vpop.f32.mrb[23].mxu1 }
 0x746   : > { %v1388_v19 = vpop.f32.mrb[20].mxu0 }
 0x747   : > { %v1439_v21 = vadd.f32 %v1438_v0, %v1388_v19  ;;  %v1932_v22 = vpop.f32.mrb[21].mxu0 }
 0x748   : > { %v1391_v23 = vpop.f32.mrb[22].mxu0 }
 0x749   : > { %v1452_v24 = vadd.f32 %v1816_v20, %v1439_v21  ;;  %v1442_v25 = vadd.f32 %v1441_v16, %v1391_v23  ;;  %v1933_v26 = vpop.f32.mrb[23].mxu0 }
 0x74b   : > { %v1453_v27 = vadd.f32 %v1816_v20, %v1442_v25  ;;  %v1454_v28 = vadd.f32 %v1452_v24, %v3176_v3 }
 0x74d   : > { %v1457_v29 = vsel %vm699_vm1, %v1454_v28, 0.0  ;;  %v1455_v30 = vadd.f32 %v1453_v27, %v3180_v4 }
 0x74e   : > { %1458 = vadd.xlane.f32.xlu0 %v1457_v29 }
 0x74f   : > { %v1460_v31 = vsel %vm699_vm1, %v1455_v30, 0.0 }
 0x750   : > { %1461 = vadd.xlane.f32.xlu1 %v1460_v31 }
 0x761   : > { %1506 = vperm.xlu1 %2111, %v1498_v32  }
 0x7db   : > { %v1459_v33 = vpop.xlane.xlu0 %1458 }
 0x7dc   : > { %v1464_v34 = vmul.f32 0.03125, %v1459_v33 }
 0x7dd   : > { %v1462_v35 = vpop.xlane.xlu1 %1461 }
 0x7de   : > { %v1466_v36 = vsub.f32 %v1454_v28, %v1464_v34  ;;  %v1465_v37 = vmul.f32 0.03125, %v1462_v35 }
 0x7e0   : > { %v1467_v38 = vsub.f32 %v1455_v30, %v1465_v37  ;;  %v1468_v3 = vmul.f32 %v1466_v36, %v1466_v36 }
 0x7e1   : > { %v1507_v43 = vpop.permute.xlu1 %1506 }
 0x7e2   : > { %v1470_v39 = vsel %vm699_vm1, %v1468_v3, 0.0  ;;  %v1469_v40 = vmul.f32 %v1467_v38, %v1467_v38 }
 0x7e3   : > { %1471 = vadd.xlane.f32.xlu0 %v1470_v39 }
 0x7e4   : > { %v1473_v4 = vsel %vm699_vm1, %v1469_v40, 0.0 }
 0x7e5   : > { %1474 = vadd.xlane.f32.xlu1 %v1473_v4 }
 0x7f6   : > { %1492 = vrot.lane.b32.xlu1 %v1817_v41, %s2627_s27 }
 0x7f9   : > { %1501 = vperm.xlu0 %2110, %v1497_v42  }
 0x870   : > { %v1472_v44 = vpop.xlane.xlu0 %1471 }
 0x871   : > { %v1476_v45 = vmul.f32 0.03125, %v1472_v44 }
 0x872   : > { %v1475_v46 = vpop.xlane.xlu1 %1474 }
 0x873   : > { %v1478_v47 = vadd.f32 1e-05, %v1476_v45  ;;  %v1477_v48 = vmul.f32 0.03125, %v1475_v46 }
 0x875   : > { %2142 = vrsqrt.f32 %v1478_v47  ;;  %v1479_v49 = vadd.f32 1e-05, %v1477_v48 }
 0x876   : > { %v1493_v53 = vpop.permute.xlu1 %1492 }
 0x877   : > { %2144 = vrsqrt.f32 %v1479_v49 }
 0x878   : > { %v1502_v56 = vpop.permute.xlu0 %1501 }
 0x87f   : > { %v2143_v50 = vpop.eup %2142 }
 0x880   : > { %v1482_v51 = vmul.f32 %v2143_v50, %v1466_v36 }
 0x881   : > { %v2145_v52 = vpop.eup %2144 }
 0x882   : > { %v1483_v54 = vmul.f32 %v2145_v52, %v1467_v38  ;;  %v1490_v55 = vmul.f32 %v1817_v41, %v1482_v51 }
 0x884   : > { %v1491_v57 = vmul.f32 %v1817_v41, %v1483_v54  ;;  %v1495_v58 = vadd.f32 %v1493_v53, %v1490_v55 }
 0x886   : > { %v1496_v59 = vadd.f32 %v1493_v53, %v1491_v57  ;;  %v1509_v60 = vmul.f32 %v1502_v56, %v1495_v58 }
 0x888   : > { %v1510_v61 = vmul.f32 %v1507_v43, %v1496_v59  ;;  %1511 = vst.msk [vmem:[%s665_s24] sm:$0xff] %vm699_vm1, %v1509_v60 }
 0x88a   : > { %1512 = vst.msk [vmem:[%s665_s24 + $0x8] sm:$0xff] %vm699_vm1, %v1510_v61 }
 0x88b   : > { %2503 = shalt.err (!%p2500_p8)
}
 0x88c   : > { %s2504_s21 = scalar_lea.hbm %s3273_s13, 256  ;;  %s2508_s28 = scalar_lea.hbm %s3455_s12, 512 }
 0x88d   : > { %p2505_p9 = scmp.ne.s32.totalorder %s3273_s13, %s2504_s21  ;;  %p2509_p3 = scmp.lt.u32.totalorder %s3273_s13, %s3455_s12 }
 0x88e   : > { %p2510_p10 = scmp.lt.u32.totalorder %s2508_s28, %s2504_s21  ;;  %p2512_p0 = scmp.lt.u32.totalorder %s2504_s21, %s3273_s13 }
 0x88f   : > { %p2506_p7 = pnand %p2505_p9, %p3456_p12 }
 0x890   : > { %p2511_p1 = por %p2510_p10, %p2509_p3 }
 0x891   : > { %p2507_p2 = pneg %p2506_p7 }
 0x892   : > { %p2513_p13 = por %p2512_p0, %p2511_p1 }
 0x894   : > { %p2514_p11 = pnand %p2513_p13, %p2507_p2 }
 0x896   : > { %2517 = shalt.err (!%p2514_p11)
}
 0x897   : > { %s2629_s3 = smov 128   ;;  %s2630_s19 = smov 8  }
 0x898   : > { %1980 = dma.vmem_to_hbm [thread:$0]  (%p3456_p12), %s3275_s22, 256, %s3273_s13, %s1514_s30, %s2629_s3, %s2629_s3, %s2630_s19  }
 0x899 PF: > { %s3457_s27 = sld [smem:[#allocation34_spill]]  ;;  %s3458_s20 = sld [smem:[#allocation44_spill]] }
 0x89a   : > { %s3459_s23 = sld [smem:[#allocation38_spill]] }
 0x89f   : > { %s1544_s24 = sand.u32 1, %s3457_s27   ;;  %p3460_p5 = scmp.ne.s32.totalorder %s3458_s20, 0 }
 0x8a0   : > { %p3461_p4 = scmp.ge.s32.totalorder %s3459_s23, 2  ;;  %s1545_s16 = scalar_lea.sflag [#allocation6], %s1544_s24 }
 0x8a2   : > { %p2021_p6 = pnand %p3461_p4, %p3460_p5 }
 0x8a4   : > { %2579 = dma.done.wait (!%p2021_p6), %s1545_s16, 256  }
 0x8a5   : > { %2581 = vsyncadd (!%p2021_p6), %s1545_s16, 4294967040  ;;  %s35_s26 = sadd.s32 1, %s3459_s23   ;;  %s3462_s21 = sld [smem:[#allocation35_spill]] }
 0x8a6   : > { %p32_p8 = scmp.ge.s32.totalorder %s35_s26, 4   ;;  %s3463_s22 = sld [smem:[#allocation36_spill]] }
 0x8a7   : > { %s3464_s23 = sld [smem:[#allocation43_spill]]  ;;  %s3465_s18 = sld [smem:[#allocation40_spill]] }
 0x8a8   : > { %s3466_s24 = smov %s2600_s25  ;;  %34 = sbr.rel (!%p32_p8) target bundleno = 24 (0x18), region = 196 }
 0x8ad   : > { %s3467_s25 = smov %s3465_s18 }
 0x8af   :  { %1550 = vsyncpa [#allocation5], 1 }
 0x8b0   :  { %1552 = vsyncpa [#allocation5 + $0x1], 1 }
 0x8b1   :  { %1553 = vsyncpa [#allocation8], 1 }
 0x8b2   :  { %1555 = vsyncpa [#allocation8 + $0x1], 1 }
 0x8b3   :  { %1556 = vsyncpa [#allocation11], 1 }
 0x8b4   :  { %1557 = vsyncpa [#allocation14], 1 }
 0x8b5   :  { %1558 = vsyncpa [#allocation17], 1 }
 0x8b6   :  { %1559 = vsyncpa [#allocation20], 1 }
 0x8b7   :  { %1560 = vsyncpa [#allocation6], 1 }
 0x8b8   :  { %1562 = vsyncpa [#allocation6 + $0x1], 1 }

</bundles_post_ra>
